<compile_context>
chip_gen: v5e
topology: v5e:2x2
jax: 0.10.0
libtpu: 0.0.40
codegen_flags: <defaults>
</compile_context>

<pallas_src>
import jax
import jax.numpy as jnp
import numpy as np
from jax import lax
from jax.experimental import pallas as pl
from jax.experimental.pallas import tpu as pltpu

# ------------------------------ dimensions ---------------------------------
B, S, H = 2, 8, 32          # batch, sequence, hidden (logical)
NUM_HEADS = 4
HEAD_DIM = H // NUM_HEADS
D_FF = 64
VOCAB = 64
NUM_LAYERS = 2
PAD_ID = 1                  # forward uses source_ids.ne(1) as attention mask

# lane-padded (vreg-dense) sizes used inside the kernel
HP = 128                    # hidden padded to the 128-lane vreg width
FP = 128                    # d_ff padded
VP = 128                    # vocab padded
SUB, LANES = 8, 128         # output slab tile
_INV_H = 1.0 / H


def _rmsnorm(x, w):
    # T5-style RMSNorm. x is zero-padded beyond lane H, so the variance must
    # be sum/H (not a mean over the padded 128 lanes).
    var = jnp.sum(x * x, axis=-1, keepdims=True) * _INV_H
    return x * lax.rsqrt(var + 1e-6) * w


# ---------------------------------------------------------------------------
# Fused Pallas kernel: embedding + mask + encoder + classifier + sigmoid + BCE
# One grid step == one batch element.
# ---------------------------------------------------------------------------
def codet5_fused_kernel(ids_row_ref, ids_col_ref, embed_ref, wqkv_ref, wo_ref,
                        ln1_ref, wi_ref, wo2_ref, ln2_ref, lnf_ref, clsw_ref,
                        clsb_ref, y_ref, prob_ref, ll_ref):
    ids_row = ids_row_ref[...].reshape(1, S)        # token ids, lanes = seq
    ids_col = ids_col_ref[...].reshape(S, 1)        # token ids, sublanes = seq

    # --- fused embedding gather: one-hot(ids) @ embed on the (idle) MXU -----
    onehot = (ids_col == lax.broadcasted_iota(jnp.int32, (S, VP), 1))
    x = jnp.dot(onehot.astype(jnp.float32), embed_ref[...],
                preferred_element_type=jnp.float32)              # (S, HP)

    # --- fused attention mask (source_ids != 1), hoisted out of the loops ---
    mask_row = jnp.where(ids_row != PAD_ID, 0.0, -1e9).astype(jnp.float32)
    mask_hqk = jnp.broadcast_to(mask_row[None, :, :], (NUM_HEADS, S, S))

    for l in range(NUM_LAYERS):                     # static unrolled layers
        # ----------------- self-attention (pre-RMSNorm, T5: no q scaling) ---
        h = _rmsnorm(x, ln1_ref[l])                                  # (S, HP)
        hb = jnp.broadcast_to(h, (NUM_HEADS, S, HP))      # one broadcast/layer
        # head-batched QKV projection: per-head weights are stacked on a
        # leading head axis and zero-padded -> no sub-lane slicing, no concat.
        qkv = jnp.einsum("hsd,hde->hse", hb, wqkv_ref[l],
                         preferred_element_type=jnp.float32)     # (NH,S,3*HP)
        q = qkv[..., 0:HP]                                   # 128-aligned cuts
        k = qkv[..., HP:2 * HP]
        v = qkv[..., 2 * HP:3 * HP]

        scores = jnp.einsum("hqd,hkd->hqk", q, k,
                            preferred_element_type=jnp.float32)    # (NH,S,S)
        scores = scores + mask_hqk
        m = jnp.max(scores, axis=-1, keepdims=True)
        e = jnp.exp(scores - m)
        # sum(e) >= 1 (max element contributes exp(0)); approx recip is safe.
        p = e * pl.reciprocal(jnp.sum(e, axis=-1, keepdims=True), approx=True)
        ctx = jnp.einsum("hqk,hkd->hqd", p, v,
                         preferred_element_type=jnp.float32)       # (NH,S,HP)
        # per-head output projection + sum over heads == concat(heads) @ Wo
        proj = jnp.einsum("hqd,hde->hqe", ctx, wo_ref[l],
                          preferred_element_type=jnp.float32)      # (NH,S,HP)
        x = x + jnp.sum(proj, axis=0)

        # ----------------- feed-forward (pre-RMSNorm, ReLU) ------------------
        h2 = _rmsnorm(x, ln2_ref[l])
        ff = jnp.maximum(
            jnp.dot(h2, wi_ref[l], preferred_element_type=jnp.float32), 0.0)
        x = x + jnp.dot(ff, wo2_ref[l], preferred_element_type=jnp.float32)

    # --- final RMSNorm on CLS token + classifier + sigmoid + per-example BCE
    cls = _rmsnorm(x[0:1, :], lnf_ref[...])                          # (1, HP)
    logit = (jnp.sum(cls * clsw_ref[...], axis=-1, keepdims=True)
             + clsb_ref[0])                                          # (1, 1)
    prob = 1.0 / (1.0 + jnp.exp(-logit))        # exact sigmoid: prob in (0,1)
    y = y_ref[pl.program_id(0)]                                      # scalar
    ll = (jnp.log(prob + 1e-10) * y
          + jnp.log(1.0 - prob + 1e-10) * (1.0 - y))                 # (1, 1)

    # lane-dense (1,8,128) output slabs instead of masked (B,1) partial stores
    prob_ref[...] = jnp.broadcast_to(prob.reshape(1, 1, 1), (1, SUB, LANES))
    ll_ref[...] = jnp.broadcast_to(ll.reshape(1, 1, 1), (1, SUB, LANES))
    # TODO(synk): T5 relative-position bias and dropout of the real (external)
    # CodeT5 encoder are omitted in this synthetic deterministic encoder.


def _full_spec(arr):
    # whole-array VMEM block, resident across the batch grid (constant index).
    n = arr.ndim
    return pl.BlockSpec(arr.shape, lambda b, n=n: (0,) * n)


@jax.jit
def codet5_forward(kp, source_ids, labels):
    """Returns (loss, prob), matching CodeT5Model.forward(source_ids, labels)."""
    Bv, Sv = source_ids.shape
    ids = source_ids.astype(jnp.int32)
    # the 16 token ids are passed in both lane- and sublane-major layouts so
    # neither the in-kernel one-hot gather nor the key mask needs a transpose
    ids_row = ids.reshape(Bv, 1, Sv)
    ids_col = ids.reshape(Bv, Sv, 1)
    y = labels.astype(jnp.float32).reshape(Bv)

    smem = pl.BlockSpec(memory_space=pltpu.MemorySpace.SMEM)
    prob_slab, ll_slab = pl.pallas_call(
        codet5_fused_kernel,
        grid=(Bv,),
        out_shape=(jax.ShapeDtypeStruct((Bv, SUB, LANES), jnp.float32),
                   jax.ShapeDtypeStruct((Bv, SUB, LANES), jnp.float32)),
        in_specs=[
            pl.BlockSpec((1, 1, Sv), lambda b: (b, 0, 0)),   # ids (lane-major)
            pl.BlockSpec((1, Sv, 1), lambda b: (b, 0, 0)),   # ids (sublane-major)
            _full_spec(kp["embed_p"]),
            _full_spec(kp["wqkv_h"]),
            _full_spec(kp["wo_h"]),
            _full_spec(kp["ln1_p"]),
            _full_spec(kp["wi_p"]),
            _full_spec(kp["wo2_p"]),
            _full_spec(kp["ln2_p"]),
            _full_spec(kp["lnf_p"]),
            _full_spec(kp["clsw_p"]),
            smem,                                            # cls_b
            smem,                                            # labels
        ],
        out_specs=(pl.BlockSpec((1, SUB, LANES), lambda b: (b, 0, 0)),
                   pl.BlockSpec((1, SUB, LANES), lambda b: (b, 0, 0))),
        compiler_params=pltpu.CompilerParams(
            dimension_semantics=("parallel",)),      # 2 TCs on v7x
    )(ids_row, ids_col, kp["embed_p"], kp["wqkv_h"], kp["wo_h"], kp["ln1_p"],
      kp["wi_p"], kp["wo2_p"], kp["ln2_p"], kp["lnf_p"], kp["clsw_p"],
      kp["cls_b"], y)

    prob = prob_slab[:, 0, :1]                     # (B, 1)
    loss = -jnp.mean(ll_slab[:, 0, 0])             # batch mean (tiny XLA op)
    return loss, prob


# ---------------------------------------------------------------------------
# Logical (unpadded) parameters + one-time host-side packing for the kernel
# ---------------------------------------------------------------------------
def init_params(key):
    ks = jax.random.split(key, 6)
    s = 0.02
    return {
        "embed": s * jax.random.normal(ks[0], (VOCAB, H), jnp.float32),
        "wqkv":  s * jax.random.normal(ks[1], (NUM_LAYERS, H, 3 * H), jnp.float32),
        "wo":    s * jax.random.normal(ks[2], (NUM_LAYERS, H, H), jnp.float32),
        "wi":    s * jax.random.normal(ks[3], (NUM_LAYERS, H, D_FF), jnp.float32),
        "wo2":   s * jax.random.normal(ks[4], (NUM_LAYERS, D_FF, H), jnp.float32),
        "ln1":   jnp.ones((NUM_LAYERS, H), jnp.float32),
        "ln2":   jnp.ones((NUM_LAYERS, H), jnp.float32),
        "ln_f":  jnp.ones((H,), jnp.float32),
        "cls_w": s * jax.random.normal(ks[5], (H,), jnp.float32),
        "cls_b": jnp.zeros((1,), jnp.float32),
    }


def pack_params(p):
    """One-time host-side lane padding + per-head weight stacking."""
    L, NH, HD = NUM_LAYERS, NUM_HEADS, HEAD_DIM
    wq = p["wqkv"][:, :, 0:H]
    wk = p["wqkv"][:, :, H:2 * H]
    wv = p["wqkv"][:, :, 2 * H:3 * H]

    def per_head_cols(w):                 # (L,H,H), cols head-major -> (L,NH,HP,HP)
        w = w.reshape(L, H, NH, HD).transpose(0, 2, 1, 3)        # (L,NH,H,HD)
        return jnp.zeros((L, NH, HP, HP), jnp.float32).at[:, :, :H, :HD].set(w)

    wqkv_h = jnp.concatenate([per_head_cols(wq), per_head_cols(wk),
                              per_head_cols(wv)], axis=-1)       # (L,NH,HP,3*HP)

    wo = p["wo"].reshape(L, NH, HD, H)                           # rows head-major
    wo_h = jnp.zeros((L, NH, HP, HP), jnp.float32).at[:, :, :HD, :H].set(wo)

    def pad2(w, r, c):
        return jnp.zeros((L, r, c), jnp.float32).at[:, :w.shape[1], :w.shape[2]].set(w)

    return {
        "embed_p": jnp.zeros((VP, HP), jnp.float32).at[:VOCAB, :H].set(p["embed"]),
        "wqkv_h": wqkv_h,
        "wo_h": wo_h,
        "ln1_p": jnp.zeros((L, 1, HP), jnp.float32).at[:, 0, :H].set(p["ln1"]),
        "ln2_p": jnp.zeros((L, 1, HP), jnp.float32).at[:, 0, :H].set(p["ln2"]),
        "wi_p": pad2(p["wi"], HP, FP),
        "wo2_p": pad2(p["wo2"], FP, HP),
        "lnf_p": jnp.zeros((1, HP), jnp.float32).at[0, :H].set(p["ln_f"]),
        "clsw_p": jnp.zeros((1, HP), jnp.float32).at[0, :H].set(p["cls_w"]),
        "cls_b": p["cls_b"],
    }


# ---------------------------------------------------------------------------
# Pure-JAX reference of the identical (unpadded) math
# ---------------------------------------------------------------------------
def ref_forward(p, source_ids, labels):
    hi = lax.Precision.HIGHEST
    x = p["embed"][source_ids]                                   # (B, S, H)
    mask = jnp.where(source_ids != PAD_ID, 0.0, -1e9)[:, None, :]

    def rms(v, w):
        return v * lax.rsqrt(jnp.mean(v * v, -1, keepdims=True) + 1e-6) * w

    for l in range(NUM_LAYERS):
        h = rms(x, p["ln1"][l])
        qkv = jnp.einsum("bsh,hk->bsk", h, p["wqkv"][l], precision=hi)
        q, k, v = qkv[..., :H], qkv[..., H:2 * H], qkv[..., 2 * H:]
        ctxs = []
        for hd in range(NUM_HEADS):
            sl = slice(hd * HEAD_DIM, (hd + 1) * HEAD_DIM)
            sc = jnp.einsum("bqd,bkd->bqk", q[..., sl], k[..., sl],
                            precision=hi) + mask
            pr = jax.nn.softmax(sc, axis=-1)
            ctxs.append(jnp.einsum("bqk,bkd->bqd", pr, v[..., sl], precision=hi))
        ctx = jnp.concatenate(ctxs, axis=-1)
        x = x + jnp.einsum("bsh,hk->bsk", ctx, p["wo"][l], precision=hi)
        h2 = rms(x, p["ln2"][l])
        ff = jax.nn.relu(jnp.einsum("bsh,hf->bsf", h2, p["wi"][l], precision=hi))
        x = x + jnp.einsum("bsf,fh->bsh", ff, p["wo2"][l], precision=hi)

    cls = rms(x[:, 0, :], p["ln_f"])
    logits = (jnp.einsum("bh,h->b", cls, p["cls_w"], precision=hi)[:, None]
              + p["cls_b"][0])
    prob = jax.nn.sigmoid(logits)
    y = labels.astype(jnp.float32)[:, None]
    ll = jnp.log(prob + 1e-10) * y + jnp.log(1.0 - prob + 1e-10) * (1.0 - y)
    return -jnp.mean(ll), prob


if __name__ == "__main__":
    key = jax.random.PRNGKey(0)
    pkey, idkey = jax.random.split(key)
    params = init_params(pkey)
    kparams = pack_params(params)        # one-time padding / head restructuring

    source_ids = jax.random.randint(idkey, (B, S), 2, VOCAB, dtype=jnp.int32)
    source_ids = source_ids.at[:, -2:].set(PAD_ID)   # padded tail (id == 1)
    labels = jnp.array([0.0, 1.0], dtype=jnp.float32)

    loss, prob = jax.block_until_ready(codet5_forward(kparams, source_ids, labels))

    ref_loss, ref_prob = ref_forward(params, source_ids, labels)
    np.testing.assert_allclose(np.asarray(prob), np.asarray(ref_prob),
                               rtol=2e-2, atol=2e-2)
    np.testing.assert_allclose(np.asarray(loss), np.asarray(ref_loss),
                               rtol=2e-2, atol=2e-2)
    assert prob.shape == (B, 1)
    assert np.all(np.isfinite(np.asarray(prob))) and np.isfinite(float(loss))
    print("KERNEL_OK")
</pallas_src>

<mosaic_0001>
module attributes {stable_mosaic.version = 11 : i64} {
  func.func @codet5_fused_kernel(%arg0: i32, %arg1: memref<1x1x8xi32, #tpu.memory_space<vmem>>, %arg2: memref<1x8x1xi32, #tpu.memory_space<vmem>>, %arg3: memref<128x128xf32, #tpu.memory_space<vmem>>, %arg4: memref<2x4x128x384xf32, #tpu.memory_space<vmem>>, %arg5: memref<2x4x128x128xf32, #tpu.memory_space<vmem>>, %arg6: memref<2x1x128xf32, #tpu.memory_space<vmem>>, %arg7: memref<2x128x128xf32, #tpu.memory_space<vmem>>, %arg8: memref<2x128x128xf32, #tpu.memory_space<vmem>>, %arg9: memref<2x1x128xf32, #tpu.memory_space<vmem>>, %arg10: memref<1x128xf32, #tpu.memory_space<vmem>>, %arg11: memref<1x128xf32, #tpu.memory_space<vmem>>, %arg12: memref<1xf32, #tpu.memory_space<smem>>, %arg13: memref<2xf32, #tpu.memory_space<smem>>, %arg14: memref<1x8x128xf32, #tpu.memory_space<vmem>>, %arg15: memref<1x8x128xf32, #tpu.memory_space<vmem>>) attributes {dimension_semantics = [#tpu.dimension_semantics<parallel>], iteration_bounds = array<i64: 2>, scalar_prefetch = 0 : i64, scratch_operands = 0 : i64, tpu.core_type = #tpu.core_type<tc>, window_params = [{transform_indices = @transform_0, window_bounds = array<i64: 1, 1, 8>}, {transform_indices = @transform_1, window_bounds = array<i64: 1, 8, 1>}, {pipeline_mode = #tpu.pipeline_mode<synchronous>, transform_indices = @transform_2, window_bounds = array<i64: 128, 128>}, {pipeline_mode = #tpu.pipeline_mode<synchronous>, transform_indices = @transform_3, window_bounds = array<i64: 2, 4, 128, 384>}, {pipeline_mode = #tpu.pipeline_mode<synchronous>, transform_indices = @transform_4, window_bounds = array<i64: 2, 4, 128, 128>}, {pipeline_mode = #tpu.pipeline_mode<synchronous>, transform_indices = @transform_5, window_bounds = array<i64: 2, 1, 128>}, {pipeline_mode = #tpu.pipeline_mode<synchronous>, transform_indices = @transform_6, window_bounds = array<i64: 2, 128, 128>}, {pipeline_mode = #tpu.pipeline_mode<synchronous>, transform_indices = @transform_7, window_bounds = array<i64: 2, 128, 128>}, {pipeline_mode = #tpu.pipeline_mode<synchronous>, transform_indices = @transform_8, window_bounds = array<i64: 2, 1, 128>}, {pipeline_mode = #tpu.pipeline_mode<synchronous>, transform_indices = @transform_9, window_bounds = array<i64: 1, 128>}, {pipeline_mode = #tpu.pipeline_mode<synchronous>, transform_indices = @transform_10, window_bounds = array<i64: 1, 128>}, {transform_indices = @transform_11, window_bounds = array<i64: 1>}, {transform_indices = @transform_12, window_bounds = array<i64: 2>}, {transform_indices = @transform_13, window_bounds = array<i64: 1, 8, 128>}, {transform_indices = @transform_14, window_bounds = array<i64: 1, 8, 128>}]} {
    %c0 = arith.constant 0 : index
    %c0_0 = arith.constant 0 : index
    %c0_1 = arith.constant 0 : index
    %0 = vector.load %arg1[%c0, %c0_0, %c0_1] : memref<1x1x8xi32, #tpu.memory_space<vmem>>, vector<1x1x8xi32>
    %1 = vector.shape_cast %0 : vector<1x1x8xi32> to vector<1x8xi32>
    %c0_2 = arith.constant 0 : index
    %c0_3 = arith.constant 0 : index
    %c0_4 = arith.constant 0 : index
    %2 = vector.load %arg2[%c0_2, %c0_3, %c0_4] : memref<1x8x1xi32, #tpu.memory_space<vmem>>, vector<1x8x1xi32>
    %3 = vector.shape_cast %2 : vector<1x8x1xi32> to vector<8x1xi32>
    %4 = tpu.iota {dimensions = array<i32: 1>} : vector<8x128xi32>
    %5 = vector.broadcast %3 : vector<8x1xi32> to vector<8x128xi32>
    %6 = arith.cmpi eq, %5, %4 : vector<8x128xi32>
    %7 = arith.extui %6 : vector<8x128xi1> to vector<8x128xi32>
    %8 = arith.sitofp %7 : vector<8x128xi32> to vector<8x128xf32>
    %c0_5 = arith.constant 0 : index
    %c0_6 = arith.constant 0 : index
    %9 = vector.load %arg3[%c0_5, %c0_6] : memref<128x128xf32, #tpu.memory_space<vmem>>, vector<128x128xf32>
    %cst = arith.constant dense<0.000000e+00> : vector<8x128xf32>
    %10 = tpu.matmul %8, %9, %cst {dimension_numbers = #tpu.dot_dimension_numbers<[1], [0], [0], [1], [0, 0, 1, 1], [], []>} : vector<8x128xf32>, vector<128x128xf32>, vector<8x128xf32> -> vector<8x128xf32>
    %c1_i32 = arith.constant 1 : i32
    %11 = vector.broadcast %c1_i32 : i32 to vector<1x8xi32>
    %12 = arith.cmpi ne, %1, %11 : vector<1x8xi32>
    %cst_7 = arith.constant 0.000000e+00 : f32
    %cst_8 = arith.constant -1.000000e+09 : f32
    %13 = vector.broadcast %cst_7 : f32 to vector<1x8xf32>
    %14 = vector.broadcast %cst_8 : f32 to vector<1x8xf32>
    %15 = arith.select %12, %13, %14 : vector<1x8xi1>, vector<1x8xf32>
    %16 = vector.shape_cast %15 : vector<1x8xf32> to vector<1x1x8xf32>
    %17 = vector.shape_cast %16 : vector<1x1x8xf32> to vector<1x1x8xf32>
    %18 = vector.broadcast %17 : vector<1x1x8xf32> to vector<4x8x8xf32>
    %c0_9 = arith.constant 0 : index
    %c0_10 = arith.constant 0 : index
    %c0_11 = arith.constant 0 : index
    %19 = vector.load %arg6[%c0_9, %c0_10, %c0_11] : memref<2x1x128xf32, #tpu.memory_space<vmem>>, vector<1x1x128xf32>
    %20 = vector.shape_cast %19 : vector<1x1x128xf32> to vector<1x128xf32>
    %21 = arith.mulf %10, %10 : vector<8x128xf32>
    %cst_12 = arith.constant dense<0.000000e+00> : vector<8xf32>
    %22 = vector.multi_reduction <add>, %21, %cst_12 [1] : vector<8x128xf32> to vector<8xf32>
    %23 = vector.shape_cast %22 : vector<8xf32> to vector<8x1xf32>
    %cst_13 = arith.constant 3.125000e-02 : f32
    %24 = vector.broadcast %cst_13 : f32 to vector<8x1xf32>
    %25 = arith.mulf %23, %24 : vector<8x1xf32>
    %cst_14 = arith.constant 9.99999997E-7 : f32
    %26 = vector.broadcast %cst_14 : f32 to vector<8x1xf32>
    %27 = arith.addf %25, %26 : vector<8x1xf32>
    %28 = math.rsqrt %27 : vector<8x1xf32>
    %29 = vector.broadcast %28 : vector<8x1xf32> to vector<8x128xf32>
    %30 = arith.mulf %10, %29 : vector<8x128xf32>
    %31 = vector.broadcast %20 : vector<1x128xf32> to vector<8x128xf32>
    %32 = arith.mulf %30, %31 : vector<8x128xf32>
    %33 = vector.shape_cast %32 : vector<8x128xf32> to vector<1x8x128xf32>
    %34 = vector.broadcast %33 : vector<1x8x128xf32> to vector<4x8x128xf32>
    %c0_15 = arith.constant 0 : index
    %c0_16 = arith.constant 0 : index
    %c0_17 = arith.constant 0 : index
    %c0_18 = arith.constant 0 : index
    %35 = vector.load %arg4[%c0_15, %c0_16, %c0_17, %c0_18] : memref<2x4x128x384xf32, #tpu.memory_space<vmem>>, vector<1x4x128x384xf32>
    %36 = vector.shape_cast %35 : vector<1x4x128x384xf32> to vector<4x128x384xf32>
    "tpu.trace_start"() <{level = 10 : i32, message = "hsd,hde->hse"}> : () -> ()
    %cst_19 = arith.constant dense<0.000000e+00> : vector<4x8x384xf32>
    %37 = tpu.matmul %34, %36, %cst_19 {dimension_numbers = #tpu.dot_dimension_numbers<[2], [1], [1], [2], [0, 0, 0, 1, 1, 2], [0], [0]>} : vector<4x8x128xf32>, vector<4x128x384xf32>, vector<4x8x384xf32> -> vector<4x8x384xf32>
    "tpu.trace_stop"() : () -> ()
    %38 = vector.extract_strided_slice %37 {offsets = [0, 0, 0], sizes = [4, 8, 128], strides = [1, 1, 1]} : vector<4x8x384xf32> to vector<4x8x128xf32>
    %39 = vector.extract_strided_slice %37 {offsets = [0, 0, 128], sizes = [4, 8, 128], strides = [1, 1, 1]} : vector<4x8x384xf32> to vector<4x8x128xf32>
    %40 = vector.extract_strided_slice %37 {offsets = [0, 0, 256], sizes = [4, 8, 128], strides = [1, 1, 1]} : vector<4x8x384xf32> to vector<4x8x128xf32>
    "tpu.trace_start"() <{level = 10 : i32, message = "hqd,hkd->hqk"}> : () -> ()
    %cst_20 = arith.constant dense<0.000000e+00> : vector<4x8x8xf32>
    %41 = tpu.matmul %38, %39, %cst_20 {dimension_numbers = #tpu.dot_dimension_numbers<[2], [2], [1], [1], [0, 0, 0, 1, 1, 1], [0], [0]>} : vector<4x8x128xf32>, vector<4x8x128xf32>, vector<4x8x8xf32> -> vector<4x8x8xf32>
    "tpu.trace_stop"() : () -> ()
    %42 = arith.addf %41, %18 : vector<4x8x8xf32>
    %cst_21 = arith.constant dense<0xFF800000> : vector<4x8xf32>
    %43 = vector.multi_reduction <maximumf>, %42, %cst_21 [2] : vector<4x8x8xf32> to vector<4x8xf32>
    %44 = vector.shape_cast %43 : vector<4x8xf32> to vector<4x8x1xf32>
    %45 = vector.broadcast %44 : vector<4x8x1xf32> to vector<4x8x8xf32>
    %46 = arith.subf %42, %45 : vector<4x8x8xf32>
    %47 = math.exp %46 : vector<4x8x8xf32>
    %cst_22 = arith.constant dense<0.000000e+00> : vector<4x8xf32>
    %48 = vector.multi_reduction <add>, %47, %cst_22 [2] : vector<4x8x8xf32> to vector<4x8xf32>
    %49 = vector.shape_cast %48 : vector<4x8xf32> to vector<4x8x1xf32>
    %50 = tpu.reciprocal %49 {approx = true} : vector<4x8x1xf32> -> vector<4x8x1xf32>
    %51 = vector.broadcast %50 : vector<4x8x1xf32> to vector<4x8x8xf32>
    %52 = arith.mulf %47, %51 : vector<4x8x8xf32>
    "tpu.trace_start"() <{level = 10 : i32, message = "hqk,hkd->hqd"}> : () -> ()
    %cst_23 = arith.constant dense<0.000000e+00> : vector<4x8x128xf32>
    %53 = tpu.matmul %52, %40, %cst_23 {dimension_numbers = #tpu.dot_dimension_numbers<[2], [1], [1], [2], [0, 0, 0, 1, 1, 2], [0], [0]>} : vector<4x8x8xf32>, vector<4x8x128xf32>, vector<4x8x128xf32> -> vector<4x8x128xf32>
    "tpu.trace_stop"() : () -> ()
    %c0_24 = arith.constant 0 : index
    %c0_25 = arith.constant 0 : index
    %c0_26 = arith.constant 0 : index
    %c0_27 = arith.constant 0 : index
    %54 = vector.load %arg5[%c0_24, %c0_25, %c0_26, %c0_27] : memref<2x4x128x128xf32, #tpu.memory_space<vmem>>, vector<1x4x128x128xf32>
    %55 = vector.shape_cast %54 : vector<1x4x128x128xf32> to vector<4x128x128xf32>
    "tpu.trace_start"() <{level = 10 : i32, message = "hqd,hde->hqe"}> : () -> ()
    %cst_28 = arith.constant dense<0.000000e+00> : vector<4x8x128xf32>
    %56 = tpu.matmul %53, %55, %cst_28 {dimension_numbers = #tpu.dot_dimension_numbers<[2], [1], [1], [2], [0, 0, 0, 1, 1, 2], [0], [0]>} : vector<4x8x128xf32>, vector<4x128x128xf32>, vector<4x8x128xf32> -> vector<4x8x128xf32>
    "tpu.trace_stop"() : () -> ()
    %cst_29 = arith.constant dense<0.000000e+00> : vector<8x128xf32>
    %57 = vector.multi_reduction <add>, %56, %cst_29 [0] : vector<4x8x128xf32> to vector<8x128xf32>
    %58 = arith.addf %10, %57 : vector<8x128xf32>
    %c0_30 = arith.constant 0 : index
    %c0_31 = arith.constant 0 : index
    %c0_32 = arith.constant 0 : index
    %59 = vector.load %arg9[%c0_30, %c0_31, %c0_32] : memref<2x1x128xf32, #tpu.memory_space<vmem>>, vector<1x1x128xf32>
    %60 = vector.shape_cast %59 : vector<1x1x128xf32> to vector<1x128xf32>
    %61 = arith.mulf %58, %58 : vector<8x128xf32>
    %cst_33 = arith.constant dense<0.000000e+00> : vector<8xf32>
    %62 = vector.multi_reduction <add>, %61, %cst_33 [1] : vector<8x128xf32> to vector<8xf32>
    %63 = vector.shape_cast %62 : vector<8xf32> to vector<8x1xf32>
    %cst_34 = arith.constant 3.125000e-02 : f32
    %64 = vector.broadcast %cst_34 : f32 to vector<8x1xf32>
    %65 = arith.mulf %63, %64 : vector<8x1xf32>
    %cst_35 = arith.constant 9.99999997E-7 : f32
    %66 = vector.broadcast %cst_35 : f32 to vector<8x1xf32>
    %67 = arith.addf %65, %66 : vector<8x1xf32>
    %68 = math.rsqrt %67 : vector<8x1xf32>
    %69 = vector.broadcast %68 : vector<8x1xf32> to vector<8x128xf32>
    %70 = arith.mulf %58, %69 : vector<8x128xf32>
    %71 = vector.broadcast %60 : vector<1x128xf32> to vector<8x128xf32>
    %72 = arith.mulf %70, %71 : vector<8x128xf32>
    %c0_36 = arith.constant 0 : index
    %c0_37 = arith.constant 0 : index
    %c0_38 = arith.constant 0 : index
    %73 = vector.load %arg7[%c0_36, %c0_37, %c0_38] : memref<2x128x128xf32, #tpu.memory_space<vmem>>, vector<1x128x128xf32>
    %74 = vector.shape_cast %73 : vector<1x128x128xf32> to vector<128x128xf32>
    %cst_39 = arith.constant dense<0.000000e+00> : vector<8x128xf32>
    %75 = tpu.matmul %72, %74, %cst_39 {dimension_numbers = #tpu.dot_dimension_numbers<[1], [0], [0], [1], [0, 0, 1, 1], [], []>} : vector<8x128xf32>, vector<128x128xf32>, vector<8x128xf32> -> vector<8x128xf32>
    %cst_40 = arith.constant 0.000000e+00 : f32
    %76 = vector.broadcast %cst_40 : f32 to vector<8x128xf32>
    %77 = arith.maximumf %75, %76 : vector<8x128xf32>
    %c0_41 = arith.constant 0 : index
    %c0_42 = arith.constant 0 : index
    %c0_43 = arith.constant 0 : index
    %78 = vector.load %arg8[%c0_41, %c0_42, %c0_43] : memref<2x128x128xf32, #tpu.memory_space<vmem>>, vector<1x128x128xf32>
    %79 = vector.shape_cast %78 : vector<1x128x128xf32> to vector<128x128xf32>
    %cst_44 = arith.constant dense<0.000000e+00> : vector<8x128xf32>
    %80 = tpu.matmul %77, %79, %cst_44 {dimension_numbers = #tpu.dot_dimension_numbers<[1], [0], [0], [1], [0, 0, 1, 1], [], []>} : vector<8x128xf32>, vector<128x128xf32>, vector<8x128xf32> -> vector<8x128xf32>
    %81 = arith.addf %58, %80 : vector<8x128xf32>
    %c1 = arith.constant 1 : index
    %c0_45 = arith.constant 0 : index
    %c0_46 = arith.constant 0 : index
    %82 = vector.load %arg6[%c1, %c0_45, %c0_46] : memref<2x1x128xf32, #tpu.memory_space<vmem>>, vector<1x1x128xf32>
    %83 = vector.shape_cast %82 : vector<1x1x128xf32> to vector<1x128xf32>
    %84 = arith.mulf %81, %81 : vector<8x128xf32>
    %cst_47 = arith.constant dense<0.000000e+00> : vector<8xf32>
    %85 = vector.multi_reduction <add>, %84, %cst_47 [1] : vector<8x128xf32> to vector<8xf32>
    %86 = vector.shape_cast %85 : vector<8xf32> to vector<8x1xf32>
    %cst_48 = arith.constant 3.125000e-02 : f32
    %87 = vector.broadcast %cst_48 : f32 to vector<8x1xf32>
    %88 = arith.mulf %86, %87 : vector<8x1xf32>
    %cst_49 = arith.constant 9.99999997E-7 : f32
    %89 = vector.broadcast %cst_49 : f32 to vector<8x1xf32>
    %90 = arith.addf %88, %89 : vector<8x1xf32>
    %91 = math.rsqrt %90 : vector<8x1xf32>
    %92 = vector.broadcast %91 : vector<8x1xf32> to vector<8x128xf32>
    %93 = arith.mulf %81, %92 : vector<8x128xf32>
    %94 = vector.broadcast %83 : vector<1x128xf32> to vector<8x128xf32>
    %95 = arith.mulf %93, %94 : vector<8x128xf32>
    %96 = vector.shape_cast %95 : vector<8x128xf32> to vector<1x8x128xf32>
    %97 = vector.broadcast %96 : vector<1x8x128xf32> to vector<4x8x128xf32>
    %c1_50 = arith.constant 1 : index
    %c0_51 = arith.constant 0 : index
    %c0_52 = arith.constant 0 : index
    %c0_53 = arith.constant 0 : index
    %98 = vector.load %arg4[%c1_50, %c0_51, %c0_52, %c0_53] : memref<2x4x128x384xf32, #tpu.memory_space<vmem>>, vector<1x4x128x384xf32>
    %99 = vector.shape_cast %98 : vector<1x4x128x384xf32> to vector<4x128x384xf32>
    "tpu.trace_start"() <{level = 10 : i32, message = "hsd,hde->hse"}> : () -> ()
    %cst_54 = arith.constant dense<0.000000e+00> : vector<4x8x384xf32>
    %100 = tpu.matmul %97, %99, %cst_54 {dimension_numbers = #tpu.dot_dimension_numbers<[2], [1], [1], [2], [0, 0, 0, 1, 1, 2], [0], [0]>} : vector<4x8x128xf32>, vector<4x128x384xf32>, vector<4x8x384xf32> -> vector<4x8x384xf32>
    "tpu.trace_stop"() : () -> ()
    %101 = vector.extract_strided_slice %100 {offsets = [0, 0, 0], sizes = [4, 8, 128], strides = [1, 1, 1]} : vector<4x8x384xf32> to vector<4x8x128xf32>
    %102 = vector.extract_strided_slice %100 {offsets = [0, 0, 128], sizes = [4, 8, 128], strides = [1, 1, 1]} : vector<4x8x384xf32> to vector<4x8x128xf32>
    %103 = vector.extract_strided_slice %100 {offsets = [0, 0, 256], sizes = [4, 8, 128], strides = [1, 1, 1]} : vector<4x8x384xf32> to vector<4x8x128xf32>
    "tpu.trace_start"() <{level = 10 : i32, message = "hqd,hkd->hqk"}> : () -> ()
    %cst_55 = arith.constant dense<0.000000e+00> : vector<4x8x8xf32>
    %104 = tpu.matmul %101, %102, %cst_55 {dimension_numbers = #tpu.dot_dimension_numbers<[2], [2], [1], [1], [0, 0, 0, 1, 1, 1], [0], [0]>} : vector<4x8x128xf32>, vector<4x8x128xf32>, vector<4x8x8xf32> -> vector<4x8x8xf32>
    "tpu.trace_stop"() : () -> ()
    %105 = arith.addf %104, %18 : vector<4x8x8xf32>
    %cst_56 = arith.constant dense<0xFF800000> : vector<4x8xf32>
    %106 = vector.multi_reduction <maximumf>, %105, %cst_56 [2] : vector<4x8x8xf32> to vector<4x8xf32>
    %107 = vector.shape_cast %106 : vector<4x8xf32> to vector<4x8x1xf32>
    %108 = vector.broadcast %107 : vector<4x8x1xf32> to vector<4x8x8xf32>
    %109 = arith.subf %105, %108 : vector<4x8x8xf32>
    %110 = math.exp %109 : vector<4x8x8xf32>
    %cst_57 = arith.constant dense<0.000000e+00> : vector<4x8xf32>
    %111 = vector.multi_reduction <add>, %110, %cst_57 [2] : vector<4x8x8xf32> to vector<4x8xf32>
    %112 = vector.shape_cast %111 : vector<4x8xf32> to vector<4x8x1xf32>
    %113 = tpu.reciprocal %112 {approx = true} : vector<4x8x1xf32> -> vector<4x8x1xf32>
    %114 = vector.broadcast %113 : vector<4x8x1xf32> to vector<4x8x8xf32>
    %115 = arith.mulf %110, %114 : vector<4x8x8xf32>
    "tpu.trace_start"() <{level = 10 : i32, message = "hqk,hkd->hqd"}> : () -> ()
    %cst_58 = arith.constant dense<0.000000e+00> : vector<4x8x128xf32>
    %116 = tpu.matmul %115, %103, %cst_58 {dimension_numbers = #tpu.dot_dimension_numbers<[2], [1], [1], [2], [0, 0, 0, 1, 1, 2], [0], [0]>} : vector<4x8x8xf32>, vector<4x8x128xf32>, vector<4x8x128xf32> -> vector<4x8x128xf32>
    "tpu.trace_stop"() : () -> ()
    %c1_59 = arith.constant 1 : index
    %c0_60 = arith.constant 0 : index
    %c0_61 = arith.constant 0 : index
    %c0_62 = arith.constant 0 : index
    %117 = vector.load %arg5[%c1_59, %c0_60, %c0_61, %c0_62] : memref<2x4x128x128xf32, #tpu.memory_space<vmem>>, vector<1x4x128x128xf32>
    %118 = vector.shape_cast %117 : vector<1x4x128x128xf32> to vector<4x128x128xf32>
    "tpu.trace_start"() <{level = 10 : i32, message = "hqd,hde->hqe"}> : () -> ()
    %cst_63 = arith.constant dense<0.000000e+00> : vector<4x8x128xf32>
    %119 = tpu.matmul %116, %118, %cst_63 {dimension_numbers = #tpu.dot_dimension_numbers<[2], [1], [1], [2], [0, 0, 0, 1, 1, 2], [0], [0]>} : vector<4x8x128xf32>, vector<4x128x128xf32>, vector<4x8x128xf32> -> vector<4x8x128xf32>
    "tpu.trace_stop"() : () -> ()
    %cst_64 = arith.constant dense<0.000000e+00> : vector<8x128xf32>
    %120 = vector.multi_reduction <add>, %119, %cst_64 [0] : vector<4x8x128xf32> to vector<8x128xf32>
    %121 = arith.addf %81, %120 : vector<8x128xf32>
    %c1_65 = arith.constant 1 : index
    %c0_66 = arith.constant 0 : index
    %c0_67 = arith.constant 0 : index
    %122 = vector.load %arg9[%c1_65, %c0_66, %c0_67] : memref<2x1x128xf32, #tpu.memory_space<vmem>>, vector<1x1x128xf32>
    %123 = vector.shape_cast %122 : vector<1x1x128xf32> to vector<1x128xf32>
    %124 = arith.mulf %121, %121 : vector<8x128xf32>
    %cst_68 = arith.constant dense<0.000000e+00> : vector<8xf32>
    %125 = vector.multi_reduction <add>, %124, %cst_68 [1] : vector<8x128xf32> to vector<8xf32>
    %126 = vector.shape_cast %125 : vector<8xf32> to vector<8x1xf32>
    %cst_69 = arith.constant 3.125000e-02 : f32
    %127 = vector.broadcast %cst_69 : f32 to vector<8x1xf32>
    %128 = arith.mulf %126, %127 : vector<8x1xf32>
    %cst_70 = arith.constant 9.99999997E-7 : f32
    %129 = vector.broadcast %cst_70 : f32 to vector<8x1xf32>
    %130 = arith.addf %128, %129 : vector<8x1xf32>
    %131 = math.rsqrt %130 : vector<8x1xf32>
    %132 = vector.broadcast %131 : vector<8x1xf32> to vector<8x128xf32>
    %133 = arith.mulf %121, %132 : vector<8x128xf32>
    %134 = vector.broadcast %123 : vector<1x128xf32> to vector<8x128xf32>
    %135 = arith.mulf %133, %134 : vector<8x128xf32>
    %c1_71 = arith.constant 1 : index
    %c0_72 = arith.constant 0 : index
    %c0_73 = arith.constant 0 : index
    %136 = vector.load %arg7[%c1_71, %c0_72, %c0_73] : memref<2x128x128xf32, #tpu.memory_space<vmem>>, vector<1x128x128xf32>
    %137 = vector.shape_cast %136 : vector<1x128x128xf32> to vector<128x128xf32>
    %cst_74 = arith.constant dense<0.000000e+00> : vector<8x128xf32>
    %138 = tpu.matmul %135, %137, %cst_74 {dimension_numbers = #tpu.dot_dimension_numbers<[1], [0], [0], [1], [0, 0, 1, 1], [], []>} : vector<8x128xf32>, vector<128x128xf32>, vector<8x128xf32> -> vector<8x128xf32>
    %cst_75 = arith.constant 0.000000e+00 : f32
    %139 = vector.broadcast %cst_75 : f32 to vector<8x128xf32>
    %140 = arith.maximumf %138, %139 : vector<8x128xf32>
    %c1_76 = arith.constant 1 : index
    %c0_77 = arith.constant 0 : index
    %c0_78 = arith.constant 0 : index
    %141 = vector.load %arg8[%c1_76, %c0_77, %c0_78] : memref<2x128x128xf32, #tpu.memory_space<vmem>>, vector<1x128x128xf32>
    %142 = vector.shape_cast %141 : vector<1x128x128xf32> to vector<128x128xf32>
    %cst_79 = arith.constant dense<0.000000e+00> : vector<8x128xf32>
    %143 = tpu.matmul %140, %142, %cst_79 {dimension_numbers = #tpu.dot_dimension_numbers<[1], [0], [0], [1], [0, 0, 1, 1], [], []>} : vector<8x128xf32>, vector<128x128xf32>, vector<8x128xf32> -> vector<8x128xf32>
    %144 = arith.addf %121, %143 : vector<8x128xf32>
    %145 = vector.extract_strided_slice %144 {offsets = [0, 0], sizes = [1, 128], strides = [1, 1]} : vector<8x128xf32> to vector<1x128xf32>
    %c0_80 = arith.constant 0 : index
    %c0_81 = arith.constant 0 : index
    %146 = vector.load %arg10[%c0_80, %c0_81] : memref<1x128xf32, #tpu.memory_space<vmem>>, vector<1x128xf32>
    %147 = arith.mulf %145, %145 : vector<1x128xf32>
    %cst_82 = arith.constant dense<0.000000e+00> : vector<1xf32>
    %148 = vector.multi_reduction <add>, %147, %cst_82 [1] : vector<1x128xf32> to vector<1xf32>
    %149 = vector.shape_cast %148 : vector<1xf32> to vector<1x1xf32>
    %cst_83 = arith.constant 3.125000e-02 : f32
    %150 = vector.broadcast %cst_83 : f32 to vector<1x1xf32>
    %151 = arith.mulf %149, %150 : vector<1x1xf32>
    %cst_84 = arith.constant 9.99999997E-7 : f32
    %152 = vector.broadcast %cst_84 : f32 to vector<1x1xf32>
    %153 = arith.addf %151, %152 : vector<1x1xf32>
    %154 = math.rsqrt %153 : vector<1x1xf32>
    %155 = vector.broadcast %154 : vector<1x1xf32> to vector<1x128xf32>
    %156 = arith.mulf %145, %155 : vector<1x128xf32>
    %157 = arith.mulf %156, %146 : vector<1x128xf32>
    %c0_85 = arith.constant 0 : index
    %c0_86 = arith.constant 0 : index
    %158 = vector.load %arg11[%c0_85, %c0_86] : memref<1x128xf32, #tpu.memory_space<vmem>>, vector<1x128xf32>
    %159 = arith.mulf %157, %158 : vector<1x128xf32>
    %cst_87 = arith.constant dense<0.000000e+00> : vector<1xf32>
    %160 = vector.multi_reduction <add>, %159, %cst_87 [1] : vector<1x128xf32> to vector<1xf32>
    %161 = vector.shape_cast %160 : vector<1xf32> to vector<1x1xf32>
    %c0_88 = arith.constant 0 : index
    %162 = memref.load %arg12[%c0_88] : memref<1xf32, #tpu.memory_space<smem>>
    %163 = vector.broadcast %162 : f32 to vector<1x1xf32>
    %164 = arith.addf %161, %163 : vector<1x1xf32>
    %cst_89 = arith.constant 0.000000e+00 : f32
    %165 = vector.broadcast %cst_89 : f32 to vector<1x1xf32>
    %166 = arith.subf %165, %164 : vector<1x1xf32>
    %167 = math.exp %166 : vector<1x1xf32>
    %cst_90 = arith.constant 1.000000e+00 : f32
    %168 = vector.broadcast %cst_90 : f32 to vector<1x1xf32>
    %169 = arith.addf %168, %167 : vector<1x1xf32>
    %cst_91 = arith.constant 1.000000e+00 : f32
    %170 = vector.broadcast %cst_91 : f32 to vector<1x1xf32>
    %171 = arith.divf %170, %169 : vector<1x1xf32>
    %172 = arith.index_cast %arg0 : i32 to index
    %173 = memref.load %arg13[%172] : memref<2xf32, #tpu.memory_space<smem>>
    %cst_92 = arith.constant 1.000000e-10 : f32
    %174 = vector.broadcast %cst_92 : f32 to vector<1x1xf32>
    %175 = arith.addf %171, %174 : vector<1x1xf32>
    %176 = math.log %175 : vector<1x1xf32>
    %177 = vector.broadcast %173 : f32 to vector<1x1xf32>
    %178 = arith.mulf %176, %177 : vector<1x1xf32>
    %cst_93 = arith.constant 1.000000e+00 : f32
    %179 = vector.broadcast %cst_93 : f32 to vector<1x1xf32>
    %180 = arith.subf %179, %171 : vector<1x1xf32>
    %cst_94 = arith.constant 1.000000e-10 : f32
    %181 = vector.broadcast %cst_94 : f32 to vector<1x1xf32>
    %182 = arith.addf %180, %181 : vector<1x1xf32>
    %183 = math.log %182 : vector<1x1xf32>
    %cst_95 = arith.constant 1.000000e+00 : f32
    %184 = arith.subf %cst_95, %173 : f32
    %185 = vector.broadcast %184 : f32 to vector<1x1xf32>
    %186 = arith.mulf %183, %185 : vector<1x1xf32>
    %187 = arith.addf %178, %186 : vector<1x1xf32>
    %188 = vector.shape_cast %171 : vector<1x1xf32> to vector<1x1x1xf32>
    %189 = vector.shape_cast %188 : vector<1x1x1xf32> to vector<1x1x1xf32>
    %190 = vector.broadcast %189 : vector<1x1x1xf32> to vector<1x8x128xf32>
    %c0_96 = arith.constant 0 : index
    %c0_97 = arith.constant 0 : index
    %c0_98 = arith.constant 0 : index
    %191 = vector.load %arg14[%c0_96, %c0_97, %c0_98] : memref<1x8x128xf32, #tpu.memory_space<vmem>>, vector<1x8x128xf32>
    tpu.vector_store %arg14[%c0_96, %c0_97, %c0_98], %190 {strides = array<i32>} : memref<1x8x128xf32, #tpu.memory_space<vmem>>, vector<1x8x128xf32>,
    %192 = vector.shape_cast %187 : vector<1x1xf32> to vector<1x1x1xf32>
    %193 = vector.shape_cast %192 : vector<1x1x1xf32> to vector<1x1x1xf32>
    %194 = vector.broadcast %193 : vector<1x1x1xf32> to vector<1x8x128xf32>
    %c0_99 = arith.constant 0 : index
    %c0_100 = arith.constant 0 : index
    %c0_101 = arith.constant 0 : index
    %195 = vector.load %arg15[%c0_99, %c0_100, %c0_101] : memref<1x8x128xf32, #tpu.memory_space<vmem>>, vector<1x8x128xf32>
    tpu.vector_store %arg15[%c0_99, %c0_100, %c0_101], %194 {strides = array<i32>} : memref<1x8x128xf32, #tpu.memory_space<vmem>>, vector<1x8x128xf32>,
    return
  }
  func.func @transform_0(%arg0: i32) -> (i32, i32, i32) {
    %c0_i32 = arith.constant 0 : i32
    %c0_i32_0 = arith.constant 0 : i32
    %c0_i32_1 = arith.constant 0 : i32
    return %arg0, %c0_i32, %c0_i32_0 : i32, i32, i32
  }
  func.func @transform_1(%arg0: i32) -> (i32, i32, i32) {
    %c0_i32 = arith.constant 0 : i32
    %c0_i32_0 = arith.constant 0 : i32
    %c0_i32_1 = arith.constant 0 : i32
    return %arg0, %c0_i32, %c0_i32_0 : i32, i32, i32
  }
  func.func @transform_2(%arg0: i32) -> (i32, i32) {
    %c0_i32 = arith.constant 0 : i32
    %c0_i32_0 = arith.constant 0 : i32
    %c0_i32_1 = arith.constant 0 : i32
    return %c0_i32, %c0_i32_0 : i32, i32
  }
  func.func @transform_3(%arg0: i32) -> (i32, i32, i32, i32) {
    %c0_i32 = arith.constant 0 : i32
    %c0_i32_0 = arith.constant 0 : i32
    %c0_i32_1 = arith.constant 0 : i32
    %c0_i32_2 = arith.constant 0 : i32
    %c0_i32_3 = arith.constant 0 : i32
    return %c0_i32, %c0_i32_0, %c0_i32_1, %c0_i32_2 : i32, i32, i32, i32
  }
  func.func @transform_4(%arg0: i32) -> (i32, i32, i32, i32) {
    %c0_i32 = arith.constant 0 : i32
    %c0_i32_0 = arith.constant 0 : i32
    %c0_i32_1 = arith.constant 0 : i32
    %c0_i32_2 = arith.constant 0 : i32
    %c0_i32_3 = arith.constant 0 : i32
    return %c0_i32, %c0_i32_0, %c0_i32_1, %c0_i32_2 : i32, i32, i32, i32
  }
  func.func @transform_5(%arg0: i32) -> (i32, i32, i32) {
    %c0_i32 = arith.constant 0 : i32
    %c0_i32_0 = arith.constant 0 : i32
    %c0_i32_1 = arith.constant 0 : i32
    %c0_i32_2 = arith.constant 0 : i32
    return %c0_i32, %c0_i32_0, %c0_i32_1 : i32, i32, i32
  }
  func.func @transform_6(%arg0: i32) -> (i32, i32, i32) {
    %c0_i32 = arith.constant 0 : i32
    %c0_i32_0 = arith.constant 0 : i32
    %c0_i32_1 = arith.constant 0 : i32
    %c0_i32_2 = arith.constant 0 : i32
    return %c0_i32, %c0_i32_0, %c0_i32_1 : i32, i32, i32
  }
  func.func @transform_7(%arg0: i32) -> (i32, i32, i32) {
    %c0_i32 = arith.constant 0 : i32
    %c0_i32_0 = arith.constant 0 : i32
    %c0_i32_1 = arith.constant 0 : i32
    %c0_i32_2 = arith.constant 0 : i32
    return %c0_i32, %c0_i32_0, %c0_i32_1 : i32, i32, i32
  }
  func.func @transform_8(%arg0: i32) -> (i32, i32, i32) {
    %c0_i32 = arith.constant 0 : i32
    %c0_i32_0 = arith.constant 0 : i32
    %c0_i32_1 = arith.constant 0 : i32
    %c0_i32_2 = arith.constant 0 : i32
    return %c0_i32, %c0_i32_0, %c0_i32_1 : i32, i32, i32
  }
  func.func @transform_9(%arg0: i32) -> (i32, i32) {
    %c0_i32 = arith.constant 0 : i32
    %c0_i32_0 = arith.constant 0 : i32
    %c0_i32_1 = arith.constant 0 : i32
    return %c0_i32, %c0_i32_0 : i32, i32
  }
  func.func @transform_10(%arg0: i32) -> (i32, i32) {
    %c0_i32 = arith.constant 0 : i32
    %c0_i32_0 = arith.constant 0 : i32
    %c0_i32_1 = arith.constant 0 : i32
    return %c0_i32, %c0_i32_0 : i32, i32
  }
  func.func @transform_11(%arg0: i32) -> i32 {
    %c0_i32 = arith.constant 0 : i32
    %c0_i32_0 = arith.constant 0 : i32
    return %c0_i32 : i32
  }
  func.func @transform_12(%arg0: i32) -> i32 {
    %c0_i32 = arith.constant 0 : i32
    %c0_i32_0 = arith.constant 0 : i32
    return %c0_i32 : i32
  }
  func.func @transform_13(%arg0: i32) -> (i32, i32, i32) {
    %c0_i32 = arith.constant 0 : i32
    %c0_i32_0 = arith.constant 0 : i32
    %c0_i32_1 = arith.constant 0 : i32
    return %arg0, %c0_i32, %c0_i32_0 : i32, i32, i32
  }
  func.func @transform_14(%arg0: i32) -> (i32, i32, i32) {
    %c0_i32 = arith.constant 0 : i32
    %c0_i32_0 = arith.constant 0 : i32
    %c0_i32_1 = arith.constant 0 : i32
    return %arg0, %c0_i32, %c0_i32_0 : i32, i32, i32
  }
}

</mosaic_0001>

<bundles_post_ra>
// kernel: codet5_forward.1
= control target key start
LH: loop header
LB: loop body
LE: loop exit
PB: predicated region body
PF: predicated region fallthrough
CT: control target
= control target key end

     0   :  { %s3837_s0 = inlined_call_operand.hbm [shape: s32[2,1,8], index: 0, kind: input, shape index: {}]   ;;  %s3838_s1 = inlined_call_operand.vmem [shape: s32[2,8,1], index: 1, kind: input, shape index: {}]   ;;  %s3839_s2 = inlined_call_operand.hbm [shape: f32[128,128], index: 2, kind: input, shape index: {}]   ;;  %s3840_s3 = inlined_call_operand.hbm [shape: f32[2,4,128,384], index: 3, kind: input, shape index: {}]   ;;  %s3841_s4 = inlined_call_operand.hbm [shape: f32[2,4,128,128], index: 4, kind: input, shape index: {}]   ;;  %s3842_s5 = inlined_call_operand.hbm [shape: f32[2,1,128], index: 5, kind: input, shape index: {}]   ;;  %s3843_s6 = inlined_call_operand.hbm [shape: f32[2,128,128], index: 6, kind: input, shape index: {}]   ;;  %s3844_s7 = inlined_call_operand.hbm [shape: f32[2,128,128], index: 7, kind: input, shape index: {}]   ;;  %s3845_s8 = inlined_call_operand.hbm [shape: f32[2,1,128], index: 8, kind: input, shape index: {}]   ;;  %s3846_s9 = inlined_call_operand.hbm [shape: f32[1,128], index: 9, kind: input, shape index: {}]   ;;  %s3847_s10 = inlined_call_operand.hbm [shape: f32[1,128], index: 10, kind: input, shape index: {}]   ;;  %s3848_s11 = inlined_call_operand.<no memory space> [shape: f32[1], index: 11, kind: input, shape index: {}]   ;;  %s3849_s12 = inlined_call_operand.hbm [shape: f32[2], index: 12, kind: input, shape index: {}]   ;;  %s3850_s13 = inlined_call_operand.vmem [shape: f32[2,8,128], index: 13, kind: output, shape index: {0}]   ;;  %s3851_s14 = inlined_call_operand.vmem [shape: f32[2,8,128], index: 14, kind: output, shape index: {1}]  }
   0x1   :  { %3854 = sst [smem:[#allocation28_spill]] %s3839_s2 }
   0x2   :  { %3855 = sst [smem:[#allocation29_spill]] %s3840_s3 }
   0x3   :  { %3856 = sst [smem:[#allocation30_spill]] %s3841_s4 }
   0x4   :  { %3857 = sst [smem:[#allocation31_spill]] %s3842_s5 }
   0x5   :  { %3858 = sst [smem:[#allocation32_spill]] %s3843_s6 }
   0x6   :  { %3859 = sst [smem:[#allocation33_spill]] %s3845_s8 }
   0x7   :  { %3860 = sst [smem:[#allocation34_spill]] %s3851_s14 }
   0x8   :  { %20 = sst [smem:[#allocation2]] %s3848_s11 }
   0x9   :  { %21 = vsyncpa [#allocation4], 0 }
   0xa   :  { %23 = vsyncpa [#allocation4 + $0x1], 0 }
   0xb   :  { %24 = vsyncpa [#allocation7], 0 }
   0xc   :  { %25 = vsyncpa [#allocation10], 0 }
   0xd   :  { %26 = vsyncpa [#allocation13], 0 }
   0xe   :  { %27 = vsyncpa [#allocation16], 0 }
   0xf   :  { %28 = vsyncpa [#allocation19], 0 }
  0x10   :  { %29 = vsyncpa [#allocation5], 0  ;;  %s3533_s15 = smov 0   ;;  %s3535_s16 = smov 0  }
  0x11   :  { %s3537_s17 = smov 0   ;;  %s3539_s18 = smov 0  }
  0x12 LB: > { %s3861_s2 = sld [smem:[#allocation28_spill]]  ;;  %s3557_s21 = sadd.s32 4294967295, %s3434_s18   ;;  %s3434_s18 = sphi %s3539_s18, %s3877_s18   ;;  %s3430_s17 = sphi %s3537_s17, %s3876_s17   ;;  %s3426_s16 = sphi %s3535_s16, %s3875_s16   ;;  %s3422_s15 = sphi %s3533_s15, %s3874_s15  }
  0x13   : > { %p2819_p0 = scmp.ge.s32.totalorder %s3434_s18, 1  ;;  %p56_p1 = scmp.eq.s32.totalorder %s3557_s21, 0 }
  0x14   : > { %p375_p2 = scmp.lt.s32.totalorder %s3434_s18, 3  ;;  %s3436_s23 = smov [#allocation6]  }
  0x15   : > { %s388_s24 = sshll.u32 %s3436_s23, 4  ;;  %s3863_s4 = sld [smem:[#allocation30_spill]]  ;;  %s389_s24 = int_to_ptr.vmem [resolvable:$true] %s388_s24 }
  0x16   : > { %p3562_p3 = pnand %p2819_p0, %p375_p2  ;;  %s3865_s6 = sld [smem:[#allocation32_spill]] }
  0x17   : > { %s3437_s19 = smov [#allocation9]   ;;  %s3853_s14 = smov 8  }
  0x18   : > { %s386_s20 = sshll.u32 %s3861_s2, 4  ;;  %p2899_p4 = pneg %p3562_p3  ;;  %s387_s20 = int_to_ptr.hbm [resolvable:$true] %s386_s20 }
  0x19   : > { %s416_s23 = sshll.u32 %s3437_s19, 4  ;;  %s3852_s2 = smov 128   ;;  %s417_s23 = int_to_ptr.vmem [resolvable:$true] %s416_s23 }
  0x1a   : > { %p3573_p5 = pnand %p2899_p4, %p56_p1  ;;  %s3440_s25 = smov [#allocation12]  }
  0x1b   : > { %s414_s27 = sshll.u32 %s3863_s4, 4  ;;  %s444_s26 = sshll.u32 %s3440_s25, 4  ;;  %s415_s27 = int_to_ptr.hbm [resolvable:$true] %s414_s27  ;;  %s445_s26 = int_to_ptr.vmem [resolvable:$true] %s444_s26 }
  0x1c   : > { %s442_s11 = sshll.u32 %s3865_s6, 4  ;;  %s3866_s8 = sld [smem:[#allocation33_spill]]  ;;  %s443_s11 = int_to_ptr.hbm [resolvable:$true] %s442_s11 }
  0x1d   : > { %2902 = dma.hbm_to_vmem [thread:$0]  (!%p3573_p5), %s387_s20, 2048, %s389_s24, [#allocation7], %s3852_s2, %s3852_s2, %s3853_s14  }
  0x1e   : > { %2908 = dma.hbm_to_vmem [thread:$0]  (!%p3573_p5), %s415_s27, 16384, %s417_s23, [#allocation10], %s3852_s2, %s3852_s2, %s3853_s14  }
  0x1f   : > { %2914 = dma.hbm_to_vmem [thread:$0]  (!%p3573_p5), %s443_s11, 4096, %s445_s26, [#allocation13], %s3852_s2, %s3852_s2, %s3853_s14  }
  0x20   : > { %s3441_s20 = smov [#allocation15]   ;;  %s3867_s3 = sld [smem:[#allocation29_spill]] }
  0x21   : > { %s472_s24 = sshll.u32 %s3441_s20, 4  ;;  %s3442_s23 = smov 16   ;;  %s473_s24 = int_to_ptr.vmem [resolvable:$true] %s472_s24 }
  0x22   : > { %s470_s19 = sshll.u32 %s3866_s8, 4  ;;  %s3443_s25 = smov 1   ;;  %s471_s19 = int_to_ptr.hbm [resolvable:$true] %s470_s19 }
  0x23   : > { %2920 = dma.hbm_to_vmem [thread:$0]  (!%p3573_p5), %s471_s19, 32, %s473_s24, [#allocation16], %s3442_s23, %s3442_s23, %s3443_s25  }
  0x24   : > { %s3444_s29 = smov [#allocation8]   ;;  %s3868_s5 = sld [smem:[#allocation31_spill]] }
  0x25   : > { %s402_s30 = sshll.u32 %s3444_s29, 4  ;;  %s3445_s20 = smov 384   ;;  %s403_s30 = int_to_ptr.vmem [resolvable:$true] %s402_s30 }
  0x26   : > { %s400_s27 = sshll.u32 %s3867_s3, 4  ;;  %s3446_s2 = smov 24   ;;  %s401_s27 = int_to_ptr.hbm [resolvable:$true] %s400_s27 }
  0x27   : > { %2905 = dma.hbm_to_vmem [thread:$0]  (!%p3573_p5), %s401_s27, 49152, %s403_s30, [#allocation7], %s3445_s20, %s3445_s20, %s3446_s2  }
  0x28   : > { %s3447_s4 = smov [#allocation11]   ;;  %s456_s19 = sshll.u32 %s3844_s7, 4  ;;  %s457_s19 = int_to_ptr.hbm [resolvable:$true] %s456_s19 }
  0x29   : > { %s430_s6 = sshll.u32 %s3447_s4, 4  ;;  %s485_s29 = sshll.u32 %s3846_s9, 4  ;;  %s431_s6 = int_to_ptr.vmem [resolvable:$true] %s430_s6  ;;  %s486_s29 = int_to_ptr.hbm [resolvable:$true] %s485_s29 }
  0x2a   : > { %s428_s26 = sshll.u32 %s3868_s5, 4  ;;  %s3448_s11 = smov [#allocation14]   ;;  %s429_s26 = int_to_ptr.hbm [resolvable:$true] %s428_s26 }
  0x2b   : > { %2911 = dma.hbm_to_vmem [thread:$0]  (!%p3573_p5), %s429_s26, 32, %s431_s6, [#allocation10], %s3442_s23, %s3442_s23, %s3443_s25  }
  0x2c   : > { %s458_s5 = sshll.u32 %s3448_s11, 4  ;;  %s3869_s2 = smov 8   ;;  %s459_s5 = int_to_ptr.vmem [resolvable:$true] %s458_s5 }
  0x2d   : > { %s3870_s27 = smov 128   ;;  %s3449_s3 = smov [#allocation17]  }
  0x2e   : > { %2917 = dma.hbm_to_vmem [thread:$0]  (!%p3573_p5), %s457_s19, 4096, %s459_s5, [#allocation13], %s3870_s27, %s3870_s27, %s3869_s2  }
  0x2f   : > { %s487_s14 = sshll.u32 %s3449_s3, 4  ;;  %s497_s30 = sshll.u32 %s3847_s10, 4  ;;  %s488_s14 = int_to_ptr.vmem [resolvable:$true] %s487_s14  ;;  %s498_s30 = int_to_ptr.hbm [resolvable:$true] %s497_s30 }
  0x30   : > { %2923 = dma.hbm_to_vmem [thread:$0]  (!%p3573_p5), %s486_s29, 16, %s488_s14, [#allocation16]  }
  0x31   : > { %s512_s5 = sshll.u32 %s3849_s12, 4  ;;  %s3450_s4 = smov [#allocation18]   ;;  %s513_s5 = int_to_ptr.hbm [resolvable:$true] %s512_s5 }
  0x32   : > { %s499_s6 = sshll.u32 %s3450_s4, 4  ;;  %s3451_s19 = smov [#allocation20]   ;;  %s500_s6 = int_to_ptr.vmem [resolvable:$true] %s499_s6 }
  0x33   : > { %2926 = dma.hbm_to_vmem [thread:$0]  (!%p3573_p5), %s498_s30, 16, %s500_s6, [#allocation19]  }
  0x34   : > { %2929 = dma.hbm_to_smem (!%p3573_p5), %s513_s5, 16, %s3451_s19, [#allocation5]  }
  0x35   : > { %s3634_s24 = sadd.s32 1, %s3434_s18   ;;  %s42_s8 = sadd.s32 1, %s3430_s17 }
  0x36   : > { %s39_s29 = ssub.s32 %s3434_s18, %s3634_s24  ;;  %p49_p6 = scmp.ne.s32.totalorder %s3430_s17, %s3426_s16 }
  0x37   : > { %p40_p7 = scmp.eq.s32.totalorder %s39_s29, 0  ;;  %p50_p8 = scmp.eq.s32.totalorder %s3434_s18, 0 }
  0x38   : > { %p55_p9 = scmp.ne.s32.totalorder %s3426_s16, %s3422_s15  ;;  %p2944_p10 = scmp.lt.s32.totalorder %s3434_s18, 2 }
  0x39   : > { %s3646_s11 = scalar_select %p40_p7, %s3430_s17, %s42_s8  }
  0x3a   : > { %p51_p11 = por %p50_p8, %p49_p6  ;;  %p3650_p12 = por %p56_p1, %p55_p9 }
  0x3b   : > { %s523_s28 = sand.u32 1, %s3430_s17   ;;  %s529_s14 = scalar_lea.hbm %s3837_s0, %s3434_s18 }
  0x3c   : > { %s531_s23 = sshll.u32 %s529_s14, 4  ;;  %s526_s25 = scalar_lea.vmem [#allocation3], %s523_s28  ;;  %s532_s23 = int_to_ptr.hbm [resolvable:$true] %s531_s23 }
  0x3d   : > { %s533_s30 = sshll.u32 %s526_s25, 4  ;;  %p3659_p13 = pnand %p2944_p10, %p51_p11  ;;  %s534_s30 = int_to_ptr.vmem [resolvable:$true] %s533_s30 }
  0x3e   : > { %s524_s26 = scalar_lea.sflag [#allocation4], %s523_s28  ;;  %s3346_s20 = sshra.s32 %s532_s23, 4  ;;  %s3347_s20 = int_to_ptr.hbm [resolvable:$true] %s3346_s20 }
  0x3f   : > { %s3348_s5 = scalar_lea.hbm %s3347_s20, 1  ;;  %p3350_p2 = pneg %p3659_p13 }
  0x40   : > { %p3349_p0 = scmp.ne.s32.totalorder %s3347_s20, %s3348_s5  ;;  %s3353_s6 = scalar_lea.hbm %s3837_s0, 2 }
  0x41   : > { %p3354_p6 = scmp.lt.s32.totalorder %s3347_s20, %s3837_s0  ;;  %p3355_p7 = scmp.lt.s32.totalorder %s3353_s6, %s3348_s5 }
  0x42   : > { %p3351_p4 = pnand %p3350_p2, %p3349_p0 }
  0x43   : > { %p3356_p8 = por %p3355_p7, %p3354_p6 }
  0x44   : > { %p3352_p5 = pneg %p3351_p4 }
  0x46   : > { %p3357_p9 = pnand %p3356_p8, %p3352_p5 }
  0x48   : > { %3360 = shalt.err (!%p3357_p9)
}
  0x49   : > { %2933 = dma.hbm_to_vmem [thread:$0]  (!%p3659_p13), %s532_s23, 16, %s534_s30, %s524_s26  }
  0x4a   : > { %549 = sbr.rel (%p3562_p3) target bundleno = 3403 (0xd4b), region = 72  ;;  %s551_s29 = sand.u32 (!%p3562_p3), 1, %s3426_s16  }
  0x4b   : > { %s552_s28 = scalar_lea.sflag (!%p3562_p3), [#allocation4], %s551_s29  ;;  %s3676_s27 = scalar_lea.vmem (!%p3562_p3), [#allocation3], %s551_s29 }
  0x4f   : > { %3393 = dma.done.wait (%p3650_p12), %s552_s28, 16  }
  0x50   : > { %3395 = vsyncadd (%p3650_p12), %s552_s28, 4294967280 }
  0x51   : > { %3397 = dma.done.wait (%p56_p1), [#allocation7], 51200  }
  0x52   : > { %3399 = vsyncadd (%p56_p1), [#allocation7], 4294916096 }
  0x53   : > { %3401 = dma.done.wait (%p56_p1), [#allocation10], 16416  }
  0x54   : > { %3403 = vsyncadd (%p56_p1), [#allocation10], 4294950880 }
  0x55   : > { %3405 = dma.done.wait (%p56_p1), [#allocation13], 8192  }
  0x56   : > { %3407 = vsyncadd (%p56_p1), [#allocation13], 4294959104 }
  0x57   : > { %3409 = dma.done.wait (%p56_p1), [#allocation16], 48  }
  0x58   : > { %3411 = vsyncadd (%p56_p1), [#allocation16], 4294967248 }
  0x59   : > { %3413 = dma.done.wait (%p56_p1), [#allocation19], 16  }
  0x5a   : > { %3415 = vsyncadd (%p56_p1), [#allocation19], 4294967280 }
  0x5b   : > { %3417 = dma.done.wait (%p56_p1), [#allocation5], 16  }
  0x5c   : > { %3419 = vsyncadd (%p56_p1), [#allocation5], 4294967280 }
  0x5d   : > { %610 = sfence }
  0x5e   : > { %p657_p3 = scmp.lt.s32.totalorder %s3557_s21, 1  ;;  %v694_v0 = vld [vmem:[#allocation6 + $0x78] sm:$0xff]  ;;  %v693_v1 = vld [vmem:[#allocation6 + $0x70] sm:$0xff]  ;;  %v3452_v2 = vmov 0   ;;  %v692_v3 = vld [vmem:[#allocation6 + $0x68] sm:$0xff]  ;;  %v671_v18 = vlaneseq  ;;  %v3453_v21 = vmov 1.0  }
  0x5f   : > { %3006 = vset.pattern.permute.xlu0 %v3452_v2  ;;  %695 = vmatpush.msra.mxu0 %v694_v0  ;;  %v691_v4 = vld [vmem:[#allocation6 + $0x60] sm:$0xff]  ;;  %v690_v6 = vld [vmem:[#allocation6 + $0x58] sm:$0xff]  ;;  %v689_v7 = vld [vmem:[#allocation6 + $0x50] sm:$0xff]  ;;  %vm1253_vm5 = vcmask 64512   ;;  %vm2553_vm15 = vcmask 1040384   ;;  %s2576_s25 = sld [smem:[#allocation2]] }
  0x60   : > { %s658_s22 = scalar_select %p657_p3, %s3557_s21, 1  ;;  %v688_v8 = vld [vmem:[#allocation6 + $0x48] sm:$0xff]  ;;  %v687_v9 = vld [vmem:[#allocation6 + $0x40] sm:$0xff]  ;;  %v686_v10 = vld [vmem:[#allocation6 + $0x38] sm:$0xff]  ;;  %v672_v19 = vand.u32 127, %v671_v18 }
  0x61   : > { %696 = vmatpush.msra.mxu0 %v693_v1  ;;  %v685_v11 = vld [vmem:[#allocation6 + $0x30] sm:$0xff]  ;;  %v684_v12 = vld [vmem:[#allocation6 + $0x28] sm:$0xff]  ;;  %v683_v13 = vld [vmem:[#allocation6 + $0x20] sm:$0xff]  ;;  %s2598_s30 = sld [smem:[#allocation20 + %s3557_s21]] }
  0x62   : > { %s3708_s2 = sshll.u32 %s658_s22, 3  ;;  %v682_v14 = vld [vmem:[#allocation6 + $0x18] sm:$0xff]  ;;  %v681_v15 = vld [vmem:[#allocation6 + $0x10] sm:$0xff]  ;;  %v680_v16 = vld [vmem:[#allocation6 + $0x8] sm:$0xff]  ;;  %s3873_s4 = sld [smem:[#allocation34_spill]] }
  0x63   : > { %s660_s23 = scalar_lea.vmem %s3838_s1, %s3708_s2  ;;  %697 = vmatpush.msra.mxu0 %v692_v3  ;;  %v679_v17 = vld [vmem:[#allocation6] sm:$0xff]  ;;  %v786_v22 = vld [vmem:[#allocation8 + $0x168] sm:$0xff]  ;;  %v787_v23 = vld [vmem:[#allocation8 + $0x170] sm:$0xff]  ;;  %s664_s20 = scalar_lea.vmem %s3850_s13, %s3708_s2 }
  0x64   : > { %v670_v5 = vld [vmem:[%s660_s23] sm:$0xff]  ;;  %933 = vmatpush.msra.mxu1 %v786_v22  ;;  %953 = vmatpush.msra.mxu2 %v787_v23  ;;  %v834_v25 = vld [vmem:[#allocation8 + $0x2e8] sm:$0xff]  ;;  %v783_v26 = vld [vmem:[#allocation8 + $0x150] sm:$0xff] }
  0x65   : > { %674 = vperm.xlu0 %3006, %v670_v5   ;;  %698 = vmatpush.msra.mxu0 %v691_v4  ;;  %v788_v24 = vld [vmem:[#allocation8 + $0x178] sm:$0xff]  ;;  %v785_v28 = vld [vmem:[#allocation8 + $0x160] sm:$0xff]  ;;  %v831_v29 = vld [vmem:[#allocation8 + $0x2d0] sm:$0xff] }
  0x66   : > { %v784_v27 = vld [vmem:[#allocation8 + $0x158] sm:$0xff]  ;;  %973 = vmatpush.msra.mxu3 %v788_v24  ;;  %934 = vmatpush.msra.mxu1 %v783_v26  ;;  %v781_v31 = vld [vmem:[#allocation8 + $0x140] sm:$0xff]  ;;  %v782_v32 = vld [vmem:[#allocation8 + $0x148] sm:$0xff] }
  0x67   : > { %699 = vmatpush.msra.mxu0 %v690_v6  ;;  %v780_v30 = vld [vmem:[#allocation8 + $0x138] sm:$0xff]  ;;  %954 = vmatpush.msra.mxu2 %v784_v27  ;;  %v777_v34 = vld [vmem:[#allocation8 + $0x120] sm:$0xff]  ;;  %v778_v35 = vld [vmem:[#allocation8 + $0x128] sm:$0xff]  ;;  %s2608_s5 = ssub.f32 1.0, %s2598_s30 }
  0x68   : > { %v828_v33 = vld [vmem:[#allocation8 + $0x2b8] sm:$0xff]  ;;  %974 = vmatpush.msra.mxu3 %v785_v28  ;;  %935 = vmatpush.msra.mxu1 %v780_v30  ;;  %v779_v36 = vld [vmem:[#allocation8 + $0x130] sm:$0xff]  ;;  %v825_v37 = vld [vmem:[#allocation8 + $0x2a0] sm:$0xff]  ;;  %s668_s6 = scalar_lea.vmem %s3873_s4, %s3708_s2 }
  0x69   : > { %700 = vmatpush.msra.mxu0 %v689_v7  ;;  %955 = vmatpush.msra.mxu2 %v781_v31  ;;  %v774_v38 = vld [vmem:[#allocation8 + $0x108] sm:$0xff]  ;;  %v775_v39 = vld [vmem:[#allocation8 + $0x110] sm:$0xff]  ;;  %v776_v40 = vld [vmem:[#allocation8 + $0x118] sm:$0xff] }
  0x6a   : > { %975 = vmatpush.msra.mxu3 %v782_v32  ;;  %936 = vmatpush.msra.mxu1 %v777_v34  ;;  %v822_v41 = vld [vmem:[#allocation8 + $0x288] sm:$0xff]  ;;  %v771_v42 = vld [vmem:[#allocation8 + $0xf0] sm:$0xff]  ;;  %v772_v43 = vld [vmem:[#allocation8 + $0xf8] sm:$0xff] }
  0x6b   : > { %701 = vmatpush.msra.mxu0 %v688_v8  ;;  %956 = vmatpush.msra.mxu2 %v778_v35  ;;  %v773_v44 = vld [vmem:[#allocation8 + $0x100] sm:$0xff]  ;;  %v819_v45 = vld [vmem:[#allocation8 + $0x270] sm:$0xff]  ;;  %v768_v46 = vld [vmem:[#allocation8 + $0xd8] sm:$0xff] }
  0x6c   : > { %976 = vmatpush.msra.mxu3 %v779_v36  ;;  %937 = vmatpush.msra.mxu1 %v774_v38  ;;  %v769_v47 = vld [vmem:[#allocation8 + $0xe0] sm:$0xff]  ;;  %v770_v48 = vld [vmem:[#allocation8 + $0xe8] sm:$0xff]  ;;  %v816_v49 = vld [vmem:[#allocation8 + $0x258] sm:$0xff] }
  0x6d   : > { %702 = vmatpush.msra.mxu0 %v687_v9  ;;  %957 = vmatpush.msra.mxu2 %v775_v39  ;;  %v765_v50 = vld [vmem:[#allocation8 + $0xc0] sm:$0xff]  ;;  %v766_v51 = vld [vmem:[#allocation8 + $0xc8] sm:$0xff]  ;;  %v767_v52 = vld [vmem:[#allocation8 + $0xd0] sm:$0xff] }
  0x6e   : > { %977 = vmatpush.msra.mxu3 %v776_v40  ;;  %938 = vmatpush.msra.mxu1 %v771_v42  ;;  %v813_v53 = vld [vmem:[#allocation8 + $0x240] sm:$0xff]  ;;  %v762_v54 = vld [vmem:[#allocation8 + $0xa8] sm:$0xff]  ;;  %v763_v55 = vld [vmem:[#allocation8 + $0xb0] sm:$0xff] }
  0x6f   : > { %703 = vmatpush.msra.mxu0 %v686_v10  ;;  %958 = vmatpush.msra.mxu2 %v772_v43  ;;  %v764_v56 = vld [vmem:[#allocation8 + $0xb8] sm:$0xff]  ;;  %v810_v57 = vld [vmem:[#allocation8 + $0x228] sm:$0xff]  ;;  %v759_v58 = vld [vmem:[#allocation8 + $0x90] sm:$0xff] }
  0x70   : > { %978 = vmatpush.msra.mxu3 %v773_v44  ;;  %939 = vmatpush.msra.mxu1 %v768_v46  ;;  %v760_v59 = vld [vmem:[#allocation8 + $0x98] sm:$0xff]  ;;  %v761_v60 = vld [vmem:[#allocation8 + $0xa0] sm:$0xff]  ;;  %v807_v61 = vld [vmem:[#allocation8 + $0x210] sm:$0xff] }
  0x71   : > { %704 = vmatpush.msra.mxu0 %v685_v11  ;;  %959 = vmatpush.msra.mxu2 %v769_v47  ;;  %v756_v62 = vld [vmem:[#allocation8 + $0x78] sm:$0xff]  ;;  %v757_v63 = vld [vmem:[#allocation8 + $0x80] sm:$0xff]  ;;  %v758_v0 = vld [vmem:[#allocation8 + $0x88] sm:$0xff] }
  0x72   : > { %979 = vmatpush.msra.mxu3 %v770_v48  ;;  %940 = vmatpush.msra.mxu1 %v765_v50  ;;  %v804_v1 = vld [vmem:[#allocation8 + $0x1f8] sm:$0xff]  ;;  %v753_v2 = vld [vmem:[#allocation8 + $0x60] sm:$0xff]  ;;  %v754_v3 = vld [vmem:[#allocation8 + $0x68] sm:$0xff] }
  0x73   : > { %705 = vmatpush.msra.mxu0 %v684_v12  ;;  %960 = vmatpush.msra.mxu2 %v766_v51  ;;  %v755_v4 = vld [vmem:[#allocation8 + $0x70] sm:$0xff]  ;;  %v801_v5 = vld [vmem:[#allocation8 + $0x1e0] sm:$0xff]  ;;  %v750_v6 = vld [vmem:[#allocation8 + $0x48] sm:$0xff] }
  0x74   : > { %980 = vmatpush.msra.mxu3 %v767_v52  ;;  %941 = vmatpush.msra.mxu1 %v762_v54  ;;  %v751_v7 = vld [vmem:[#allocation8 + $0x50] sm:$0xff]  ;;  %v752_v8 = vld [vmem:[#allocation8 + $0x58] sm:$0xff]  ;;  %v798_v9 = vld [vmem:[#allocation8 + $0x1c8] sm:$0xff] }
  0x75   : > { %706 = vmatpush.msra.mxu0 %v683_v13  ;;  %961 = vmatpush.msra.mxu2 %v763_v55  ;;  %v747_v10 = vld [vmem:[#allocation8 + $0x30] sm:$0xff]  ;;  %v748_v11 = vld [vmem:[#allocation8 + $0x38] sm:$0xff]  ;;  %v749_v12 = vld [vmem:[#allocation8 + $0x40] sm:$0xff] }
  0x76   : > { %981 = vmatpush.msra.mxu3 %v764_v56  ;;  %942 = vmatpush.msra.mxu1 %v759_v58  ;;  %v795_v13 = vld [vmem:[#allocation8 + $0x1b0] sm:$0xff]  ;;  %v741_v18 = vld [vmem:[#allocation8] sm:$0xff]  ;;  %v882_v26 = vld [vmem:[#allocation8 + $0x468] sm:$0xff] }
  0x77   : > { %707 = vmatpush.msra.mxu0 %v682_v14  ;;  %962 = vmatpush.msra.mxu2 %v760_v59  ;;  %v744_v14 = vld [vmem:[#allocation8 + $0x18] sm:$0xff]  ;;  %v789_v23 = vld [vmem:[#allocation8 + $0x180] sm:$0xff]  ;;  %v835_v24 = vld [vmem:[#allocation8 + $0x2f0] sm:$0xff] }
  0x78   : > { %982 = vmatpush.msra.mxu3 %v761_v60  ;;  %943 = vmatpush.msra.mxu1 %v756_v62  ;;  %v883_v27 = vld [vmem:[#allocation8 + $0x470] sm:$0xff]  ;;  %v832_v28 = vld [vmem:[#allocation8 + $0x2d8] sm:$0xff]  ;;  %v829_v32 = vld [vmem:[#allocation8 + $0x2c0] sm:$0xff] }
  0x79   : > { %708 = vmatpush.msra.mxu0 %v681_v15  ;;  %963 = vmatpush.msra.mxu2 %v757_v63  ;;  %v745_v15 = vld [vmem:[#allocation8 + $0x20] sm:$0xff]  ;;  %v879_v30 = vld [vmem:[#allocation8 + $0x450] sm:$0xff]  ;;  %v880_v31 = vld [vmem:[#allocation8 + $0x458] sm:$0xff] }
  0x7a   : > { %983 = vmatpush.msra.mxu3 %v758_v0  ;;  %944 = vmatpush.msra.mxu1 %v753_v2  ;;  %v876_v34 = vld [vmem:[#allocation8 + $0x438] sm:$0xff]  ;;  %v877_v35 = vld [vmem:[#allocation8 + $0x440] sm:$0xff]  ;;  %v826_v36 = vld [vmem:[#allocation8 + $0x2a8] sm:$0xff] }
  0x7b   : > { %709 = vmatpush.msra.mxu0 %v680_v16  ;;  %964 = vmatpush.msra.mxu2 %v754_v3  ;;  %v746_v16 = vld [vmem:[#allocation8 + $0x28] sm:$0xff]  ;;  %v873_v38 = vld [vmem:[#allocation8 + $0x420] sm:$0xff]  ;;  %v823_v40 = vld [vmem:[#allocation8 + $0x290] sm:$0xff] }
  0x7c   : > { %984 = vmatpush.msra.mxu3 %v755_v4  ;;  %945 = vmatpush.msra.mxu1 %v750_v6  ;;  %v874_v39 = vld [vmem:[#allocation8 + $0x428] sm:$0xff]  ;;  %v871_v43 = vld [vmem:[#allocation8 + $0x410] sm:$0xff]  ;;  %v820_v44 = vld [vmem:[#allocation8 + $0x278] sm:$0xff] }
  0x7d   : > { %710 = vmatpush.msra.mxu0 %v679_v17  ;;  %965 = vmatpush.msra.mxu2 %v751_v7  ;;  %v792_v17 = vld [vmem:[#allocation8 + $0x198] sm:$0xff]  ;;  %v870_v42 = vld [vmem:[#allocation8 + $0x408] sm:$0xff]  ;;  %v867_v46 = vld [vmem:[#allocation8 + $0x3f0] sm:$0xff] }
  0x7e   : > { %985 = vmatpush.msra.mxu3 %v752_v8  ;;  %946 = vmatpush.msra.mxu1 %v747_v10  ;;  %v868_v47 = vld [vmem:[#allocation8 + $0x3f8] sm:$0xff]  ;;  %v817_v48 = vld [vmem:[#allocation8 + $0x260] sm:$0xff]  ;;  %v814_v52 = vld [vmem:[#allocation8 + $0x248] sm:$0xff] }
  0x7f   : > { %993 = vmatpush.msrb.mxu0 %v834_v25  ;;  %966 = vmatpush.msra.mxu2 %v748_v11  ;;  %v836_v25 = vld [vmem:[#allocation8 + $0x2f8] sm:$0xff]  ;;  %v865_v51 = vld [vmem:[#allocation8 + $0x3e0] sm:$0xff]  ;;  %v862_v55 = vld [vmem:[#allocation8 + $0x3c8] sm:$0xff] }
  0x80   : > { %986 = vmatpush.msra.mxu3 %v749_v12  ;;  %947 = vmatpush.msra.mxu1 %v744_v14  ;;  %v864_v50 = vld [vmem:[#allocation8 + $0x3d8] sm:$0xff]  ;;  %v861_v54 = vld [vmem:[#allocation8 + $0x3c0] sm:$0xff]  ;;  %v811_v56 = vld [vmem:[#allocation8 + $0x230] sm:$0xff] }
  0x81   : > { %994 = vmatpush.msrb.mxu0 %v831_v29  ;;  %967 = vmatpush.msra.mxu2 %v745_v15  ;;  %v833_v29 = vld [vmem:[#allocation8 + $0x2e0] sm:$0xff]  ;;  %v858_v58 = vld [vmem:[#allocation8 + $0x3a8] sm:$0xff]  ;;  %v859_v59 = vld [vmem:[#allocation8 + $0x3b0] sm:$0xff] }
  0x82   : > { %987 = vmatpush.msra.mxu3 %v746_v16  ;;  %948 = vmatpush.msra.mxu1 %v741_v18  ;;  %v808_v60 = vld [vmem:[#allocation8 + $0x218] sm:$0xff]  ;;  %v855_v62 = vld [vmem:[#allocation8 + $0x390] sm:$0xff]  ;;  %v805_v0 = vld [vmem:[#allocation8 + $0x200] sm:$0xff] }
  0x83   : > { %995 = vmatpush.msrb.mxu0 %v828_v33  ;;  %v830_v33 = vld [vmem:[#allocation8 + $0x2c8] sm:$0xff]  ;;  %v856_v63 = vld [vmem:[#allocation8 + $0x398] sm:$0xff]  ;;  %v853_v3 = vld [vmem:[#allocation8 + $0x380] sm:$0xff] }
  0x84   : > { %1013 = vmatpush.msrb.mxu1 %v835_v24  ;;  %v852_v2 = vld [vmem:[#allocation8 + $0x378] sm:$0xff]  ;;  %v802_v4 = vld [vmem:[#allocation8 + $0x1e8] sm:$0xff]  ;;  %v849_v6 = vld [vmem:[#allocation8 + $0x360] sm:$0xff] }
  0x85   : > { %996 = vmatpush.msrb.mxu0 %v825_v37  ;;  %v827_v37 = vld [vmem:[#allocation8 + $0x2b0] sm:$0xff]  ;;  %v850_v7 = vld [vmem:[#allocation8 + $0x368] sm:$0xff]  ;;  %v796_v12 = vld [vmem:[#allocation8 + $0x1b8] sm:$0xff] }
  0x86   : > { %1014 = vmatpush.msrb.mxu1 %v832_v28  ;;  %v799_v8 = vld [vmem:[#allocation8 + $0x1d0] sm:$0xff]  ;;  %v846_v10 = vld [vmem:[#allocation8 + $0x348] sm:$0xff]  ;;  %v844_v15 = vld [vmem:[#allocation8 + $0x338] sm:$0xff] }
  0x87   : > { %997 = vmatpush.msrb.mxu0 %v822_v41  ;;  %v824_v41 = vld [vmem:[#allocation8 + $0x298] sm:$0xff]  ;;  %v847_v11 = vld [vmem:[#allocation8 + $0x350] sm:$0xff]  ;;  %v793_v16 = vld [vmem:[#allocation8 + $0x1a0] sm:$0xff] }
  0x88   : > { %1015 = vmatpush.msrb.mxu1 %v829_v32  ;;  %v843_v14 = vld [vmem:[#allocation8 + $0x330] sm:$0xff]  ;;  %v840_v18 = vld [vmem:[#allocation8 + $0x318] sm:$0xff]  ;;  %v838_v24 = vld [vmem:[#allocation8 + $0x308] sm:$0xff] }
  0x89   : > { %998 = vmatpush.msrb.mxu0 %v819_v45  ;;  %v821_v45 = vld [vmem:[#allocation8 + $0x280] sm:$0xff] }
  0x8a   : > { %1016 = vmatpush.msrb.mxu1 %v826_v36 }
  0x8b   : > { %999 = vmatpush.msrb.mxu0 %v816_v49  ;;  %v818_v49 = vld [vmem:[#allocation8 + $0x268] sm:$0xff] }
  0x8c   : > { %1017 = vmatpush.msrb.mxu1 %v823_v40  ;;  %v931_v40 = vld [vmem:[#allocation8 + $0x5f0] sm:$0xff] }
  0x8d   : > { %1000 = vmatpush.msrb.mxu0 %v813_v53  ;;  %v815_v53 = vld [vmem:[#allocation8 + $0x250] sm:$0xff] }
  0x8e   : > { %1018 = vmatpush.msrb.mxu1 %v820_v44  ;;  %v928_v44 = vld [vmem:[#allocation8 + $0x5d8] sm:$0xff] }
  0x8f   : > { %1001 = vmatpush.msrb.mxu0 %v810_v57  ;;  %v812_v57 = vld [vmem:[#allocation8 + $0x238] sm:$0xff] }
  0x90   : > { %1019 = vmatpush.msrb.mxu1 %v817_v48  ;;  %v925_v48 = vld [vmem:[#allocation8 + $0x5c0] sm:$0xff] }
  0x91   : > { %1002 = vmatpush.msrb.mxu0 %v807_v61  ;;  %v809_v61 = vld [vmem:[#allocation8 + $0x220] sm:$0xff] }
  0x92   : > { %1020 = vmatpush.msrb.mxu1 %v814_v52  ;;  %v922_v52 = vld [vmem:[#allocation8 + $0x5a8] sm:$0xff] }
  0x93   : > { %1003 = vmatpush.msrb.mxu0 %v804_v1  ;;  %v806_v1 = vld [vmem:[#allocation8 + $0x208] sm:$0xff] }
  0x94   : > { %1021 = vmatpush.msrb.mxu1 %v811_v56  ;;  %v919_v56 = vld [vmem:[#allocation8 + $0x590] sm:$0xff] }
  0x95   : > { %1004 = vmatpush.msrb.mxu0 %v801_v5  ;;  %v803_v5 = vld [vmem:[#allocation8 + $0x1f0] sm:$0xff] }
  0x96   : > { %1022 = vmatpush.msrb.mxu1 %v808_v60  ;;  %v916_v60 = vld [vmem:[#allocation8 + $0x578] sm:$0xff] }
  0x97   : > { %1005 = vmatpush.msrb.mxu0 %v798_v9  ;;  %v800_v9 = vld [vmem:[#allocation8 + $0x1d8] sm:$0xff] }
  0x98   : > { %1023 = vmatpush.msrb.mxu1 %v805_v0  ;;  %v913_v0 = vld [vmem:[#allocation8 + $0x560] sm:$0xff] }
  0x99   : > { %1006 = vmatpush.msrb.mxu0 %v795_v13  ;;  %v797_v13 = vld [vmem:[#allocation8 + $0x1c0] sm:$0xff] }
  0x9a   : > { %1024 = vmatpush.msrb.mxu1 %v802_v4  ;;  %v910_v4 = vld [vmem:[#allocation8 + $0x548] sm:$0xff] }
  0x9b   : > { %1007 = vmatpush.msrb.mxu0 %v792_v17  ;;  %v794_v17 = vld [vmem:[#allocation8 + $0x1a8] sm:$0xff] }
  0x9c   : > { %1025 = vmatpush.msrb.mxu1 %v799_v8  ;;  %v907_v8 = vld [vmem:[#allocation8 + $0x530] sm:$0xff] }
  0x9d   : > { %1008 = vmatpush.msrb.mxu0 %v789_v23  ;;  %v837_v23 = vld [vmem:[#allocation8 + $0x300] sm:$0xff] }
  0x9e   : > { %1026 = vmatpush.msrb.mxu1 %v796_v12  ;;  %v904_v12 = vld [vmem:[#allocation8 + $0x518] sm:$0xff] }
  0xa0   : > { %1027 = vmatpush.msrb.mxu1 %v793_v16  ;;  %v901_v16 = vld [vmem:[#allocation8 + $0x500] sm:$0xff] }
  0xd7   : > { %v675_v20 = vpop.permute.xlu0 %674 }
  0xd8   : > { %vm676_vm0 = vcmp.eq.s32.totalorder %v675_v20, %v672_v19  ;;  %v742_v19 = vld [vmem:[#allocation8 + $0x8] sm:$0xff] }
  0xd9   : > { %2846 = vmatmul.msk.f32.vlgmr.msra.gmra.mxu0 %vm676_vm0, %v3453_v21  ;;  %v743_v21 = vld [vmem:[#allocation8 + $0x10] sm:$0xff]  ;;  %968 = vmatpush.msra.mxu2 %v742_v19  ;;  %v841_v19 = vld [vmem:[#allocation8 + $0x320] sm:$0xff] }
  0xda   : > { %988 = vmatpush.msra.mxu3 %v743_v21  ;;  %1073 = vmatpush.msra.mxu0 %v883_v27  ;;  %v790_v21 = vld [vmem:[#allocation8 + $0x188] sm:$0xff] }
  0xdb   : > { %1033 = vmatpush.msrb.mxu2 %v836_v25  ;;  %1028 = vmatpush.msrb.mxu1 %v790_v21  ;;  %v898_v21 = vld [vmem:[#allocation8 + $0x4e8] sm:$0xff] }
  0xdc   : > { %1053 = vmatpush.msrb.mxu3 %v882_v26  ;;  %1074 = vmatpush.msra.mxu0 %v880_v31 }
  0xdd   : > { %1034 = vmatpush.msrb.mxu2 %v833_v29 }
  0xde   : > { %1054 = vmatpush.msrb.mxu3 %v879_v30  ;;  %1075 = vmatpush.msra.mxu0 %v877_v35 }
  0xdf   : > { %1035 = vmatpush.msrb.mxu2 %v830_v33 }
  0xe0   : > { %1055 = vmatpush.msrb.mxu3 %v876_v34  ;;  %1076 = vmatpush.msra.mxu0 %v874_v39  ;;  %v3007_v34 = vld [vmem:[#allocation11] ss:$0 sm:$0xff]  ;;  %v930_v39 = vld [vmem:[#allocation8 + $0x5e8] sm:$0xff] }
  0xe1   : > { %1036 = vmatpush.msrb.mxu2 %v827_v37 }
  0xe2   : > { %1056 = vmatpush.msrb.mxu3 %v873_v38  ;;  %1077 = vmatpush.msra.mxu0 %v871_v43  ;;  %v884_v38 = vld [vmem:[#allocation8 + $0x478] sm:$0xff]  ;;  %v927_v43 = vld [vmem:[#allocation8 + $0x5d0] sm:$0xff] }
  0xe3   : > { %1037 = vmatpush.msrb.mxu2 %v824_v41  ;;  %v932_v41 = vld [vmem:[#allocation8 + $0x5f8] sm:$0xff] }
  0xe4   : > { %1057 = vmatpush.msrb.mxu3 %v870_v42  ;;  %1078 = vmatpush.msra.mxu0 %v868_v47  ;;  %v881_v42 = vld [vmem:[#allocation8 + $0x460] sm:$0xff]  ;;  %v924_v47 = vld [vmem:[#allocation8 + $0x5b8] sm:$0xff] }
  0xe5   : > { %1038 = vmatpush.msrb.mxu2 %v821_v45  ;;  %v929_v45 = vld [vmem:[#allocation8 + $0x5e0] sm:$0xff] }
  0xe6   : > { %1058 = vmatpush.msrb.mxu3 %v867_v46  ;;  %1079 = vmatpush.msra.mxu0 %v865_v51  ;;  %v878_v46 = vld [vmem:[#allocation8 + $0x448] sm:$0xff]  ;;  %v921_v51 = vld [vmem:[#allocation8 + $0x5a0] sm:$0xff] }
  0xe7   : > { %1039 = vmatpush.msrb.mxu2 %v818_v49  ;;  %v926_v49 = vld [vmem:[#allocation8 + $0x5c8] sm:$0xff] }
  0xe8   : > { %1059 = vmatpush.msrb.mxu3 %v864_v50  ;;  %1080 = vmatpush.msra.mxu0 %v862_v55  ;;  %v875_v50 = vld [vmem:[#allocation8 + $0x430] sm:$0xff]  ;;  %v918_v55 = vld [vmem:[#allocation8 + $0x588] sm:$0xff] }
  0xe9   : > { %1040 = vmatpush.msrb.mxu2 %v815_v53  ;;  %v923_v53 = vld [vmem:[#allocation8 + $0x5b0] sm:$0xff] }
  0xea   : > { %1060 = vmatpush.msrb.mxu3 %v861_v54  ;;  %1081 = vmatpush.msra.mxu0 %v859_v59  ;;  %v872_v54 = vld [vmem:[#allocation8 + $0x418] sm:$0xff]  ;;  %v915_v59 = vld [vmem:[#allocation8 + $0x570] sm:$0xff] }
  0xeb   : > { %1041 = vmatpush.msrb.mxu2 %v812_v57  ;;  %v920_v57 = vld [vmem:[#allocation8 + $0x598] sm:$0xff] }
  0xec   : > { %1061 = vmatpush.msrb.mxu3 %v858_v58  ;;  %1082 = vmatpush.msra.mxu0 %v856_v63  ;;  %v869_v58 = vld [vmem:[#allocation8 + $0x400] sm:$0xff]  ;;  %v912_v63 = vld [vmem:[#allocation8 + $0x558] sm:$0xff] }
  0xed   : > { %1042 = vmatpush.msrb.mxu2 %v809_v61  ;;  %v917_v61 = vld [vmem:[#allocation8 + $0x580] sm:$0xff] }
  0xee   : > { %1062 = vmatpush.msrb.mxu3 %v855_v62  ;;  %1083 = vmatpush.msra.mxu0 %v853_v3  ;;  %v866_v62 = vld [vmem:[#allocation8 + $0x3e8] sm:$0xff]  ;;  %v909_v3 = vld [vmem:[#allocation8 + $0x540] sm:$0xff] }
  0xef   : > { %1043 = vmatpush.msrb.mxu2 %v806_v1  ;;  %v914_v1 = vld [vmem:[#allocation8 + $0x568] sm:$0xff] }
  0xf0   : > { %1063 = vmatpush.msrb.mxu3 %v852_v2  ;;  %1084 = vmatpush.msra.mxu0 %v850_v7  ;;  %v863_v2 = vld [vmem:[#allocation8 + $0x3d0] sm:$0xff]  ;;  %v906_v7 = vld [vmem:[#allocation8 + $0x528] sm:$0xff] }
  0xf1   : > { %1044 = vmatpush.msrb.mxu2 %v803_v5  ;;  %v911_v5 = vld [vmem:[#allocation8 + $0x550] sm:$0xff] }
  0xf2   : > { %1064 = vmatpush.msrb.mxu3 %v849_v6  ;;  %1085 = vmatpush.msra.mxu0 %v847_v11  ;;  %v860_v6 = vld [vmem:[#allocation8 + $0x3b8] sm:$0xff]  ;;  %v903_v11 = vld [vmem:[#allocation8 + $0x510] sm:$0xff] }
  0xf3   : > { %1045 = vmatpush.msrb.mxu2 %v800_v9  ;;  %v908_v9 = vld [vmem:[#allocation8 + $0x538] sm:$0xff] }
  0xf4   : > { %1065 = vmatpush.msrb.mxu3 %v846_v10  ;;  %1086 = vmatpush.msra.mxu0 %v844_v15  ;;  %v857_v10 = vld [vmem:[#allocation8 + $0x3a0] sm:$0xff]  ;;  %v900_v15 = vld [vmem:[#allocation8 + $0x4f8] sm:$0xff] }
  0xf5   : > { %1046 = vmatpush.msrb.mxu2 %v797_v13  ;;  %v905_v13 = vld [vmem:[#allocation8 + $0x520] sm:$0xff] }
  0xf6   : > { %1066 = vmatpush.msrb.mxu3 %v843_v14  ;;  %1087 = vmatpush.msra.mxu0 %v841_v19  ;;  %v854_v14 = vld [vmem:[#allocation8 + $0x388] sm:$0xff]  ;;  %v897_v19 = vld [vmem:[#allocation8 + $0x4e0] sm:$0xff] }
  0xf7   : > { %1047 = vmatpush.msrb.mxu2 %v794_v17  ;;  %v902_v17 = vld [vmem:[#allocation8 + $0x508] sm:$0xff] }
  0xf8   : > { %1067 = vmatpush.msrb.mxu3 %v840_v18  ;;  %1088 = vmatpush.msra.mxu0 %v838_v24  ;;  %v851_v18 = vld [vmem:[#allocation8 + $0x370] sm:$0xff]  ;;  %v894_v24 = vld [vmem:[#allocation8 + $0x4c8] sm:$0xff] }
  0xfa   : > { %1068 = vmatpush.msrb.mxu3 %v837_v23  ;;  %v848_v23 = vld [vmem:[#allocation8 + $0x358] sm:$0xff] }
 0x156   : > { %v3714_v20 = vpop.f32.mrf.mxu0 }
 0x157   : > { %v721_v22 = vmul.f32 %v3714_v20, %v3714_v20 }
 0x159   : > { %722 = vadd.xlane.f32.xlu0 %v721_v22  ;;  %v791_v22 = vld [vmem:[#allocation8 + $0x190] sm:$0xff] }
 0x15a   : > { %1048 = vmatpush.msrb.mxu2 %v791_v22  ;;  %v899_v22 = vld [vmem:[#allocation8 + $0x4f0] sm:$0xff] }
 0x1cc   : > { %v723_v25 = vpop.xlane.xlu0 %722 }
 0x1cd   : > { %v724_v26 = vmul.f32 0.03125, %v723_v25  ;;  %v895_v25 = vld [vmem:[#allocation8 + $0x4d0] sm:$0xff] }
 0x1cf   : > { %v725_v27 = vadd.f32 1e-06, %v724_v26  ;;  %v896_v26 = vld [vmem:[#allocation8 + $0x4d8] sm:$0xff] }
 0x1d1   : > { %3011 = vrsqrt.f32 %v725_v27  ;;  %vm732_vm2 = vweird.f32 %v725_v27 }
 0x1d7   : > { %v3012_v28 = vpop.eup %3011 }
 0x1d8   : > { %v727_v29 = vmul.f32 %v3012_v28, %v725_v27  ;;  %vm733_vm1 = vweird.f32 %v3012_v28  ;;  %v845_v27 = vld [vmem:[#allocation8 + $0x340] sm:$0xff] }
 0x1d9   : > { %vm734_vm3 = vmor %vm732_vm2, %vm733_vm1 }
 0x1da   : > { %v728_v30 = vmul.f32 %v3012_v28, %v727_v29  ;;  %v892_v29 = vld [vmem:[#allocation8 + $0x4b8] sm:$0xff] }
 0x1dc   : > { %v729_v31 = vmul.f32 0.5, %v728_v30  ;;  %v893_v30 = vld [vmem:[#allocation8 + $0x4c0] sm:$0xff] }
 0x1de   : > { %v730_v32 = vsub.f32 1.5, %v729_v31  ;;  %v842_v31 = vld [vmem:[#allocation8 + $0x328] sm:$0xff] }
 0x1e0   : > { %v731_v33 = vmul.f32 %v3012_v28, %v730_v32  ;;  %v888_v32 = vld [vmem:[#allocation8 + $0x498] sm:$0xff] }
 0x1e2   : > { %v735_v35 = vsel %vm734_vm3, %v3012_v28, %v731_v33  ;;  %v891_v28 = vld [vmem:[#allocation8 + $0x4b0] sm:$0xff]  ;;  %v889_v33 = vld [vmem:[#allocation8 + $0x4a0] sm:$0xff] }
 0x1e3   : > { %v736_v36 = vmul.f32 %v735_v35, %v3714_v20  ;;  %v839_v35 = vld [vmem:[#allocation8 + $0x310] sm:$0xff] }
 0x1e5   : > { %v3719_v37 = vmul.f32 %v3007_v34, %v736_v36  ;;  %v890_v34 = vld [vmem:[#allocation8 + $0x4a8] sm:$0xff]  ;;  %v885_v36 = vld [vmem:[#allocation8 + $0x480] sm:$0xff] }
 0x1e7   : > { %949 = vmatmul.f32.vlgmr.msra.gmra.mxu1 %v3719_v37  ;;  %969 = vmatmul.f32.vlgmr.msra.gmra.mxu2 %v3719_v37 }
 0x1e8   : > { %989 = vmatmul.f32.vlgmr.msra.gmra.mxu3 %v3719_v37  ;;  %1009 = vmatmul.f32.vlgmr.msrb.gmra.mxu0 %v3719_v37 }
 0x1e9   : > { %1093 = vmatpush.msra.mxu1 %v884_v38  ;;  %1113 = vmatpush.msra.mxu2 %v930_v39  ;;  %v886_v38 = vld [vmem:[#allocation8 + $0x488] sm:$0xff]  ;;  %v887_v39 = vld [vmem:[#allocation8 + $0x490] sm:$0xff] }
 0x1ea   : > { %1133 = vmatpush.msra.mxu3 %v931_v40  ;;  %1153 = vmatpush.msrb.mxu0 %v932_v41 }
 0x1eb   : > { %1094 = vmatpush.msra.mxu1 %v881_v42  ;;  %1114 = vmatpush.msra.mxu2 %v927_v43 }
 0x1ec   : > { %1134 = vmatpush.msra.mxu3 %v928_v44  ;;  %1154 = vmatpush.msrb.mxu0 %v929_v45 }
 0x1ed   : > { %1095 = vmatpush.msra.mxu1 %v878_v46  ;;  %1115 = vmatpush.msra.mxu2 %v924_v47 }
 0x1ee   : > { %1135 = vmatpush.msra.mxu3 %v925_v48  ;;  %1155 = vmatpush.msrb.mxu0 %v926_v49 }
 0x1ef   : > { %1096 = vmatpush.msra.mxu1 %v875_v50  ;;  %1116 = vmatpush.msra.mxu2 %v921_v51  ;;  %v669_v51 = vld [vmem:[%s3676_s27] sm:$0x1] }
 0x1f0   : > { %1136 = vmatpush.msra.mxu3 %v922_v52  ;;  %1156 = vmatpush.msrb.mxu0 %v923_v53  ;;  %vm715_vm4 = vcmp.ne.s32.totalorder %v669_v51, 1  ;;  %v3454_v52 = vmov -1e+09   ;;  %v1431_v51 = vld [vmem:[#allocation9 + $0x148] sm:$0xff] }
 0x1f1   : > { %1029 = vmatmul.f32.vlgmr.msrb.gmra.mxu1 %v3719_v37  ;;  %1049 = vmatmul.f32.vlgmr.msrb.gmra.mxu2 %v3719_v37  ;;  %v716_v53 = vsel %vm715_vm4, 0.0, %v3454_v52  ;;  %v1398_v52 = vld [vmem:[#allocation9 + $0x40] sm:$0xff] }
 0x1f2   : > { %1069 = vmatmul.f32.vlgmr.msrb.gmra.mxu3 %v3719_v37  ;;  %1089 = vmatmul.f32.vlgmr.msra.gmra.mxu0 %v3719_v37 }
 0x1f3   : > { %1097 = vmatpush.msra.mxu1 %v872_v54  ;;  %1117 = vmatpush.msra.mxu2 %v918_v55  ;;  %v3734_v54 = vperm.slane %v716_v53, 0  ;;  %v1416_v53 = vld [vmem:[#allocation9 + $0xd0] sm:$0xff] }
 0x1f4   : > { %1137 = vmatpush.msra.mxu3 %v919_v56  ;;  %1157 = vmatpush.msrb.mxu0 %v920_v57 }
 0x1f5   : > { %1098 = vmatpush.msra.mxu1 %v869_v58  ;;  %1118 = vmatpush.msra.mxu2 %v915_v59 }
 0x1f6   : > { %1138 = vmatpush.msra.mxu3 %v916_v60  ;;  %1158 = vmatpush.msrb.mxu0 %v917_v61 }
 0x1f7   : > { %1099 = vmatpush.msra.mxu1 %v866_v62  ;;  %1119 = vmatpush.msra.mxu2 %v912_v63 }
 0x1f8   : > { %1139 = vmatpush.msra.mxu3 %v913_v0  ;;  %1159 = vmatpush.msrb.mxu0 %v914_v1 }
 0x1f9   : > { %1100 = vmatpush.msra.mxu1 %v863_v2  ;;  %1120 = vmatpush.msra.mxu2 %v909_v3 }
 0x1fa   : > { %1140 = vmatpush.msra.mxu3 %v910_v4  ;;  %1160 = vmatpush.msrb.mxu0 %v911_v5 }
 0x1fb   : > { %1101 = vmatpush.msra.mxu1 %v860_v6  ;;  %1121 = vmatpush.msra.mxu2 %v906_v7 }
 0x1fc   : > { %1141 = vmatpush.msra.mxu3 %v907_v8  ;;  %1161 = vmatpush.msrb.mxu0 %v908_v9 }
 0x1fd   : > { %1102 = vmatpush.msra.mxu1 %v857_v10  ;;  %1122 = vmatpush.msra.mxu2 %v903_v11 }
 0x1fe   : > { %1142 = vmatpush.msra.mxu3 %v904_v12  ;;  %1162 = vmatpush.msrb.mxu0 %v905_v13 }
 0x1ff   : > { %1103 = vmatpush.msra.mxu1 %v854_v14  ;;  %1123 = vmatpush.msra.mxu2 %v900_v15 }
 0x200   : > { %1143 = vmatpush.msra.mxu3 %v901_v16  ;;  %1163 = vmatpush.msrb.mxu0 %v902_v17 }
 0x201   : > { %1104 = vmatpush.msra.mxu1 %v851_v18  ;;  %1124 = vmatpush.msra.mxu2 %v897_v19 }
 0x202   : > { %1144 = vmatpush.msra.mxu3 %v898_v21  ;;  %1164 = vmatpush.msrb.mxu0 %v899_v22 }
 0x203   : > { %1105 = vmatpush.msra.mxu1 %v848_v23  ;;  %1125 = vmatpush.msra.mxu2 %v894_v24 }
 0x204   : > { %1145 = vmatpush.msra.mxu3 %v895_v25  ;;  %1165 = vmatpush.msrb.mxu0 %v896_v26 }
 0x205   : > { %1106 = vmatpush.msra.mxu1 %v845_v27  ;;  %1126 = vmatpush.msra.mxu2 %v891_v28 }
 0x206   : > { %1146 = vmatpush.msra.mxu3 %v892_v29  ;;  %1166 = vmatpush.msrb.mxu0 %v893_v30  ;;  %v1405_v30 = vld [vmem:[#allocation9 + $0x78] sm:$0xff] }
 0x207   : > { %1107 = vmatpush.msra.mxu1 %v842_v31  ;;  %1127 = vmatpush.msra.mxu2 %v888_v32  ;;  %v1404_v31 = vld [vmem:[#allocation9 + $0x70] sm:$0xff]  ;;  %v1437_v32 = vld [vmem:[#allocation9 + $0x178] sm:$0xff] }
 0x208   : > { %1147 = vmatpush.msra.mxu3 %v889_v33  ;;  %1167 = vmatpush.msrb.mxu0 %v890_v34 }
 0x209   : > { %1108 = vmatpush.msra.mxu1 %v839_v35  ;;  %1128 = vmatpush.msra.mxu2 %v885_v36  ;;  %v1436_v35 = vld [vmem:[#allocation9 + $0x170] sm:$0xff] }
 0x20a   : > { %1148 = vmatpush.msra.mxu3 %v886_v38  ;;  %1168 = vmatpush.msrb.mxu0 %v887_v39  ;;  %v1403_v38 = vld [vmem:[#allocation9 + $0x68] sm:$0xff]  ;;  %v1421_v39 = vld [vmem:[#allocation9 + $0xf8] sm:$0xff] }
 0x20b   : > { %1109 = vmatmul.f32.vlgmr.msra.gmra.mxu1 %v3719_v37  ;;  %1129 = vmatmul.f32.vlgmr.msra.gmra.mxu2 %v3719_v37 }
 0x20c   : > { %1149 = vmatmul.f32.vlgmr.msra.gmra.mxu3 %v3719_v37  ;;  %1169 = vmatmul.f32.vlgmr.msrb.gmra.mxu0 %v3719_v37 }
 0x264   : > { %v950_v40 = vpop.f32.mrf.mxu1 }
 0x265   : > { %v1010_v41 = vpop.f32.mrf.mxu0 }
 0x26a   : > { %v970_v42 = vpop.f32.mrf.mxu2 }
 0x26b   : > { %v990_v43 = vpop.f32.mrf.mxu3  ;;  %1188 = vmatpush.xpose.msrb.mxu3 %v970_v42  ;;  %v1420_v42 = vld [vmem:[#allocation9 + $0xf0] sm:$0xff] }
 0x26e   : > { %v1030_v44 = vpop.f32.mrf.mxu1  ;;  %1189 = vmatmul.f32.vlgmr.msrb.gmra.mxu3 %v950_v40  ;;  %v1435_v40 = vld [vmem:[#allocation9 + $0x168] sm:$0xff] }
 0x26f   : > { %v1090_v45 = vpop.f32.mrf.mxu0  ;;  %1208 = vmatpush.xpose.msrb.mxu2 %v1030_v44  ;;  %v1401_v44 = vld [vmem:[#allocation9 + $0x58] sm:$0xff] }
 0x270   : > { %1228 = vmatpush.xpose.msra.mxu3 %v1090_v45  ;;  %v1419_v45 = vld [vmem:[#allocation9 + $0xe8] sm:$0xff] }
 0x272   : > { %1209 = vmatmul.f32.vlgmr.msrb.gmra.mxu2 %v1010_v41  ;;  %v1402_v41 = vld [vmem:[#allocation9 + $0x60] sm:$0xff] }
 0x273   : > { %1316 = vmatpush.msra.mxu2 %v990_v43  ;;  %v1434_v43 = vld [vmem:[#allocation9 + $0x160] sm:$0xff] }
 0x274   : > { %v1050_v49 = vpop.f32.mrf.mxu2 }
 0x275   : > { %v1070_v46 = vpop.f32.mrf.mxu3 }
 0x276   : > { %1229 = vmatmul.f32.vlgmr.msra.gmra.mxu3 %v1070_v46  ;;  %v1433_v46 = vld [vmem:[#allocation9 + $0x158] sm:$0xff] }
 0x288   : > { %v1110_v47 = vpop.f32.mrf.mxu1 }
 0x289   : > { %v1170_v48 = vpop.f32.mrf.mxu0  ;;  %1362 = vmatpush.msrb.mxu1 %v1110_v47  ;;  %v1400_v47 = vld [vmem:[#allocation9 + $0x50] sm:$0xff] }
 0x28a   : > { %1385 = vmatpush.msrb.mxu2 %v1170_v48  ;;  %v1418_v48 = vld [vmem:[#allocation9 + $0xe0] sm:$0xff] }
 0x28b   : > { %1474 = vmatpush.msra.mxu1 %v1421_v39 }
 0x28d   : > { %1475 = vmatpush.msra.mxu1 %v1420_v42 }
 0x28e   : > { %v1130_v50 = vpop.f32.mrf.mxu2 }
 0x28f   : > { %v1150_v37 = vpop.f32.mrf.mxu3  ;;  %1476 = vmatpush.msra.mxu1 %v1419_v45  ;;  %v1572_v45 = vld [vmem:[#allocation12 + $0x68] sm:$0xff] }
 0x290   : > { %1248 = vmatpush.xpose.msrb.mxu3 %v1150_v37  ;;  %v1399_v37 = vld [vmem:[#allocation9 + $0x48] sm:$0xff] }
 0x291   : > { %1477 = vmatpush.msra.mxu1 %v1418_v48 }
 0x293   : > { %1249 = vmatmul.f32.vlgmr.msrb.gmra.mxu3 %v1130_v50  ;;  %v1417_v50 = vld [vmem:[#allocation9 + $0xd8] sm:$0xff] }
 0x294   : > { %1339 = vmatpush.msra.mxu3 %v1050_v49  ;;  %v1432_v49 = vld [vmem:[#allocation9 + $0x150] sm:$0xff]  ;;  %1478 = vmatpush.msra.mxu1 %v1417_v50 }
 0x296   : > { %1454 = vmatpush.msrb.mxu3 %v1405_v30  ;;  %1479 = vmatpush.msra.mxu1 %v1416_v53  ;;  %v1445_v30 = vld [vmem:[#allocation9 + $0x1b8] sm:$0xff] }
 0x298   : > { %1455 = vmatpush.msrb.mxu3 %v1404_v31  ;;  %v1444_v31 = vld [vmem:[#allocation9 + $0x1b0] sm:$0xff] }
 0x29a   : > { %1456 = vmatpush.msrb.mxu3 %v1403_v38 }
 0x29c   : > { %1457 = vmatpush.msrb.mxu3 %v1402_v41 }
 0x29e   : > { %1458 = vmatpush.msrb.mxu3 %v1401_v44  ;;  %v1573_v44 = vld [vmem:[#allocation12 + $0x70] sm:$0xff] }
 0x2a0   : > { %1459 = vmatpush.msrb.mxu3 %v1400_v47 }
 0x2a2   : > { %1460 = vmatpush.msrb.mxu3 %v1399_v37 }
 0x2a4   : > { %1461 = vmatpush.msrb.mxu3 %v1398_v52 }
 0x2f1   : > { %v1190_v55 = vpop.f32.mrf.mxu3 }
 0x2f2   : > { %v1191_v56 = vadd.f32 %v1190_v55, %v3734_v54  ;;  %v1430_v55 = vld [vmem:[#allocation9 + $0x140] sm:$0xff] }
 0x2f4   : > { %v1254_v57 = vsel %vm1253_vm5, %v1191_v56, -inf }
 0x2f5   : > { %v1210_v58 = vpop.f32.mrf.mxu2  ;;  %1255 = vmax.xlane.f32.xlu1 %v1254_v57  ;;  %v1415_v57 = vld [vmem:[#allocation9 + $0xc8] sm:$0xff] }
 0x2f6   : > { %v1211_v59 = vadd.f32 %v1210_v58, %v3734_v54  ;;  %v1429_v58 = vld [vmem:[#allocation9 + $0x138] sm:$0xff]  ;;  %1480 = vmatpush.msra.mxu1 %v1415_v57 }
 0x2f7   : > { %v1569_v57 = vld [vmem:[#allocation12 + $0x50] sm:$0xff] }
 0x2f8   : > { %v1257_v63 = vsel %vm1253_vm5, %v1211_v59, -inf }
 0x2f9   : > { %v1230_v60 = vpop.f32.mrf.mxu3 }
 0x2fa   : > { %v1231_v61 = vadd.f32 %v1230_v60, %v3734_v54  ;;  %v1414_v60 = vld [vmem:[#allocation9 + $0xc0] sm:$0xff] }
 0x2fb   : > { %1481 = vmatpush.msra.mxu1 %v1414_v60  ;;  %v1566_v60 = vld [vmem:[#allocation12 + $0x38] sm:$0xff] }
 0x2fc   : > { %v1260_v62 = vsel %vm1253_vm5, %v1231_v61, -inf }
 0x2fd   : > { %1261 = vmax.xlane.f32.xlu2 %v1260_v62  ;;  %1258 = vmax.xlane.f32.xlu1 %v1257_v63  ;;  %v1395_v62 = vld [vmem:[#allocation9 + $0x28] sm:$0xff]  ;;  %v1413_v63 = vld [vmem:[#allocation9 + $0xb8] sm:$0xff] }
 0x2fe   : > { %1482 = vmatpush.msra.mxu1 %v1413_v63  ;;  %v1562_v63 = vld [vmem:[#allocation12 + $0x18] sm:$0xff] }
 0x316   : > { %v1250_v0 = vpop.f32.mrf.mxu3 }
 0x317   : > { %v1251_v1 = vadd.f32 %v1250_v0, %v3734_v54  ;;  %v1427_v0 = vld [vmem:[#allocation9 + $0x128] sm:$0xff] }
 0x319   : > { %v1263_v2 = vsel %vm1253_vm5, %v1251_v1, -inf }
 0x31a   : > { %1264 = vmax.xlane.f32.xlu2 %v1263_v2  ;;  %v1412_v2 = vld [vmem:[#allocation9 + $0xb0] sm:$0xff] }
 0x31b   : > { %1483 = vmatpush.msra.mxu1 %v1412_v2  ;;  %v1559_v2 = vld [vmem:[#allocation12] sm:$0xff] }
 0x368   : > { %v1256_v3 = vpop.xlane.xlu1 %1255 }
 0x369   : > { %v1266_v4 = vsub.f32 %v1191_v56, %v1256_v3  ;;  %v1397_v56 = vld [vmem:[#allocation9 + $0x38] sm:$0xff]  ;;  %v1426_v3 = vld [vmem:[#allocation9 + $0x120] sm:$0xff] }
 0x36a   : > { %1462 = vmatpush.msrb.mxu3 %v1397_v56  ;;  %v1570_v56 = vld [vmem:[#allocation12 + $0x58] sm:$0xff] }
 0x36b   : > { %v1270_v5 = vmul.f32 1.442695, %v1266_v4 }
 0x36d   : > { %3013 = vpow2.f32 %v1270_v5  ;;  %v1393_v5 = vld [vmem:[#allocation9 + $0x18] sm:$0xff] }
 0x370   : > { %v1262_v6 = vpop.xlane.xlu2 %1261  ;;  %v1259_v7 = vpop.xlane.xlu1 %1258 }
 0x371   : > { %v1268_v8 = vsub.f32 %v1231_v61, %v1262_v6  ;;  %v1267_v9 = vsub.f32 %v1211_v59, %v1259_v7  ;;  %v1396_v59 = vld [vmem:[#allocation9 + $0x30] sm:$0xff]  ;;  %v1411_v6 = vld [vmem:[#allocation9 + $0xa8] sm:$0xff]  ;;  %v1425_v7 = vld [vmem:[#allocation9 + $0x118] sm:$0xff] }
 0x372   : > { %v1428_v61 = vld [vmem:[#allocation9 + $0x130] sm:$0xff]  ;;  %1463 = vmatpush.msrb.mxu3 %v1396_v59  ;;  %1484 = vmatpush.msra.mxu1 %v1411_v6  ;;  %v1567_v59 = vld [vmem:[#allocation12 + $0x40] sm:$0xff] }
 0x373   : > { %v3014_v10 = vpop.eup %3013  ;;  %v1274_v11 = vmul.f32 1.442695, %v1268_v8  ;;  %v1272_v12 = vmul.f32 1.442695, %v1267_v9  ;;  %v1392_v8 = vld [vmem:[#allocation9 + $0x10] sm:$0xff]  ;;  %v1608_v6 = vld [vmem:[#allocation14 + $0x60] sm:$0xff] }
 0x374   : > { %v1278_v13 = vsel %vm1253_vm5, %v3014_v10, 0.0  ;;  %1464 = vmatpush.msrb.mxu3 %v1395_v62  ;;  %v1424_v9 = vld [vmem:[#allocation9 + $0x110] sm:$0xff]  ;;  %v1563_v62 = vld [vmem:[#allocation12 + $0x20] sm:$0xff] }
 0x375   : > { %3015 = vpow2.f32 %v1274_v11  ;;  %1279 = vadd.xlane.f32.xlu1 %v1278_v13  ;;  %v1390_v13 = vld [vmem:[#allocation9] sm:$0xff] }
 0x376   : > { %3017 = vpow2.f32 %v1272_v12 }
 0x37b   : > { %v3016_v14 = vpop.eup %3015 }
 0x37c   : > { %v3018_v15 = vpop.eup %3017  ;;  %v1284_v16 = vsel %vm1253_vm5, %v3016_v14, 0.0 }
 0x37d   : > { %1285 = vadd.xlane.f32.xlu1 %v1284_v16  ;;  %v1281_v17 = vsel %vm1253_vm5, %v3018_v15, 0.0  ;;  %v1453_v16 = vld [vmem:[#allocation9 + $0x1f8] sm:$0xff] }
 0x37e   : > { %1282 = vadd.xlane.f32.xlu2 %v1281_v17  ;;  %1514 = vmatpush.msra.mxu0 %v1453_v16  ;;  %v1409_v17 = vld [vmem:[#allocation9 + $0x98] sm:$0xff] }
 0x37f   : > { %v1602_v16 = vld [vmem:[#allocation14 + $0x30] sm:$0xff] }
 0x38d   : > { %v1265_v18 = vpop.xlane.xlu2 %1264 }
 0x38e   : > { %v1269_v19 = vsub.f32 %v1251_v1, %v1265_v18  ;;  %v1394_v1 = vld [vmem:[#allocation9 + $0x20] sm:$0xff] }
 0x38f   : > { %1465 = vmatpush.msrb.mxu3 %v1394_v1  ;;  %v1422_v18 = vld [vmem:[#allocation9 + $0x100] sm:$0xff]  ;;  %v1560_v1 = vld [vmem:[#allocation12 + $0x8] sm:$0xff] }
 0x390   : > { %v1276_v21 = vmul.f32 1.442695, %v1269_v19  ;;  %v1452_v19 = vld [vmem:[#allocation9 + $0x1f0] sm:$0xff] }
 0x391   : > { %1466 = vmatpush.msrb.mxu3 %v1393_v5  ;;  %1515 = vmatpush.msra.mxu0 %v1452_v19  ;;  %v1609_v5 = vld [vmem:[#allocation14 + $0x68] sm:$0xff] }
 0x392   : > { %3019 = vpow2.f32 %v1276_v21  ;;  %v1408_v21 = vld [vmem:[#allocation9 + $0x90] sm:$0xff] }
 0x393   : > { %1467 = vmatpush.msrb.mxu3 %v1392_v8 }
 0x398   : > { %v3747_v22 = vpop.eup %3019 }
 0x399   : > { %v1287_v23 = vsel %vm1253_vm5, %v3747_v22, 0.0 }
 0x39a   : > { %1288 = vadd.xlane.f32.xlu2 %v1287_v23  ;;  %v1451_v23 = vld [vmem:[#allocation9 + $0x1e8] sm:$0xff] }
 0x39b   : > { %1516 = vmatpush.msra.mxu0 %v1451_v23 }
 0x3e8   : > { %v1280_v24 = vpop.xlane.xlu1 %1279 }
 0x3e9   : > { %3021 = vrcp.f32 %v1280_v24  ;;  %v1407_v24 = vld [vmem:[#allocation9 + $0x88] sm:$0xff] }
 0x3ef   : > { %v3022_v25 = vpop.eup %3021 }
 0x3f0   : > { %v1294_v26 = vmul.f32 %v3022_v25, %v3014_v10  ;;  %v1286_v27 = vpop.xlane.xlu1 %1285  ;;  %v1391_v10 = vld [vmem:[#allocation9 + $0x8] sm:$0xff]  ;;  %v1406_v25 = vld [vmem:[#allocation9 + $0x80] sm:$0xff] }
 0x3f1   : > { %v1283_v28 = vpop.xlane.xlu2 %1282  ;;  %3023 = vrcp.f32 %v1286_v27  ;;  %1468 = vmatpush.msrb.mxu3 %v1391_v10  ;;  %v1448_v27 = vld [vmem:[#allocation9 + $0x1d0] sm:$0xff] }
 0x3f2   : > { %3025 = vrcp.f32 %v1283_v28  ;;  %2847 = vmatmul.msk.f32.vlgmr.msra.gmra.mxu2 %vm1253_vm5, %v1294_v26  ;;  %v1449_v26 = vld [vmem:[#allocation9 + $0x1d8] sm:$0xff]  ;;  %v1447_v28 = vld [vmem:[#allocation9 + $0x1c8] sm:$0xff] }
 0x3f3   : > { %1494 = vmatpush.msra.mxu2 %v1437_v32  ;;  %1469 = vmatpush.msrb.mxu3 %v1390_v13  ;;  %v1443_v32 = vld [vmem:[#allocation9 + $0x1a8] sm:$0xff] }
 0x3f4   : > { %v1604_v13 = vld [vmem:[#allocation14 + $0x40] sm:$0xff] }
 0x3f5   : > { %1495 = vmatpush.msra.mxu2 %v1436_v35  ;;  %v1440_v35 = vld [vmem:[#allocation9 + $0x190] sm:$0xff] }
 0x3f7   : > { %v3024_v29 = vpop.eup %3023  ;;  %1496 = vmatpush.msra.mxu2 %v1435_v40  ;;  %v1438_v40 = vld [vmem:[#allocation9 + $0x180] sm:$0xff] }
 0x3f8   : > { %v3026_v33 = vpop.eup %3025  ;;  %v1296_v34 = vmul.f32 %v3024_v29, %v3016_v14  ;;  %v1410_v14 = vld [vmem:[#allocation9 + $0xa0] sm:$0xff] }
 0x3f9   : > { %v1295_v36 = vmul.f32 %v3026_v33, %v3018_v15  ;;  %1497 = vmatpush.msra.mxu2 %v1434_v43  ;;  %v1423_v15 = vld [vmem:[#allocation9 + $0x108] sm:$0xff]  ;;  %1485 = vmatpush.msra.mxu1 %v1410_v14  ;;  %v1446_v29 = vld [vmem:[#allocation9 + $0x1c0] sm:$0xff] }
 0x3fa   : > { %2849 = vmatmul.msk.f32.vlgmr.msrb.gmra.mxu1 %vm1253_vm5, %v1296_v34  ;;  %v1442_v33 = vld [vmem:[#allocation9 + $0x1a0] sm:$0xff]  ;;  %v1441_v34 = vld [vmem:[#allocation9 + $0x198] sm:$0xff] }
 0x3fb   : > { %2848 = vmatmul.msk.f32.vlgmr.msra.gmra.mxu3 %vm1253_vm5, %v1295_v36  ;;  %1498 = vmatpush.msra.mxu2 %v1433_v46  ;;  %v1439_v36 = vld [vmem:[#allocation9 + $0x188] sm:$0xff]  ;;  %v1574_v43 = vld [vmem:[#allocation12 + $0x78] sm:$0xff] }
 0x3fc   : > { %1486 = vmatpush.msra.mxu1 %v1409_v17  ;;  %1575 = vmatpush.msra.mxu3 %v1574_v43  ;;  %v1603_v14 = vld [vmem:[#allocation14 + $0x38] sm:$0xff]  ;;  %v1746_v43 = vld [vmem:[#allocation8 + $0x8d0] sm:$0xff] }
 0x3fd   : > { %1499 = vmatpush.msra.mxu2 %v1432_v49 }
 0x3fe   : > { %1487 = vmatpush.msra.mxu1 %v1408_v21  ;;  %1576 = vmatpush.msra.mxu3 %v1573_v44  ;;  %v1600_v21 = vld [vmem:[#allocation14 + $0x20] sm:$0xff]  ;;  %v1695_v44 = vld [vmem:[#allocation8 + $0x738] sm:$0xff] }
 0x3ff   : > { %1500 = vmatpush.msra.mxu2 %v1431_v51 }
 0x400   : > { %1488 = vmatpush.msra.mxu1 %v1407_v24  ;;  %1577 = vmatpush.msra.mxu3 %v1572_v45  ;;  %v1599_v24 = vld [vmem:[#allocation14 + $0x18] sm:$0xff] }
 0x401   : > { %1501 = vmatpush.msra.mxu2 %v1430_v55  ;;  %v1571_v55 = vld [vmem:[#allocation12 + $0x60] sm:$0xff] }
 0x402   : > { %1489 = vmatpush.msra.mxu1 %v1406_v25  ;;  %1578 = vmatpush.msra.mxu3 %v1571_v55  ;;  %v1598_v25 = vld [vmem:[#allocation14 + $0x10] sm:$0xff]  ;;  %v1696_v45 = vld [vmem:[#allocation8 + $0x740] sm:$0xff] }
 0x403   : > { %1502 = vmatpush.msra.mxu2 %v1429_v58  ;;  %v1568_v58 = vld [vmem:[#allocation12 + $0x48] sm:$0xff]  ;;  %v1691_v55 = vld [vmem:[#allocation8 + $0x718] sm:$0xff] }
 0x404   : > { %1579 = vmatpush.msra.mxu3 %v1570_v56  ;;  %v1737_v56 = vld [vmem:[#allocation8 + $0x888] sm:$0xff] }
 0x405   : > { %1503 = vmatpush.msra.mxu2 %v1428_v61  ;;  %v1565_v61 = vld [vmem:[#allocation12 + $0x30] sm:$0xff] }
 0x406   : > { %1580 = vmatpush.msra.mxu3 %v1569_v57  ;;  %v1686_v57 = vld [vmem:[#allocation8 + $0x6f0] sm:$0xff] }
 0x407   : > { %1504 = vmatpush.msra.mxu2 %v1427_v0  ;;  %v1561_v0 = vld [vmem:[#allocation12 + $0x10] sm:$0xff] }
 0x408   : > { %1581 = vmatpush.msra.mxu3 %v1568_v58  ;;  %v1687_v58 = vld [vmem:[#allocation8 + $0x6f8] sm:$0xff] }
 0x409   : > { %1505 = vmatpush.msra.mxu2 %v1426_v3  ;;  %v1611_v3 = vld [vmem:[#allocation14 + $0x78] sm:$0xff] }
 0x40a   : > { %1582 = vmatpush.msra.mxu3 %v1567_v59  ;;  %1612 = vmatpush.msrb.mxu1 %v1611_v3  ;;  %v1688_v59 = vld [vmem:[#allocation8 + $0x700] sm:$0xff] }
 0x40b   : > { %1506 = vmatpush.msra.mxu2 %v1425_v7  ;;  %v1728_v3 = vld [vmem:[#allocation8 + $0x840] sm:$0xff] }
 0x40c   : > { %1583 = vmatpush.msra.mxu3 %v1566_v60  ;;  %v1734_v60 = vld [vmem:[#allocation8 + $0x870] sm:$0xff] }
 0x40d   : > { %v1289_v4 = vpop.xlane.xlu2 %1288  ;;  %1507 = vmatpush.msra.mxu2 %v1424_v9  ;;  %v1607_v9 = vld [vmem:[#allocation14 + $0x58] sm:$0xff] }
 0x40e   : > { %3027 = vrcp.f32 %v1289_v4  ;;  %1584 = vmatpush.msra.mxu3 %v1565_v61  ;;  %v1610_v4 = vld [vmem:[#allocation14 + $0x70] sm:$0xff] }
 0x40f   : > { %1508 = vmatpush.msra.mxu2 %v1423_v15  ;;  %1613 = vmatpush.msrb.mxu1 %v1610_v4  ;;  %v1683_v61 = vld [vmem:[#allocation8 + $0x6d8] sm:$0xff]  ;;  %v1677_v4 = vld [vmem:[#allocation8 + $0x6a8] sm:$0xff] }
 0x411   : > { %1509 = vmatpush.msra.mxu2 %v1422_v18  ;;  %1614 = vmatpush.msrb.mxu1 %v1609_v5  ;;  %v1601_v18 = vld [vmem:[#allocation14 + $0x28] sm:$0xff] }
 0x412   : > { %v1678_v5 = vld [vmem:[#allocation8 + $0x6b0] sm:$0xff] }
 0x413   : > { %1615 = vmatpush.msrb.mxu1 %v1608_v6  ;;  %v1679_v6 = vld [vmem:[#allocation8 + $0x6b8] sm:$0xff] }
 0x414   : > { %v3028_v11 = vpop.eup %3027 }
 0x415   : > { %v1297_v12 = vmul.f32 %v3028_v11, %v3747_v22  ;;  %v1450_v22 = vld [vmem:[#allocation9 + $0x1e0] sm:$0xff]  ;;  %v1606_v11 = vld [vmem:[#allocation14 + $0x50] sm:$0xff]  ;;  %1616 = vmatpush.msrb.mxu1 %v1607_v9 }
 0x416   : > { %1517 = vmatpush.msra.mxu0 %v1450_v22  ;;  %v1675_v9 = vld [vmem:[#allocation8 + $0x698] sm:$0xff] }
 0x417   : > { %2850 = vmatmul.msk.f32.vlgmr.msrb.gmra.mxu2 %vm1253_vm5, %v1297_v12  ;;  %v1605_v12 = vld [vmem:[#allocation14 + $0x48] sm:$0xff]  ;;  %1617 = vmatpush.msrb.mxu1 %v1606_v11 }
 0x418   : > { %1518 = vmatpush.msra.mxu0 %v1449_v26  ;;  %v1722_v11 = vld [vmem:[#allocation8 + $0x810] sm:$0xff] }
 0x419   : > { %1618 = vmatpush.msrb.mxu1 %v1605_v12  ;;  %v1671_v12 = vld [vmem:[#allocation8 + $0x678] sm:$0xff] }
 0x41a   : > { %1519 = vmatpush.msra.mxu0 %v1448_v27  ;;  %v3008_v27 = vld [vmem:[#allocation15] ss:$0 sm:$0xff] }
 0x41b   : > { %1619 = vmatpush.msrb.mxu1 %v1604_v13  ;;  %v1672_v13 = vld [vmem:[#allocation8 + $0x680] sm:$0xff] }
 0x41c   : > { %1520 = vmatpush.msra.mxu0 %v1447_v28 }
 0x41d   : > { %1620 = vmatpush.msrb.mxu1 %v1603_v14  ;;  %v1673_v14 = vld [vmem:[#allocation8 + $0x688] sm:$0xff] }
 0x41e   : > { %1521 = vmatpush.msra.mxu0 %v1446_v29 }
 0x41f   : > { %1621 = vmatpush.msrb.mxu1 %v1602_v16  ;;  %v1668_v16 = vld [vmem:[#allocation8 + $0x660] sm:$0xff] }
 0x420   : > { %1522 = vmatpush.msra.mxu0 %v1445_v30 }
 0x421   : > { %1622 = vmatpush.msrb.mxu1 %v1601_v18  ;;  %v1670_v18 = vld [vmem:[#allocation8 + $0x670] sm:$0xff] }
 0x422   : > { %1523 = vmatpush.msra.mxu0 %v1444_v31  ;;  %v1597_v31 = vld [vmem:[#allocation14 + $0x8] sm:$0xff] }
 0x423   : > { %1623 = vmatpush.msrb.mxu1 %v1600_v21  ;;  %v1665_v21 = vld [vmem:[#allocation8 + $0x648] sm:$0xff] }
 0x424   : > { %1524 = vmatpush.msra.mxu0 %v1443_v32  ;;  %v1596_v32 = vld [vmem:[#allocation14] sm:$0xff] }
 0x425   : > { %1624 = vmatpush.msrb.mxu1 %v1599_v24  ;;  %v1667_v24 = vld [vmem:[#allocation8 + $0x658] sm:$0xff] }
 0x426   : > { %1525 = vmatpush.msra.mxu0 %v1442_v33 }
 0x427   : > { %1625 = vmatpush.msrb.mxu1 %v1598_v25  ;;  %v1662_v25 = vld [vmem:[#allocation8 + $0x630] sm:$0xff] }
 0x428   : > { %1526 = vmatpush.msra.mxu0 %v1441_v34 }
 0x429   : > { %1626 = vmatpush.msrb.mxu1 %v1597_v31 }
 0x42a   : > { %1527 = vmatpush.msra.mxu0 %v1440_v35  ;;  %v1701_v35 = vld [vmem:[#allocation8 + $0x768] sm:$0xff] }
 0x42b   : > { %1627 = vmatpush.msrb.mxu1 %v1596_v32  ;;  %1848 = vmatpush.msrb.mxu2 %v1701_v35  ;;  %v1661_v32 = vld [vmem:[#allocation8 + $0x628] sm:$0xff]  ;;  %v1656_v35 = vld [vmem:[#allocation8 + $0x600] sm:$0xff] }
 0x42c   : > { %1528 = vmatpush.msra.mxu0 %v1439_v36  ;;  %v1702_v36 = vld [vmem:[#allocation8 + $0x770] sm:$0xff] }
 0x42e   : > { %1529 = vmatpush.msra.mxu0 %v1438_v40  ;;  %v1698_v40 = vld [vmem:[#allocation8 + $0x750] sm:$0xff] }
 0x42f   : > { %1849 = vmatpush.msrb.mxu2 %v1698_v40  ;;  %v1704_v40 = vld [vmem:[#allocation8 + $0x780] sm:$0xff] }
 0x430   : > { %1868 = vmatpush.msrb.mxu0 %v1702_v36  ;;  %v1657_v36 = vld [vmem:[#allocation8 + $0x608] sm:$0xff] }
 0x431   : > { %1850 = vmatpush.msrb.mxu2 %v1695_v44  ;;  %v1747_v44 = vld [vmem:[#allocation8 + $0x8d8] sm:$0xff] }
 0x475   : > { %v1318_v38 = vpop.f32.mrf.mxu2 }
 0x476   : > { %1470 = vmatmul.f32.vlgmr.msrb.gmra.mxu3 %v1318_v38  ;;  %v1703_v38 = vld [vmem:[#allocation8 + $0x778] sm:$0xff] }
 0x477   : > { %v1364_v39 = vpop.f32.mrf.mxu1 }
 0x478   : > { %1510 = vmatmul.f32.vlgmr.msra.gmra.mxu2 %v1364_v39  ;;  %v1749_v39 = vld [vmem:[#allocation8 + $0x8e8] sm:$0xff] }
 0x47e   : > { %v1341_v41 = vpop.f32.mrf.mxu3 }
 0x47f   : > { %1490 = vmatmul.f32.vlgmr.msra.gmra.mxu1 %v1341_v41  ;;  %v1699_v41 = vld [vmem:[#allocation8 + $0x758] sm:$0xff] }
 0x480   : > { %1908 = vmatpush.msra.mxu1 %v1749_v39  ;;  %1869 = vmatpush.msrb.mxu0 %v1699_v41  ;;  %v1750_v41 = vld [vmem:[#allocation8 + $0x8f0] sm:$0xff] }
 0x482   : > { %1909 = vmatpush.msra.mxu1 %v1746_v43  ;;  %1870 = vmatpush.msrb.mxu0 %v1696_v45  ;;  %v1797_v43 = vld [vmem:[#allocation8 + $0xa68] sm:$0xff]  ;;  %v1748_v45 = vld [vmem:[#allocation8 + $0x8e0] sm:$0xff] }
 0x49a   : > { %v1387_v42 = vpop.f32.mrf.mxu2 }
 0x49b   : > { %1530 = vmatmul.f32.vlgmr.msra.gmra.mxu0 %v1387_v42  ;;  %v1700_v42 = vld [vmem:[#allocation8 + $0x760] sm:$0xff] }
 0x4f9   : > { %v1471_v47 = vpop.f32.mrf.mxu3 }
 0x4fb   : > { %v1511_v49 = vpop.f32.mrf.mxu2 }
 0x4fc   : > { %v1491_v46 = vpop.f32.mrf.mxu1 }
 0x4fd   : > { %v1534_v48 = vadd.f32 %v1491_v46, %v1471_v47  ;;  %v1697_v46 = vld [vmem:[#allocation8 + $0x748] sm:$0xff]  ;;  %v1743_v47 = vld [vmem:[#allocation8 + $0x8b8] sm:$0xff] }
 0x4fe   : > { %1910 = vmatpush.msra.mxu1 %v1743_v47  ;;  %v1795_v47 = vld [vmem:[#allocation8 + $0xa58] sm:$0xff] }
 0x4ff   : > { %v1535_v37 = vadd.f32 %v1534_v48, %v1511_v49  ;;  %v1692_v48 = vld [vmem:[#allocation8 + $0x720] sm:$0xff]  ;;  %v1693_v49 = vld [vmem:[#allocation8 + $0x728] sm:$0xff] }
 0x500   : > { %1851 = vmatpush.msrb.mxu2 %v1692_v48  ;;  %1871 = vmatpush.msrb.mxu0 %v1693_v49  ;;  %v1744_v48 = vld [vmem:[#allocation8 + $0x8c0] sm:$0xff]  ;;  %v1745_v49 = vld [vmem:[#allocation8 + $0x8c8] sm:$0xff] }
 0x518   : > { %v1531_v50 = vpop.f32.mrf.mxu0 }
 0x519   : > { %v1536_v51 = vadd.f32 %v1535_v37, %v1531_v50  ;;  %v1694_v37 = vld [vmem:[#allocation8 + $0x730] sm:$0xff]  ;;  %v1740_v50 = vld [vmem:[#allocation8 + $0x8a0] sm:$0xff] }
 0x51a   : > { %1911 = vmatpush.msra.mxu1 %v1740_v50  ;;  %v1792_v50 = vld [vmem:[#allocation8 + $0xa40] sm:$0xff] }
 0x51b   : > { %v3757_v52 = vadd.f32 %v1536_v51, %v3714_v20  ;;  %v1564_v20 = vld [vmem:[#allocation12 + $0x28] sm:$0xff] }
 0x51c   : > { %1585 = vmatpush.msra.mxu3 %v1564_v20  ;;  %v1689_v51 = vld [vmem:[#allocation8 + $0x708] sm:$0xff]  ;;  %1912 = vmatpush.msra.mxu1 %v1737_v56  ;;  %v1684_v20 = vld [vmem:[#allocation8 + $0x6e0] sm:$0xff] }
 0x51d   : > { %v1539_v53 = vmul.f32 %v3757_v52, %v3757_v52  ;;  %1852 = vmatpush.msrb.mxu2 %v1689_v51  ;;  %v1741_v51 = vld [vmem:[#allocation8 + $0x8a8] sm:$0xff] }
 0x51e   : > { %1586 = vmatpush.msra.mxu3 %v1563_v62  ;;  %v1685_v62 = vld [vmem:[#allocation8 + $0x6e8] sm:$0xff]  ;;  %1913 = vmatpush.msra.mxu1 %v1734_v60  ;;  %v1786_v60 = vld [vmem:[#allocation8 + $0xa10] sm:$0xff] }
 0x51f   : > { %1540 = vadd.xlane.f32.xlu1 %v1539_v53  ;;  %v1690_v53 = vld [vmem:[#allocation8 + $0x710] sm:$0xff]  ;;  %1853 = vmatpush.msrb.mxu2 %v1686_v57  ;;  %v1789_v56 = vld [vmem:[#allocation8 + $0xa28] sm:$0xff] }
 0x520   : > { %1587 = vmatpush.msra.mxu3 %v1562_v63  ;;  %1872 = vmatpush.msrb.mxu0 %v1690_v53  ;;  %v1731_v63 = vld [vmem:[#allocation8 + $0x858] sm:$0xff]  ;;  %v1742_v53 = vld [vmem:[#allocation8 + $0x8b0] sm:$0xff] }
 0x521   : > { %1854 = vmatpush.msrb.mxu2 %v1683_v61  ;;  %1914 = vmatpush.msra.mxu1 %v1731_v63  ;;  %v1738_v57 = vld [vmem:[#allocation8 + $0x890] sm:$0xff]  ;;  %v1735_v61 = vld [vmem:[#allocation8 + $0x878] sm:$0xff] }
 0x522   : > { %1588 = vmatpush.msra.mxu3 %v1561_v0  ;;  %1873 = vmatpush.msrb.mxu0 %v1687_v58  ;;  %v1680_v0 = vld [vmem:[#allocation8 + $0x6c0] sm:$0xff]  ;;  %v1739_v58 = vld [vmem:[#allocation8 + $0x898] sm:$0xff] }
 0x523   : > { %1855 = vmatpush.msrb.mxu2 %v1680_v0  ;;  %1915 = vmatpush.msra.mxu1 %v1728_v3  ;;  %v1783_v63 = vld [vmem:[#allocation8 + $0x9f8] sm:$0xff]  ;;  %v1732_v0 = vld [vmem:[#allocation8 + $0x860] sm:$0xff] }
 0x524   : > { %1589 = vmatpush.msra.mxu3 %v1560_v1  ;;  %v1681_v1 = vld [vmem:[#allocation8 + $0x6c8] sm:$0xff]  ;;  %1874 = vmatpush.msrb.mxu0 %v1684_v20  ;;  %v1736_v20 = vld [vmem:[#allocation8 + $0x880] sm:$0xff] }
 0x525   : > { %1856 = vmatpush.msrb.mxu2 %v1677_v4  ;;  %v1780_v3 = vld [vmem:[#allocation8 + $0x9e0] sm:$0xff]  ;;  %v1729_v4 = vld [vmem:[#allocation8 + $0x848] sm:$0xff] }
 0x526   : > { %1590 = vmatpush.msra.mxu3 %v1559_v2  ;;  %v1682_v2 = vld [vmem:[#allocation8 + $0x6d0] sm:$0xff]  ;;  %1875 = vmatpush.msrb.mxu0 %v1681_v1  ;;  %v1733_v1 = vld [vmem:[#allocation8 + $0x868] sm:$0xff] }
 0x528   : > { %1888 = vmatpush.msrb.mxu3 %v1703_v38  ;;  %1876 = vmatpush.msrb.mxu0 %v1678_v5  ;;  %v1658_v38 = vld [vmem:[#allocation8 + $0x610] sm:$0xff] }
 0x529   : > { %v1730_v5 = vld [vmem:[#allocation8 + $0x850] sm:$0xff] }
 0x52a   : > { %1889 = vmatpush.msrb.mxu3 %v1700_v42  ;;  %1877 = vmatpush.msrb.mxu0 %v1675_v9  ;;  %v1751_v42 = vld [vmem:[#allocation8 + $0x8f8] sm:$0xff] }
 0x52b   : > { %v1727_v9 = vld [vmem:[#allocation8 + $0x838] sm:$0xff] }
 0x52c   : > { %1890 = vmatpush.msrb.mxu3 %v1697_v46  ;;  %1878 = vmatpush.msrb.mxu0 %v1672_v13  ;;  %v1794_v46 = vld [vmem:[#allocation8 + $0xa50] sm:$0xff]  ;;  %v1724_v13 = vld [vmem:[#allocation8 + $0x820] sm:$0xff] }
 0x52e   : > { %1891 = vmatpush.msrb.mxu3 %v1694_v37  ;;  %v1791_v37 = vld [vmem:[#allocation8 + $0xa38] sm:$0xff] }
 0x530   : > { %1892 = vmatpush.msrb.mxu3 %v1691_v55  ;;  %v1788_v55 = vld [vmem:[#allocation8 + $0xa20] sm:$0xff] }
 0x532   : > { %1893 = vmatpush.msrb.mxu3 %v1688_v59  ;;  %v1785_v59 = vld [vmem:[#allocation8 + $0xa08] sm:$0xff] }
 0x534   : > { %1894 = vmatpush.msrb.mxu3 %v1685_v62  ;;  %v1782_v62 = vld [vmem:[#allocation8 + $0x9f0] sm:$0xff] }
 0x536   : > { %1895 = vmatpush.msrb.mxu3 %v1682_v2  ;;  %v1779_v2 = vld [vmem:[#allocation8 + $0x9d8] sm:$0xff] }
 0x538   : > { %1896 = vmatpush.msrb.mxu3 %v1679_v6  ;;  %v1776_v6 = vld [vmem:[#allocation8 + $0x9c0] sm:$0xff] }
 0x592   : > { %v1541_v7 = vpop.xlane.xlu1 %1540 }
 0x593   : > { %v1542_v8 = vmul.f32 0.03125, %v1541_v7  ;;  %v1725_v7 = vld [vmem:[#allocation8 + $0x828] sm:$0xff] }
 0x594   : > { %1916 = vmatpush.msra.mxu1 %v1725_v7  ;;  %v1777_v7 = vld [vmem:[#allocation8 + $0x9c8] sm:$0xff] }
 0x595   : > { %v1543_v10 = vadd.f32 1e-06, %v1542_v8  ;;  %v1674_v8 = vld [vmem:[#allocation8 + $0x690] sm:$0xff] }
 0x596   : > { %1857 = vmatpush.msrb.mxu2 %v1674_v8  ;;  %1917 = vmatpush.msra.mxu1 %v1722_v11  ;;  %v1726_v8 = vld [vmem:[#allocation8 + $0x830] sm:$0xff] }
 0x597   : > { %3029 = vrsqrt.f32 %v1543_v10  ;;  %vm1550_vm7 = vweird.f32 %v1543_v10  ;;  %v1774_v11 = vld [vmem:[#allocation8 + $0x9b0] sm:$0xff] }
 0x598   : > { %1858 = vmatpush.msrb.mxu2 %v1671_v12  ;;  %v1723_v12 = vld [vmem:[#allocation8 + $0x818] sm:$0xff] }
 0x59a   : > { %1859 = vmatpush.msrb.mxu2 %v1668_v16  ;;  %v1720_v16 = vld [vmem:[#allocation8 + $0x800] sm:$0xff] }
 0x59c   : > { %1860 = vmatpush.msrb.mxu2 %v1665_v21  ;;  %v1717_v21 = vld [vmem:[#allocation8 + $0x7e8] sm:$0xff] }
 0x59d   : > { %v3030_v15 = vpop.eup %3029 }
 0x59e   : > { %v1545_v17 = vmul.f32 %v3030_v15, %v1543_v10  ;;  %vm1551_vm6 = vweird.f32 %v3030_v15  ;;  %v1676_v10 = vld [vmem:[#allocation8 + $0x6a0] sm:$0xff]  ;;  %1861 = vmatpush.msrb.mxu2 %v1662_v25  ;;  %v1714_v25 = vld [vmem:[#allocation8 + $0x7d0] sm:$0xff] }
 0x59f   : > { %vm1552_vm8 = vmor %vm1550_vm7, %vm1551_vm6  ;;  %1897 = vmatpush.msrb.mxu3 %v1676_v10  ;;  %v1773_v10 = vld [vmem:[#allocation8 + $0x9a8] sm:$0xff] }
 0x5a0   : > { %v1546_v19 = vmul.f32 %v3030_v15, %v1545_v17  ;;  %v1669_v17 = vld [vmem:[#allocation8 + $0x668] sm:$0xff] }
 0x5a1   : > { %1898 = vmatpush.msrb.mxu3 %v1673_v14  ;;  %1879 = vmatpush.msrb.mxu0 %v1669_v17  ;;  %v1770_v14 = vld [vmem:[#allocation8 + $0x990] sm:$0xff]  ;;  %v1721_v17 = vld [vmem:[#allocation8 + $0x808] sm:$0xff] }
 0x5a2   : > { %v1547_v23 = vmul.f32 0.5, %v1546_v19  ;;  %v1716_v19 = vld [vmem:[#allocation8 + $0x7e0] sm:$0xff] }
 0x5a3   : > { %1899 = vmatpush.msrb.mxu3 %v1670_v18  ;;  %v1767_v18 = vld [vmem:[#allocation8 + $0x978] sm:$0xff] }
 0x5a4   : > { %v1548_v22 = vsub.f32 1.5, %v1547_v23  ;;  %v1666_v23 = vld [vmem:[#allocation8 + $0x650] sm:$0xff] }
 0x5a5   : > { %1880 = vmatpush.msrb.mxu0 %v1666_v23  ;;  %1900 = vmatpush.msrb.mxu3 %v1667_v24  ;;  %v1718_v23 = vld [vmem:[#allocation8 + $0x7f0] sm:$0xff]  ;;  %v1764_v24 = vld [vmem:[#allocation8 + $0x960] sm:$0xff] }
 0x5a6   : > { %v1549_v26 = vmul.f32 %v3030_v15, %v1548_v22  ;;  %v1713_v22 = vld [vmem:[#allocation8 + $0x7c8] sm:$0xff] }
 0x5a8   : > { %v1553_v28 = vsel %vm1552_vm8, %v3030_v15, %v1549_v26  ;;  %v1719_v15 = vld [vmem:[#allocation8 + $0x7f8] sm:$0xff] }
 0x5a9   : > { %v1554_v29 = vmul.f32 %v1553_v28, %v3757_v52  ;;  %1918 = vmatpush.msra.mxu1 %v1719_v15  ;;  %v1663_v26 = vld [vmem:[#allocation8 + $0x638] sm:$0xff]  ;;  %v1710_v28 = vld [vmem:[#allocation8 + $0x7b0] sm:$0xff] }
 0x5aa   : > { %1881 = vmatpush.msrb.mxu0 %v1663_v26  ;;  %v1771_v15 = vld [vmem:[#allocation8 + $0x998] sm:$0xff] }
 0x5ab   : > { %v1558_v30 = vmul.f32 %v3008_v27, %v1554_v29  ;;  %1919 = vmatpush.msra.mxu1 %v1716_v19  ;;  %v1664_v27 = vld [vmem:[#allocation8 + $0x640] sm:$0xff]  ;;  %v1659_v29 = vld [vmem:[#allocation8 + $0x618] sm:$0xff] }
 0x5ac   : > { %1901 = vmatpush.msrb.mxu3 %v1664_v27  ;;  %1862 = vmatpush.msrb.mxu2 %v1659_v29  ;;  %v1768_v19 = vld [vmem:[#allocation8 + $0x980] sm:$0xff]  ;;  %v1715_v26 = vld [vmem:[#allocation8 + $0x7d8] sm:$0xff]  ;;  %v1761_v27 = vld [vmem:[#allocation8 + $0x948] sm:$0xff] }
 0x5ad   : > { %1591 = vmatmul.f32.vlgmr.msra.gmra.mxu3 %v1558_v30  ;;  %1920 = vmatpush.msra.mxu1 %v1713_v22  ;;  %v1660_v30 = vld [vmem:[#allocation8 + $0x620] sm:$0xff]  ;;  %v1765_v22 = vld [vmem:[#allocation8 + $0x968] sm:$0xff]  ;;  %v1711_v29 = vld [vmem:[#allocation8 + $0x7b8] sm:$0xff] }
 0x5ae   : > { %1882 = vmatpush.msrb.mxu0 %v1660_v30  ;;  %1902 = vmatpush.msrb.mxu3 %v1661_v32  ;;  %v1712_v30 = vld [vmem:[#allocation8 + $0x7c0] sm:$0xff]  ;;  %v1759_v32 = vld [vmem:[#allocation8 + $0x938] sm:$0xff] }
 0x5af   : > { %1921 = vmatpush.msra.mxu1 %v1710_v28  ;;  %1863 = vmatpush.msrb.mxu2 %v1656_v35  ;;  %v1762_v28 = vld [vmem:[#allocation8 + $0x950] sm:$0xff]  ;;  %v1709_v35 = vld [vmem:[#allocation8 + $0x7a8] sm:$0xff] }
 0x5b0   : > { %1883 = vmatpush.msrb.mxu0 %v1657_v36  ;;  %1903 = vmatpush.msrb.mxu3 %v1658_v38  ;;  %v1755_v36 = vld [vmem:[#allocation8 + $0x918] sm:$0xff]  ;;  %v1756_v38 = vld [vmem:[#allocation8 + $0x920] sm:$0xff] }
 0x5b1   : > { %1928 = vmatpush.msra.mxu2 %v1750_v41  ;;  %v1752_v41 = vld [vmem:[#allocation8 + $0x900] sm:$0xff] }
 0x5b2   : > { %1948 = vmatpush.msra.mxu0 %v1751_v42  ;;  %1968 = vmatpush.msra.mxu3 %v1797_v43  ;;  %v1753_v42 = vld [vmem:[#allocation8 + $0x908] sm:$0xff] }
 0x5b3   : > { %1929 = vmatpush.msra.mxu2 %v1747_v44 }
 0x5b4   : > { %1949 = vmatpush.msra.mxu0 %v1748_v45  ;;  %1969 = vmatpush.msra.mxu3 %v1794_v46 }
 0x5b5   : > { %1930 = vmatpush.msra.mxu2 %v1744_v48 }
 0x5b6   : > { %1950 = vmatpush.msra.mxu0 %v1745_v49  ;;  %1970 = vmatpush.msra.mxu3 %v1791_v37 }
 0x5b7   : > { %1931 = vmatpush.msra.mxu2 %v1741_v51 }
 0x5b8   : > { %1951 = vmatpush.msra.mxu0 %v1742_v53  ;;  %1971 = vmatpush.msra.mxu3 %v1788_v55 }
 0x5b9   : > { %1932 = vmatpush.msra.mxu2 %v1738_v57  ;;  %v1845_v57 = vld [vmem:[#allocation8 + $0xbe8] sm:$0xff] }
 0x5ba   : > { %1952 = vmatpush.msra.mxu0 %v1739_v58  ;;  %1972 = vmatpush.msra.mxu3 %v1785_v59  ;;  %v1846_v58 = vld [vmem:[#allocation8 + $0xbf0] sm:$0xff]  ;;  %v1847_v59 = vld [vmem:[#allocation8 + $0xbf8] sm:$0xff] }
 0x5bb   : > { %1933 = vmatpush.msra.mxu2 %v1735_v61  ;;  %v1842_v61 = vld [vmem:[#allocation8 + $0xbd0] sm:$0xff] }
 0x5bc   : > { %1953 = vmatpush.msra.mxu0 %v1736_v20  ;;  %1973 = vmatpush.msra.mxu3 %v1782_v62  ;;  %v1843_v20 = vld [vmem:[#allocation8 + $0xbd8] sm:$0xff]  ;;  %v1844_v62 = vld [vmem:[#allocation8 + $0xbe0] sm:$0xff] }
 0x5bd   : > { %1934 = vmatpush.msra.mxu2 %v1732_v0  ;;  %v1839_v0 = vld [vmem:[#allocation8 + $0xbb8] sm:$0xff] }
 0x5be   : > { %1954 = vmatpush.msra.mxu0 %v1733_v1  ;;  %1974 = vmatpush.msra.mxu3 %v1779_v2  ;;  %v1840_v1 = vld [vmem:[#allocation8 + $0xbc0] sm:$0xff]  ;;  %v1841_v2 = vld [vmem:[#allocation8 + $0xbc8] sm:$0xff] }
 0x5bf   : > { %1935 = vmatpush.msra.mxu2 %v1729_v4  ;;  %v1836_v4 = vld [vmem:[#allocation8 + $0xba0] sm:$0xff] }
 0x5c0   : > { %1955 = vmatpush.msra.mxu0 %v1730_v5  ;;  %1975 = vmatpush.msra.mxu3 %v1776_v6  ;;  %v1837_v5 = vld [vmem:[#allocation8 + $0xba8] sm:$0xff]  ;;  %v1838_v6 = vld [vmem:[#allocation8 + $0xbb0] sm:$0xff] }
 0x5c1   : > { %1936 = vmatpush.msra.mxu2 %v1726_v8  ;;  %v1833_v8 = vld [vmem:[#allocation8 + $0xb88] sm:$0xff] }
 0x5c2   : > { %1956 = vmatpush.msra.mxu0 %v1727_v9  ;;  %1976 = vmatpush.msra.mxu3 %v1773_v10  ;;  %v1834_v9 = vld [vmem:[#allocation8 + $0xb90] sm:$0xff]  ;;  %v1835_v10 = vld [vmem:[#allocation8 + $0xb98] sm:$0xff] }
 0x5c3   : > { %1937 = vmatpush.msra.mxu2 %v1723_v12  ;;  %v1830_v12 = vld [vmem:[#allocation8 + $0xb70] sm:$0xff] }
 0x5c4   : > { %1957 = vmatpush.msra.mxu0 %v1724_v13  ;;  %1977 = vmatpush.msra.mxu3 %v1770_v14  ;;  %v1831_v13 = vld [vmem:[#allocation8 + $0xb78] sm:$0xff]  ;;  %v1832_v14 = vld [vmem:[#allocation8 + $0xb80] sm:$0xff] }
 0x5c5   : > { %1938 = vmatpush.msra.mxu2 %v1720_v16  ;;  %v1827_v16 = vld [vmem:[#allocation8 + $0xb58] sm:$0xff] }
 0x5c6   : > { %1958 = vmatpush.msra.mxu0 %v1721_v17  ;;  %1978 = vmatpush.msra.mxu3 %v1767_v18  ;;  %v1828_v17 = vld [vmem:[#allocation8 + $0xb60] sm:$0xff]  ;;  %v1829_v18 = vld [vmem:[#allocation8 + $0xb68] sm:$0xff] }
 0x5c7   : > { %1939 = vmatpush.msra.mxu2 %v1717_v21  ;;  %v1824_v21 = vld [vmem:[#allocation8 + $0xb40] sm:$0xff] }
 0x5c8   : > { %1959 = vmatpush.msra.mxu0 %v1718_v23  ;;  %1979 = vmatpush.msra.mxu3 %v1764_v24  ;;  %v1825_v23 = vld [vmem:[#allocation8 + $0xb48] sm:$0xff]  ;;  %v1826_v24 = vld [vmem:[#allocation8 + $0xb50] sm:$0xff] }
 0x5c9   : > { %1940 = vmatpush.msra.mxu2 %v1714_v25  ;;  %v1821_v25 = vld [vmem:[#allocation8 + $0xb28] sm:$0xff] }
 0x5ca   : > { %1960 = vmatpush.msra.mxu0 %v1715_v26  ;;  %1980 = vmatpush.msra.mxu3 %v1761_v27  ;;  %v1822_v26 = vld [vmem:[#allocation8 + $0xb30] sm:$0xff]  ;;  %v1823_v27 = vld [vmem:[#allocation8 + $0xb38] sm:$0xff] }
 0x5cb   : > { %1941 = vmatpush.msra.mxu2 %v1711_v29  ;;  %v1818_v29 = vld [vmem:[#allocation8 + $0xb10] sm:$0xff] }
 0x5cc   : > { %1961 = vmatpush.msra.mxu0 %v1712_v30  ;;  %v1819_v30 = vld [vmem:[#allocation8 + $0xb18] sm:$0xff] }
 0x5ce   : > { %1962 = vmatpush.msra.mxu0 %v1709_v35  ;;  %v1816_v35 = vld [vmem:[#allocation8 + $0xb00] sm:$0xff] }
 0x630   : > { %v1592_v33 = vpop.f32.mrf.mxu3 }
 0x631   : > { %v1595_v34 = vmax.f32 %v1592_v33, 0.0  ;;  %v1707_v33 = vld [vmem:[#allocation8 + $0x798] sm:$0xff] }
 0x632   : > { %1922 = vmatpush.msra.mxu1 %v1707_v33  ;;  %v1708_v33 = vld [vmem:[#allocation8 + $0x7a0] sm:$0xff] }
 0x633   : > { %1628 = vmatmul.f32.vlgmr.msrb.gmra.mxu1 %v1595_v34  ;;  %1942 = vmatpush.msra.mxu2 %v1708_v33  ;;  %v1815_v33 = vld [vmem:[#allocation8 + $0xaf8] sm:$0xff] }
 0x634   : > { %1923 = vmatpush.msra.mxu1 %v1704_v40  ;;  %v1706_v40 = vld [vmem:[#allocation8 + $0x790] sm:$0xff] }
 0x635   : > { %1963 = vmatpush.msra.mxu0 %v1706_v40  ;;  %v1813_v40 = vld [vmem:[#allocation8 + $0xae8] sm:$0xff] }
 0x6b0   : > { %v1629_v31 = vpop.f32.mrf.mxu1 }
 0x6b1   : > { %v3763_v34 = vadd.f32 %v1629_v31, %v3757_v52  ;;  %v1798_v52 = vld [vmem:[#allocation8 + $0xa70] sm:$0xff] }
 0x6b2   : > { %1988 = vmatpush.msrb.mxu1 %v1798_v52  ;;  %v1758_v31 = vld [vmem:[#allocation8 + $0x930] sm:$0xff] }
 0x6b3   : > { %v1635_v39 = vmul.f32 %v3763_v34, %v3763_v34  ;;  %1981 = vmatpush.msra.mxu3 %v1758_v31  ;;  %v1820_v31 = vld [vmem:[#allocation8 + $0xb20] sm:$0xff] }
 0x6b4   : > { %1989 = vmatpush.msrb.mxu1 %v1795_v47 }
 0x6b5   : > { %1636 = vadd.xlane.f32.xlu2 %v1635_v39  ;;  %1982 = vmatpush.msra.mxu3 %v1755_v36  ;;  %v1705_v39 = vld [vmem:[#allocation8 + $0x788] sm:$0xff] }
 0x6b6   : > { %1990 = vmatpush.msrb.mxu1 %v1792_v50  ;;  %1943 = vmatpush.msra.mxu2 %v1705_v39  ;;  %v3009_v50 = vld [vmem:[#allocation11 + $0x1] ss:$0 sm:$0xff]  ;;  %v1817_v36 = vld [vmem:[#allocation8 + $0xb08] sm:$0xff] }
 0x6b7   : > { %1983 = vmatpush.msra.mxu3 %v1752_v41  ;;  %v1812_v39 = vld [vmem:[#allocation8 + $0xae0] sm:$0xff]  ;;  %v1814_v41 = vld [vmem:[#allocation8 + $0xaf0] sm:$0xff] }
 0x6b8   : > { %1991 = vmatpush.msrb.mxu1 %v1789_v56  ;;  %v1799_v56 = vld [vmem:[#allocation8 + $0xa78] sm:$0xff] }
 0x6ba   : > { %1992 = vmatpush.msrb.mxu1 %v1786_v60  ;;  %v1796_v60 = vld [vmem:[#allocation8 + $0xa60] sm:$0xff] }
 0x6bc   : > { %1993 = vmatpush.msrb.mxu1 %v1783_v63  ;;  %v1793_v63 = vld [vmem:[#allocation8 + $0xa48] sm:$0xff] }
 0x6be   : > { %1994 = vmatpush.msrb.mxu1 %v1780_v3  ;;  %v1790_v3 = vld [vmem:[#allocation8 + $0xa30] sm:$0xff] }
 0x6c0   : > { %1995 = vmatpush.msrb.mxu1 %v1777_v7  ;;  %v1787_v7 = vld [vmem:[#allocation8 + $0xa18] sm:$0xff] }
 0x6c2   : > { %1996 = vmatpush.msrb.mxu1 %v1774_v11  ;;  %v1784_v11 = vld [vmem:[#allocation8 + $0xa00] sm:$0xff] }
 0x6c4   : > { %1997 = vmatpush.msrb.mxu1 %v1771_v15  ;;  %v1781_v15 = vld [vmem:[#allocation8 + $0x9e8] sm:$0xff] }
 0x6c6   : > { %1998 = vmatpush.msrb.mxu1 %v1768_v19  ;;  %v1778_v19 = vld [vmem:[#allocation8 + $0x9d0] sm:$0xff] }
 0x6c8   : > { %1999 = vmatpush.msrb.mxu1 %v1765_v22  ;;  %v1775_v22 = vld [vmem:[#allocation8 + $0x9b8] sm:$0xff] }
 0x6ca   : > { %2000 = vmatpush.msrb.mxu1 %v1762_v28  ;;  %v1772_v28 = vld [vmem:[#allocation8 + $0x9a0] sm:$0xff] }
 0x6cc   : > { %2001 = vmatpush.msrb.mxu1 %v1759_v32  ;;  %v1769_v32 = vld [vmem:[#allocation8 + $0x988] sm:$0xff] }
 0x6ce   : > { %2002 = vmatpush.msrb.mxu1 %v1756_v38  ;;  %v1766_v38 = vld [vmem:[#allocation8 + $0x970] sm:$0xff] }
 0x6d0   : > { %2003 = vmatpush.msrb.mxu1 %v1753_v42  ;;  %v1763_v42 = vld [vmem:[#allocation8 + $0x958] sm:$0xff] }
 0x728   : > { %v1637_v43 = vpop.xlane.xlu2 %1636 }
 0x729   : > { %v1638_v52 = vmul.f32 0.03125, %v1637_v43  ;;  %v1809_v43 = vld [vmem:[#allocation8 + $0xac8] sm:$0xff] }
 0x72b   : > { %v1639_v44 = vadd.f32 1e-06, %v1638_v52  ;;  %v1810_v52 = vld [vmem:[#allocation8 + $0xad0] sm:$0xff] }
 0x72d   : > { %3031 = vrsqrt.f32 %v1639_v44  ;;  %vm1646_vm10 = vweird.f32 %v1639_v44 }
 0x733   : > { %v3032_v45 = vpop.eup %3031 }
 0x734   : > { %v1641_v46 = vmul.f32 %v3032_v45, %v1639_v44  ;;  %vm1647_vm9 = vweird.f32 %v3032_v45  ;;  %v1811_v44 = vld [vmem:[#allocation8 + $0xad8] sm:$0xff] }
 0x735   : > { %vm1648_vm11 = vmor %vm1646_vm10, %vm1647_vm9 }
 0x736   : > { %v1642_v47 = vmul.f32 %v3032_v45, %v1641_v46  ;;  %v1806_v46 = vld [vmem:[#allocation8 + $0xab0] sm:$0xff] }
 0x738   : > { %v1643_v48 = vmul.f32 0.5, %v1642_v47  ;;  %v1807_v47 = vld [vmem:[#allocation8 + $0xab8] sm:$0xff] }
 0x73a   : > { %v1644_v49 = vsub.f32 1.5, %v1643_v48  ;;  %v1808_v48 = vld [vmem:[#allocation8 + $0xac0] sm:$0xff] }
 0x73c   : > { %v1645_v37 = vmul.f32 %v3032_v45, %v1644_v49  ;;  %v1757_v49 = vld [vmem:[#allocation8 + $0x928] sm:$0xff] }
 0x73e   : > { %v1649_v51 = vsel %vm1648_vm11, %v3032_v45, %v1645_v37  ;;  %v1760_v45 = vld [vmem:[#allocation8 + $0x940] sm:$0xff]  ;;  %v1803_v37 = vld [vmem:[#allocation8 + $0xa98] sm:$0xff] }
 0x73f   : > { %v1650_v53 = vmul.f32 %v1649_v51, %v3763_v34  ;;  %v1805_v51 = vld [vmem:[#allocation8 + $0xaa8] sm:$0xff] }
 0x741   : > { %v3768_v55 = vmul.f32 %v3009_v50, %v1650_v53  ;;  %v1804_v50 = vld [vmem:[#allocation8 + $0xaa0] sm:$0xff]  ;;  %v1754_v53 = vld [vmem:[#allocation8 + $0x910] sm:$0xff] }
 0x743   : > { %1864 = vmatmul.f32.vlgmr.msrb.gmra.mxu2 %v3768_v55  ;;  %1884 = vmatmul.f32.vlgmr.msrb.gmra.mxu0 %v3768_v55 }
 0x744   : > { %1904 = vmatmul.f32.vlgmr.msrb.gmra.mxu3 %v3768_v55  ;;  %1924 = vmatmul.f32.vlgmr.msra.gmra.mxu1 %v3768_v55 }
 0x745   : > { %2008 = vmatpush.msrb.mxu2 %v1799_v56  ;;  %2028 = vmatpush.msrb.mxu0 %v1845_v57  ;;  %v1800_v56 = vld [vmem:[#allocation8 + $0xa80] sm:$0xff]  ;;  %v1801_v57 = vld [vmem:[#allocation8 + $0xa88] sm:$0xff] }
 0x746   : > { %2048 = vmatpush.msrb.mxu3 %v1846_v58  ;;  %2068 = vmatpush.msra.mxu1 %v1847_v59  ;;  %v1802_v58 = vld [vmem:[#allocation8 + $0xa90] sm:$0xff] }
 0x747   : > { %2009 = vmatpush.msrb.mxu2 %v1796_v60  ;;  %2029 = vmatpush.msrb.mxu0 %v1842_v61 }
 0x748   : > { %2049 = vmatpush.msrb.mxu3 %v1843_v20  ;;  %2069 = vmatpush.msra.mxu1 %v1844_v62 }
 0x749   : > { %2010 = vmatpush.msrb.mxu2 %v1793_v63  ;;  %2030 = vmatpush.msrb.mxu0 %v1839_v0 }
 0x74a   : > { %2050 = vmatpush.msrb.mxu3 %v1840_v1  ;;  %2070 = vmatpush.msra.mxu1 %v1841_v2 }
 0x74b   : > { %2011 = vmatpush.msrb.mxu2 %v1790_v3  ;;  %2031 = vmatpush.msrb.mxu0 %v1836_v4 }
 0x74c   : > { %2051 = vmatpush.msrb.mxu3 %v1837_v5  ;;  %2071 = vmatpush.msra.mxu1 %v1838_v6 }
 0x74d   : > { %1944 = vmatmul.f32.vlgmr.msra.gmra.mxu2 %v3768_v55  ;;  %1964 = vmatmul.f32.vlgmr.msra.gmra.mxu0 %v3768_v55 }
 0x74e   : > { %1984 = vmatmul.f32.vlgmr.msra.gmra.mxu3 %v3768_v55  ;;  %2004 = vmatmul.f32.vlgmr.msrb.gmra.mxu1 %v3768_v55 }
 0x74f   : > { %2012 = vmatpush.msrb.mxu2 %v1787_v7  ;;  %2032 = vmatpush.msrb.mxu0 %v1833_v8 }
 0x750   : > { %2052 = vmatpush.msrb.mxu3 %v1834_v9  ;;  %2072 = vmatpush.msra.mxu1 %v1835_v10 }
 0x751   : > { %2013 = vmatpush.msrb.mxu2 %v1784_v11  ;;  %2033 = vmatpush.msrb.mxu0 %v1830_v12 }
 0x752   : > { %2053 = vmatpush.msrb.mxu3 %v1831_v13  ;;  %2073 = vmatpush.msra.mxu1 %v1832_v14 }
 0x753   : > { %2014 = vmatpush.msrb.mxu2 %v1781_v15  ;;  %2034 = vmatpush.msrb.mxu0 %v1827_v16 }
 0x754   : > { %2054 = vmatpush.msrb.mxu3 %v1828_v17  ;;  %2074 = vmatpush.msra.mxu1 %v1829_v18 }
 0x755   : > { %2015 = vmatpush.msrb.mxu2 %v1778_v19  ;;  %2035 = vmatpush.msrb.mxu0 %v1824_v21 }
 0x756   : > { %2055 = vmatpush.msrb.mxu3 %v1825_v23  ;;  %2075 = vmatpush.msra.mxu1 %v1826_v24 }
 0x757   : > { %2016 = vmatpush.msrb.mxu2 %v1775_v22  ;;  %2036 = vmatpush.msrb.mxu0 %v1821_v25 }
 0x758   : > { %2056 = vmatpush.msrb.mxu3 %v1822_v26  ;;  %2076 = vmatpush.msra.mxu1 %v1823_v27 }
 0x759   : > { %2017 = vmatpush.msrb.mxu2 %v1772_v28  ;;  %2037 = vmatpush.msrb.mxu0 %v1818_v29 }
 0x75a   : > { %2057 = vmatpush.msrb.mxu3 %v1819_v30  ;;  %2077 = vmatpush.msra.mxu1 %v1820_v31 }
 0x75b   : > { %2018 = vmatpush.msrb.mxu2 %v1769_v32  ;;  %2038 = vmatpush.msrb.mxu0 %v1815_v33 }
 0x75c   : > { %2058 = vmatpush.msrb.mxu3 %v1816_v35  ;;  %2078 = vmatpush.msra.mxu1 %v1817_v36 }
 0x75d   : > { %2019 = vmatpush.msrb.mxu2 %v1766_v38  ;;  %2039 = vmatpush.msrb.mxu0 %v1812_v39 }
 0x75e   : > { %2059 = vmatpush.msrb.mxu3 %v1813_v40  ;;  %2079 = vmatpush.msra.mxu1 %v1814_v41 }
 0x75f   : > { %2020 = vmatpush.msrb.mxu2 %v1763_v42  ;;  %2040 = vmatpush.msrb.mxu0 %v1809_v43  ;;  %v2320_v42 = vld [vmem:[#allocation9 + $0x278] sm:$0xff]  ;;  %v2319_v43 = vld [vmem:[#allocation9 + $0x270] sm:$0xff] }
 0x760   : > { %2060 = vmatpush.msrb.mxu3 %v1810_v52  ;;  %2080 = vmatpush.msra.mxu1 %v1811_v44  ;;  %v2318_v52 = vld [vmem:[#allocation9 + $0x268] sm:$0xff] }
 0x761   : > { %2021 = vmatpush.msrb.mxu2 %v1760_v45  ;;  %2041 = vmatpush.msrb.mxu0 %v1806_v46  ;;  %v2352_v45 = vld [vmem:[#allocation9 + $0x378] sm:$0xff]  ;;  %v2317_v46 = vld [vmem:[#allocation9 + $0x260] sm:$0xff] }
 0x762   : > { %2061 = vmatpush.msrb.mxu3 %v1807_v47  ;;  %2081 = vmatpush.msra.mxu1 %v1808_v48  ;;  %v2336_v47 = vld [vmem:[#allocation9 + $0x2f8] sm:$0xff]  ;;  %v2351_v48 = vld [vmem:[#allocation9 + $0x370] sm:$0xff] }
 0x763   : > { %2022 = vmatpush.msrb.mxu2 %v1757_v49  ;;  %2042 = vmatpush.msrb.mxu0 %v1803_v37  ;;  %v2335_v49 = vld [vmem:[#allocation9 + $0x2f0] sm:$0xff]  ;;  %v2350_v37 = vld [vmem:[#allocation9 + $0x368] sm:$0xff] }
 0x764   : > { %2062 = vmatpush.msrb.mxu3 %v1804_v50  ;;  %2082 = vmatpush.msra.mxu1 %v1805_v51  ;;  %v2316_v50 = vld [vmem:[#allocation9 + $0x258] sm:$0xff]  ;;  %v2334_v51 = vld [vmem:[#allocation9 + $0x2e8] sm:$0xff] }
 0x765   : > { %2023 = vmatpush.msrb.mxu2 %v1754_v53  ;;  %2043 = vmatpush.msrb.mxu0 %v1800_v56  ;;  %v2349_v53 = vld [vmem:[#allocation9 + $0x360] sm:$0xff]  ;;  %v2315_v56 = vld [vmem:[#allocation9 + $0x250] sm:$0xff] }
 0x766   : > { %2063 = vmatpush.msrb.mxu3 %v1801_v57  ;;  %2083 = vmatpush.msra.mxu1 %v1802_v58  ;;  %v2333_v57 = vld [vmem:[#allocation9 + $0x2e0] sm:$0xff]  ;;  %v2348_v58 = vld [vmem:[#allocation9 + $0x358] sm:$0xff] }
 0x767   : > { %2024 = vmatmul.f32.vlgmr.msrb.gmra.mxu2 %v3768_v55  ;;  %2044 = vmatmul.f32.vlgmr.msrb.gmra.mxu0 %v3768_v55 }
 0x768   : > { %2064 = vmatmul.f32.vlgmr.msrb.gmra.mxu3 %v3768_v55  ;;  %2084 = vmatmul.f32.vlgmr.msra.gmra.mxu1 %v3768_v55 }
 0x769   : > { %2389 = vmatpush.msrb.mxu1 %v2336_v47  ;;  %v2356_v47 = vld [vmem:[#allocation9 + $0x398] sm:$0xff] }
 0x76b   : > { %2390 = vmatpush.msrb.mxu1 %v2335_v49 }
 0x76d   : > { %2391 = vmatpush.msrb.mxu1 %v2334_v51 }
 0x76f   : > { %2392 = vmatpush.msrb.mxu1 %v2333_v57  ;;  %v2491_v57 = vld [vmem:[#allocation12 + $0xf8] sm:$0xff] }
 0x7c0   : > { %v1885_v59 = vpop.f32.mrf.mxu0 }
 0x7c1   : > { %2103 = vmatpush.xpose.msra.mxu2 %v1885_v59  ;;  %v1925_v61 = vpop.f32.mrf.mxu1 }
 0x7c6   : > { %v1865_v60 = vpop.f32.mrf.mxu2 }
 0x7c7   : > { %2104 = vmatmul.f32.vlgmr.msra.gmra.mxu2 %v1865_v60  ;;  %v1905_v63 = vpop.f32.mrf.mxu3  ;;  %v2314_v60 = vld [vmem:[#allocation9 + $0x248] sm:$0xff] }
 0x7ca   : > { %v1965_v20 = vpop.f32.mrf.mxu0 }
 0x7cb   : > { %2253 = vmatpush.msra.mxu0 %v1965_v20  ;;  %v2005_v0 = vpop.f32.mrf.mxu1 }
 0x7cd   : > { %2369 = vmatpush.msrb.mxu0 %v2320_v42  ;;  %v2337_v42 = vld [vmem:[#allocation9 + $0x300] sm:$0xff] }
 0x7cf   : > { %2370 = vmatpush.msrb.mxu0 %v2319_v43  ;;  %v2360_v43 = vld [vmem:[#allocation9 + $0x3b8] sm:$0xff] }
 0x7d0   : > { %v1945_v62 = vpop.f32.mrf.mxu2 }
 0x7d1   : > { %2123 = vmatpush.xpose.msrb.mxu2 %v1945_v62  ;;  %v1985_v1 = vpop.f32.mrf.mxu3  ;;  %2371 = vmatpush.msrb.mxu0 %v2318_v52  ;;  %v2332_v62 = vld [vmem:[#allocation9 + $0x2d8] sm:$0xff]  ;;  %v2321_v52 = vld [vmem:[#allocation9 + $0x280] sm:$0xff] }
 0x7d2   : > { %2393 = vmatpush.msrb.mxu1 %v2332_v62 }
 0x7d3   : > { %2372 = vmatpush.msrb.mxu0 %v2317_v46  ;;  %v2357_v46 = vld [vmem:[#allocation9 + $0x3a0] sm:$0xff] }
 0x7d4   : > { %2124 = vmatmul.f32.vlgmr.msrb.gmra.mxu2 %v1925_v61 }
 0x7d5   : > { %2143 = vmatpush.xpose.msra.mxu2 %v2005_v0  ;;  %2373 = vmatpush.msrb.mxu0 %v2316_v50  ;;  %v2313_v0 = vld [vmem:[#allocation9 + $0x240] sm:$0xff] }
 0x7d6   : > { %v2353_v50 = vld [vmem:[#allocation9 + $0x380] sm:$0xff] }
 0x7d7   : > { %2374 = vmatpush.msrb.mxu0 %v2315_v56 }
 0x7d9   : > { %2375 = vmatpush.msrb.mxu0 %v2314_v60 }
 0x7db   : > { %2376 = vmatpush.msrb.mxu0 %v2313_v0 }
 0x7dc   : > { %2144 = vmatmul.f32.vlgmr.msra.gmra.mxu2 %v1985_v1  ;;  %v2312_v1 = vld [vmem:[#allocation9 + $0x238] sm:$0xff] }
 0x7dd   : > { %2377 = vmatpush.msrb.mxu0 %v2312_v1 }
 0x7e4   : > { %v2045_v55 = vpop.f32.mrf.mxu0 }
 0x7e5   : > { %v2085_v2 = vpop.f32.mrf.mxu1 }
 0x7e6   : > { %2299 = vmatpush.msra.mxu3 %v2085_v2  ;;  %v2311_v2 = vld [vmem:[#allocation9 + $0x230] sm:$0xff] }
 0x7e7   : > { %2378 = vmatpush.msrb.mxu0 %v2311_v2 }
 0x7ea   : > { %v2025_v4 = vpop.f32.mrf.mxu2 }
 0x7eb   : > { %v2065_v3 = vpop.f32.mrf.mxu3 }
 0x7ec   : > { %2163 = vmatpush.xpose.msrb.mxu2 %v2065_v3 }
 0x7ef   : > { %2164 = vmatmul.f32.vlgmr.msrb.gmra.mxu2 %v2045_v55 }
 0x7f0   : > { %2230 = vmatpush.msra.mxu2 %v1905_v63  ;;  %v2347_v63 = vld [vmem:[#allocation9 + $0x350] sm:$0xff] }
 0x7f2   : > { %2276 = vmatpush.msrb.mxu2 %v2025_v4  ;;  %v2310_v4 = vld [vmem:[#allocation9 + $0x228] sm:$0xff] }
 0x7f3   : > { %2379 = vmatpush.msrb.mxu0 %v2310_v4  ;;  %v2487_v4 = vld [vmem:[#allocation12 + $0xd8] sm:$0xff] }
 0x84a   : > { %v2105_v5 = vpop.f32.mrf.mxu2 }
 0x84b   : > { %v2106_v6 = vadd.f32 %v2105_v5, %v3734_v54  ;;  %v2309_v5 = vld [vmem:[#allocation9 + $0x220] sm:$0xff] }
 0x84c   : > { %2380 = vmatpush.msrb.mxu0 %v2309_v5  ;;  %v2486_v5 = vld [vmem:[#allocation12 + $0xd0] sm:$0xff] }
 0x84d   : > { %v2168_v7 = vsel %vm1253_vm5, %v2106_v6, -inf }
 0x84e   : > { %2169 = vmax.xlane.f32.xlu1 %v2168_v7  ;;  %v2308_v7 = vld [vmem:[#allocation9 + $0x218] sm:$0xff] }
 0x84f   : > { %2381 = vmatpush.msrb.mxu0 %v2308_v7  ;;  %v2484_v7 = vld [vmem:[#allocation12 + $0xc0] sm:$0xff] }
 0x857   : > { %v2125_v8 = vpop.f32.mrf.mxu2 }
 0x858   : > { %v2126_v12 = vadd.f32 %v2125_v8, %v3734_v54  ;;  %v2307_v8 = vld [vmem:[#allocation9 + $0x210] sm:$0xff] }
 0x859   : > { %2382 = vmatpush.msrb.mxu0 %v2307_v8  ;;  %v2483_v8 = vld [vmem:[#allocation12 + $0xb8] sm:$0xff] }
 0x85a   : > { %v2171_v13 = vsel %vm1253_vm5, %v2126_v12, -inf }
 0x85f   : > { %v2145_v9 = vpop.f32.mrf.mxu2 }
 0x860   : > { %v2146_v10 = vadd.f32 %v2145_v9, %v3734_v54  ;;  %v2306_v9 = vld [vmem:[#allocation9 + $0x208] sm:$0xff] }
 0x861   : > { %2383 = vmatpush.msrb.mxu0 %v2306_v9  ;;  %v2482_v9 = vld [vmem:[#allocation12 + $0xb0] sm:$0xff] }
 0x862   : > { %v2174_v11 = vsel %vm1253_vm5, %v2146_v10, -inf }
 0x863   : > { %2175 = vmax.xlane.f32.xlu2 %v2174_v11 }
 0x86b   : > { %2172 = vmax.xlane.f32.xlu2 %v2171_v13  ;;  %v2331_v13 = vld [vmem:[#allocation9 + $0x2d0] sm:$0xff] }
 0x86c   : > { %2394 = vmatpush.msrb.mxu1 %v2331_v13  ;;  %v2477_v13 = vld [vmem:[#allocation12 + $0x88] sm:$0xff] }
 0x872   : > { %v2165_v14 = vpop.f32.mrf.mxu2 }
 0x873   : > { %v2166_v15 = vadd.f32 %v2165_v14, %v3734_v54  ;;  %v2346_v14 = vld [vmem:[#allocation9 + $0x348] sm:$0xff] }
 0x875   : > { %v2177_v16 = vsel %vm1253_vm5, %v2166_v15, -inf }
 0x876   : > { %2178 = vmax.xlane.f32.xlu1 %v2177_v16  ;;  %v2345_v16 = vld [vmem:[#allocation9 + $0x340] sm:$0xff] }
 0x8c1   : > { %v2170_v17 = vpop.xlane.xlu1 %2169 }
 0x8c2   : > { %v2180_v18 = vsub.f32 %v2106_v6, %v2170_v17  ;;  %v2368_v17 = vld [vmem:[#allocation9 + $0x3f8] sm:$0xff] }
 0x8c3   : > { %2429 = vmatpush.msrb.mxu3 %v2368_v17  ;;  %v2527_v17 = vld [vmem:[#allocation14 + $0xe8] sm:$0xff] }
 0x8c4   : > { %v2184_v19 = vmul.f32 1.442695, %v2180_v18  ;;  %v2329_v18 = vld [vmem:[#allocation9 + $0x2c0] sm:$0xff] }
 0x8c6   : > { %3033 = vpow2.f32 %v2184_v19  ;;  %v2344_v19 = vld [vmem:[#allocation9 + $0x338] sm:$0xff] }
 0x8cc   : > { %v3034_v21 = vpop.eup %3033 }
 0x8cd   : > { %v2192_v23 = vsel %vm1253_vm5, %v3034_v21, 0.0 }
 0x8ce   : > { %2193 = vadd.xlane.f32.xlu0 %v2192_v23  ;;  %v2366_v23 = vld [vmem:[#allocation9 + $0x3e8] sm:$0xff] }
 0x8d6   : > { %v2176_v24 = vpop.xlane.xlu2 %2175 }
 0x8d7   : > { %v2182_v22 = vsub.f32 %v2146_v10, %v2176_v24  ;;  %v2328_v24 = vld [vmem:[#allocation9 + $0x2b8] sm:$0xff] }
 0x8d9   : > { %v2188_v25 = vmul.f32 1.442695, %v2182_v22  ;;  %v2343_v22 = vld [vmem:[#allocation9 + $0x330] sm:$0xff] }
 0x8db   : > { %3035 = vpow2.f32 %v2188_v25  ;;  %v2365_v25 = vld [vmem:[#allocation9 + $0x3e0] sm:$0xff] }
 0x8de   : > { %v2173_v26 = vpop.xlane.xlu2 %2172 }
 0x8df   : > { %v2181_v27 = vsub.f32 %v2126_v12, %v2173_v26  ;;  %v2305_v12 = vld [vmem:[#allocation9 + $0x200] sm:$0xff]  ;;  %v2327_v26 = vld [vmem:[#allocation9 + $0x2b0] sm:$0xff] }
 0x8e0   : > { %2384 = vmatpush.msrb.mxu0 %v2305_v12  ;;  %v2478_v12 = vld [vmem:[#allocation12 + $0x90] sm:$0xff] }
 0x8e1   : > { %v3036_v28 = vpop.eup %3035  ;;  %v2186_v29 = vmul.f32 1.442695, %v2181_v27  ;;  %v2342_v27 = vld [vmem:[#allocation9 + $0x328] sm:$0xff] }
 0x8e2   : > { %v2198_v54 = vsel %vm1253_vm5, %v3036_v28, 0.0 }
 0x8e3   : > { %3037 = vpow2.f32 %v2186_v29  ;;  %2199 = vadd.xlane.f32.xlu1 %v2198_v54  ;;  %v2326_v29 = vld [vmem:[#allocation9 + $0x2a8] sm:$0xff]  ;;  %v2341_v54 = vld [vmem:[#allocation9 + $0x320] sm:$0xff] }
 0x8e9   : > { %v3792_v30 = vpop.eup %3037  ;;  %v2179_v31 = vpop.xlane.xlu1 %2178 }
 0x8ea   : > { %v2183_v32 = vsub.f32 %v2166_v15, %v2179_v31  ;;  %v2195_v33 = vsel %vm1253_vm5, %v3792_v30, 0.0  ;;  %v2330_v15 = vld [vmem:[#allocation9 + $0x2c8] sm:$0xff]  ;;  %v2325_v31 = vld [vmem:[#allocation9 + $0x2a0] sm:$0xff] }
 0x8eb   : > { %2196 = vadd.xlane.f32.xlu0 %v2195_v33  ;;  %2395 = vmatpush.msrb.mxu1 %v2330_v15  ;;  %v2362_v33 = vld [vmem:[#allocation9 + $0x3c8] sm:$0xff]  ;;  %v2529_v15 = vld [vmem:[#allocation14 + $0xf8] sm:$0xff] }
 0x8ec   : > { %v2190_v35 = vmul.f32 1.442695, %v2183_v32  ;;  %v2340_v32 = vld [vmem:[#allocation9 + $0x318] sm:$0xff] }
 0x8ed   : > { %2396 = vmatpush.msrb.mxu1 %v2329_v18  ;;  %v2526_v18 = vld [vmem:[#allocation14 + $0xe0] sm:$0xff] }
 0x8ee   : > { %3039 = vpow2.f32 %v2190_v35  ;;  %v2324_v35 = vld [vmem:[#allocation9 + $0x298] sm:$0xff] }
 0x8ef   : > { %2397 = vmatpush.msrb.mxu1 %v2328_v24 }
 0x8f1   : > { %2398 = vmatpush.msrb.mxu1 %v2327_v26  ;;  %v2522_v26 = vld [vmem:[#allocation14 + $0xc0] sm:$0xff] }
 0x8f3   : > { %2399 = vmatpush.msrb.mxu1 %v2326_v29  ;;  %v2520_v29 = vld [vmem:[#allocation14 + $0xb0] sm:$0xff] }
 0x8f4   : > { %v3796_v36 = vpop.eup %3039 }
 0x8f5   : > { %v2201_v38 = vsel %vm1253_vm5, %v3796_v36, 0.0  ;;  %2400 = vmatpush.msrb.mxu1 %v2325_v31 }
 0x8f6   : > { %2202 = vadd.xlane.f32.xlu2 %v2201_v38  ;;  %v2361_v38 = vld [vmem:[#allocation9 + $0x3c0] sm:$0xff] }
 0x8f7   : > { %2401 = vmatpush.msrb.mxu1 %v2324_v35  ;;  %v2517_v35 = vld [vmem:[#allocation14 + $0x98] sm:$0xff] }
 0x941   : > { %v2194_v39 = vpop.xlane.xlu0 %2193 }
 0x942   : > { %3041 = vrcp.f32 %v2194_v39  ;;  %v2323_v39 = vld [vmem:[#allocation9 + $0x290] sm:$0xff] }
 0x943   : > { %2402 = vmatpush.msrb.mxu1 %v2323_v39 }
 0x948   : > { %v3042_v40 = vpop.eup %3041 }
 0x949   : > { %v2208_v41 = vmul.f32 %v3042_v40, %v3034_v21  ;;  %v2367_v21 = vld [vmem:[#allocation9 + $0x3f0] sm:$0xff]  ;;  %v2338_v40 = vld [vmem:[#allocation9 + $0x308] sm:$0xff] }
 0x94a   : > { %2430 = vmatpush.msrb.mxu3 %v2367_v21 }
 0x94b   : > { %2851 = vmatmul.msk.f32.vlgmr.msra.gmra.mxu2 %vm1253_vm5, %v2208_v41  ;;  %v2322_v41 = vld [vmem:[#allocation9 + $0x288] sm:$0xff] }
 0x94c   : > { %2409 = vmatpush.msra.mxu2 %v2352_v45  ;;  %2431 = vmatpush.msrb.mxu3 %v2366_v23  ;;  %v2358_v45 = vld [vmem:[#allocation9 + $0x3a8] sm:$0xff]  ;;  %v2525_v23 = vld [vmem:[#allocation14 + $0xd8] sm:$0xff] }
 0x94d   : > { %2403 = vmatpush.msrb.mxu1 %v2322_v41 }
 0x94e   : > { %2410 = vmatpush.msra.mxu2 %v2351_v48  ;;  %2432 = vmatpush.msrb.mxu3 %v2365_v25  ;;  %v2355_v48 = vld [vmem:[#allocation9 + $0x390] sm:$0xff] }
 0x94f   : > { %2404 = vmatpush.msrb.mxu1 %v2321_v52  ;;  %v2523_v25 = vld [vmem:[#allocation14 + $0xc8] sm:$0xff] }
 0x950   : > { %2411 = vmatpush.msra.mxu2 %v2350_v37  ;;  %v2354_v37 = vld [vmem:[#allocation9 + $0x388] sm:$0xff] }
 0x951   : > { %2530 = vmatpush.msra.mxu1 %v2529_v15  ;;  %v2515_v52 = vld [vmem:[#allocation14 + $0x88] sm:$0xff] }
 0x952   : > { %2412 = vmatpush.msra.mxu2 %v2349_v53 }
 0x954   : > { %2413 = vmatpush.msra.mxu2 %v2348_v58  ;;  %v2490_v58 = vld [vmem:[#allocation12 + $0xf0] sm:$0xff] }
 0x956   : > { %v2200_v44 = vpop.xlane.xlu1 %2199  ;;  %2414 = vmatpush.msra.mxu2 %v2347_v63 }
 0x957   : > { %3043 = vrcp.f32 %v2200_v44  ;;  %v2359_v44 = vld [vmem:[#allocation9 + $0x3b0] sm:$0xff] }
 0x958   : > { %2415 = vmatpush.msra.mxu2 %v2346_v14  ;;  %v2476_v14 = vld [vmem:[#allocation12 + $0x80] sm:$0xff] }
 0x95a   : > { %2416 = vmatpush.msra.mxu2 %v2345_v16  ;;  %v2528_v16 = vld [vmem:[#allocation14 + $0xf0] sm:$0xff] }
 0x95b   : > { %2531 = vmatpush.msra.mxu1 %v2528_v16 }
 0x95c   : > { %2417 = vmatpush.msra.mxu2 %v2344_v19 }
 0x95d   : > { %v3044_v59 = vpop.eup %3043  ;;  %2532 = vmatpush.msra.mxu1 %v2527_v17 }
 0x95e   : > { %v2210_v61 = vmul.f32 %v3044_v59, %v3036_v28  ;;  %v2197_v20 = vpop.xlane.xlu0 %2196  ;;  %2418 = vmatpush.msra.mxu2 %v2343_v22  ;;  %v2364_v28 = vld [vmem:[#allocation9 + $0x3d8] sm:$0xff]  ;;  %v2489_v59 = vld [vmem:[#allocation12 + $0xe8] sm:$0xff] }
 0x95f   : > { %3045 = vrcp.f32 %v2197_v20  ;;  %2433 = vmatpush.msrb.mxu3 %v2364_v28  ;;  %2533 = vmatpush.msra.mxu1 %v2526_v18  ;;  %v2524_v22 = vld [vmem:[#allocation14 + $0xd0] sm:$0xff] }
 0x960   : > { %2853 = vmatmul.msk.f32.vlgmr.msrb.gmra.mxu2 %vm1253_vm5, %v2210_v61 }
 0x961   : > { %2419 = vmatpush.msra.mxu2 %v2342_v27  ;;  %2534 = vmatpush.msra.mxu1 %v2525_v23  ;;  %v2521_v27 = vld [vmem:[#allocation14 + $0xb8] sm:$0xff] }
 0x963   : > { %2420 = vmatpush.msra.mxu2 %v2341_v54  ;;  %2535 = vmatpush.msra.mxu1 %v2524_v22 }
 0x965   : > { %v3046_v3 = vpop.eup %3045  ;;  %2421 = vmatpush.msra.mxu2 %v2340_v32  ;;  %2536 = vmatpush.msra.mxu1 %v2523_v25  ;;  %v2518_v32 = vld [vmem:[#allocation14 + $0xa0] sm:$0xff] }
 0x966   : > { %v2209_v55 = vmul.f32 %v3046_v3, %v3792_v30  ;;  %v2363_v30 = vld [vmem:[#allocation9 + $0x3d0] sm:$0xff] }
 0x967   : > { %2434 = vmatpush.msrb.mxu3 %v2363_v30  ;;  %2537 = vmatpush.msra.mxu1 %v2522_v26  ;;  %v2519_v30 = vld [vmem:[#allocation14 + $0xa8] sm:$0xff] }
 0x968   : > { %2852 = vmatmul.msk.f32.vlgmr.msra.gmra.mxu0 %vm1253_vm5, %v2209_v55  ;;  %v2488_v55 = vld [vmem:[#allocation12 + $0xe0] sm:$0xff] }
 0x969   : > { %v2203_v6 = vpop.xlane.xlu2 %2202  ;;  %2435 = vmatpush.msrb.mxu3 %v2362_v33  ;;  %2492 = vmatpush.msra.mxu0 %v2491_v57 }
 0x96a   : > { %3047 = vrcp.f32 %v2203_v6  ;;  %v2485_v6 = vld [vmem:[#allocation12 + $0xc8] sm:$0xff]  ;;  %2538 = vmatpush.msra.mxu1 %v2521_v27  ;;  %v2602_v27 = vstv %s2598_s30 }
 0x96b   : > { %2436 = vmatpush.msrb.mxu3 %v2361_v38  ;;  %2493 = vmatpush.msra.mxu0 %v2490_v58  ;;  %v2516_v38 = vld [vmem:[#allocation14 + $0x90] sm:$0xff] }
 0x96c   : > { %2539 = vmatpush.msra.mxu1 %v2520_v29 }
 0x96d   : > { %2437 = vmatpush.msrb.mxu3 %v2360_v43  ;;  %2494 = vmatpush.msra.mxu0 %v2489_v59 }
 0x96e   : > { %2540 = vmatpush.msra.mxu1 %v2519_v30 }
 0x96f   : > { %2438 = vmatpush.msrb.mxu3 %v2359_v44  ;;  %2495 = vmatpush.msra.mxu0 %v2488_v55  ;;  %v2514_v44 = vld [vmem:[#allocation14 + $0x80] sm:$0xff]  ;;  %v2577_v55 = vstv %s2576_s25 }
 0x970   : > { %v3048_v10 = vpop.eup %3047  ;;  %2541 = vmatpush.msra.mxu1 %v2518_v32 }
 0x971   : > { %v2211_v11 = vmul.f32 %v3048_v10, %v3796_v36  ;;  %v2339_v36 = vld [vmem:[#allocation9 + $0x310] sm:$0xff]  ;;  %2439 = vmatpush.msrb.mxu3 %v2358_v45  ;;  %2496 = vmatpush.msra.mxu0 %v2487_v4  ;;  %v2480_v10 = vld [vmem:[#allocation12 + $0xa0] sm:$0xff] }
 0x972   : > { %2422 = vmatpush.msra.mxu2 %v2339_v36  ;;  %2542 = vmatpush.msra.mxu1 %v2517_v35 }
 0x973   : > { %2854 = vmatmul.msk.f32.vlgmr.msra.gmra.mxu3 %vm1253_vm5, %v2211_v11  ;;  %2497 = vmatpush.msra.mxu0 %v2486_v5  ;;  %v2479_v11 = vld [vmem:[#allocation12 + $0x98] sm:$0xff] }
 0x974   : > { %2423 = vmatpush.msra.mxu2 %v2338_v40  ;;  %2440 = vmatpush.msrb.mxu3 %v2357_v46  ;;  %v3010_v40 = vld [vmem:[#allocation15 + $0x1] ss:$0 sm:$0xff] }
 0x975   : > { %2498 = vmatpush.msra.mxu0 %v2485_v6  ;;  %2543 = vmatpush.msra.mxu1 %v2516_v38 }
 0x976   : > { %2424 = vmatpush.msra.mxu2 %v2337_v42  ;;  %2441 = vmatpush.msrb.mxu3 %v2356_v47 }
 0x977   : > { %2499 = vmatpush.msra.mxu0 %v2484_v7  ;;  %2544 = vmatpush.msra.mxu1 %v2515_v52 }
 0x978   : > { %2442 = vmatpush.msrb.mxu3 %v2355_v48 }
 0x979   : > { %2500 = vmatpush.msra.mxu0 %v2483_v8  ;;  %2545 = vmatpush.msra.mxu1 %v2514_v44 }
 0x97a   : > { %2443 = vmatpush.msrb.mxu3 %v2354_v37 }
 0x97b   : > { %2501 = vmatpush.msra.mxu0 %v2482_v9 }
 0x97c   : > { %2444 = vmatpush.msrb.mxu3 %v2353_v50 }
 0x9ce   : > { %v2232_v49 = vpop.f32.mrf.mxu2 }
 0x9cf   : > { %2385 = vmatmul.f32.vlgmr.msrb.gmra.mxu0 %v2232_v49 }
 0x9e3   : > { %v2278_v51 = vpop.f32.mrf.mxu2 }
 0x9e4   : > { %2425 = vmatmul.f32.vlgmr.msra.gmra.mxu2 %v2278_v51 }
 0x9e5   : > { %v2255_v53 = vpop.f32.mrf.mxu0 }
 0x9e6   : > { %2405 = vmatmul.f32.vlgmr.msrb.gmra.mxu1 %v2255_v53 }
 0x9f6   : > { %v2301_v56 = vpop.f32.mrf.mxu3 }
 0x9f7   : > { %2445 = vmatmul.f32.vlgmr.msrb.gmra.mxu3 %v2301_v56 }
 0xa4c   : > { %v2386_v61 = vpop.f32.mrf.mxu0 }
 0xa63   : > { %v2406_v60 = vpop.f32.mrf.mxu1 }
 0xa64   : > { %v2449_v62 = vadd.f32 %v2406_v60, %v2386_v61 }
 0xa67   : > { %v2426_v20 = vpop.f32.mrf.mxu2 }
 0xa68   : > { %v2450_v63 = vadd.f32 %v2449_v62, %v2426_v20  ;;  %v2551_v20 = vld [vmem:[#allocation17] sm:$0x1] }
 0xa7a   : > { %v2446_v0 = vpop.f32.mrf.mxu3 }
 0xa7b   : > { %v2451_v1 = vadd.f32 %v2450_v63, %v2446_v0  ;;  %v2571_v0 = vld [vmem:[#allocation18] sm:$0x1] }
 0xa7d   : > { %v3807_v2 = vadd.f32 %v2451_v1, %v3763_v34  ;;  %v2481_v34 = vld [vmem:[#allocation12 + $0xa8] sm:$0xff] }
 0xa7e   : > { %2502 = vmatpush.msra.mxu0 %v2481_v34 }
 0xa7f   : > { %v2455_v3 = vmul.f32 %v3807_v2, %v3807_v2 }
 0xa80   : > { %2503 = vmatpush.msra.mxu0 %v2480_v10 }
 0xa81   : > { %2456 = vadd.xlane.f32.xlu1 %v2455_v3 }
 0xa82   : > { %2504 = vmatpush.msra.mxu0 %v2479_v11 }
 0xa84   : > { %2505 = vmatpush.msra.mxu0 %v2478_v12 }
 0xa86   : > { %2506 = vmatpush.msra.mxu0 %v2477_v13 }
 0xa88   : > { %2507 = vmatpush.msra.mxu0 %v2476_v14 }
 0xaf4   : > { %v2457_v19 = vpop.xlane.xlu1 %2456 }
 0xaf5   : > { %v2458_v21 = vmul.f32 0.03125, %v2457_v19 }
 0xaf7   : > { %v2459_v24 = vadd.f32 1e-06, %v2458_v21 }
 0xaf9   : > { %3049 = vrsqrt.f32 %v2459_v24  ;;  %vm2466_vm13 = vweird.f32 %v2459_v24 }
 0xaff   : > { %v3050_v28 = vpop.eup %3049 }
 0xb00   : > { %v2461_v54 = vmul.f32 %v3050_v28, %v2459_v24  ;;  %vm2467_vm12 = vweird.f32 %v3050_v28 }
 0xb01   : > { %vm2468_vm14 = vmor %vm2466_vm13, %vm2467_vm12 }
 0xb02   : > { %v2462_v31 = vmul.f32 %v3050_v28, %v2461_v54 }
 0xb04   : > { %v2463_v33 = vmul.f32 0.5, %v2462_v31 }
 0xb06   : > { %v2464_v36 = vsub.f32 1.5, %v2463_v33 }
 0xb08   : > { %v2465_v39 = vmul.f32 %v3050_v28, %v2464_v36 }
 0xb0a   : > { %v2469_v41 = vsel %vm2468_vm14, %v3050_v28, %v2465_v39  ;;  %v2609_v28 = vstv %s2608_s5 }
 0xb0b   : > { %v2470_v42 = vmul.f32 %v2469_v41, %v3807_v2 }
 0xb0d   : > { %v2474_v43 = vmul.f32 %v3010_v40, %v2470_v42 }
 0xb0f   : > { %2508 = vmatmul.f32.vlgmr.msra.gmra.mxu0 %v2474_v43 }
 0xb8c   : > { %v2509_v45 = vpop.f32.mrf.mxu0 }
 0xb8d   : > { %v2512_v46 = vmax.f32 %v2509_v45, 0.0 }
 0xb8f   : > { %2546 = vmatmul.f32.vlgmr.msra.gmra.mxu1 %v2512_v46 }
 0xc0c   : > { %v2547_v47 = vpop.f32.mrf.mxu1 }
 0xc0d   : > { %v2550_v48 = vadd.f32 %v2547_v47, %v3807_v2 }
 0xc0f   : > { %v2552_v49 = vmul.f32 %v2550_v48, %v2550_v48 }
 0xc11   : > { %v2554_v37 = vsel %vm2553_vm15, %v2552_v49, 0.0 }
 0xc12   : > { %2555 = vadd.xlane.f32.xlu2 %v2554_v37 }
 0xc85   : > { %v2556_v50 = vpop.xlane.xlu2 %2555 }
 0xc86   : > { %v2557_v51 = vmul.f32 0.03125, %v2556_v50 }
 0xc88   : > { %v2558_v53 = vadd.f32 1e-06, %v2557_v51 }
 0xc8a   : > { %3051 = vrsqrt.f32 %v2558_v53  ;;  %vm2565_vm1 = vweird.f32 %v2558_v53 }
 0xc90   : > { %v3052_v56 = vpop.eup %3051 }
 0xc91   : > { %v2560_v57 = vmul.f32 %v3052_v56, %v2558_v53  ;;  %vm2566_vm0 = vweird.f32 %v3052_v56 }
 0xc92   : > { %vm2567_vm2 = vmor %vm2565_vm1, %vm2566_vm0 }
 0xc93   : > { %v2561_v58 = vmul.f32 %v3052_v56, %v2560_v57 }
 0xc95   : > { %v2562_v59 = vmul.f32 0.5, %v2561_v58 }
 0xc97   : > { %v2563_v60 = vsub.f32 1.5, %v2562_v59 }
 0xc99   : > { %v2564_v61 = vmul.f32 %v3052_v56, %v2563_v60 }
 0xc9b   : > { %v2568_v62 = vsel %vm2567_vm2, %v3052_v56, %v2564_v61 }
 0xc9c   : > { %v2569_v63 = vmul.f32 %v2568_v62, %v2550_v48 }
 0xc9e   : > { %v2570_v1 = vmul.f32 %v2569_v63, %v2551_v20 }
 0xca0   : > { %v2572_v2 = vmul.f32 %v2571_v0, %v2570_v1 }
 0xca2   : > { %v2573_v3 = vsel %vm2553_vm15, %v2572_v2, 0.0 }
 0xca3   : > { %2574 = vadd.xlane.f32.xlu0 %v2573_v3 }
 0xd16   : > { %v2575_v4 = vpop.xlane.xlu0 %2574 }
 0xd17   : > { %v2578_v5 = vadd.f32 %v2577_v55, %v2575_v4 }
 0xd19   : > { %v2579_v6 = vsub.f32 0.0, %v2578_v5 }
 0xd1b   : > { %v2580_v7 = vmul.f32 1.442695, %v2579_v6 }
 0xd1d   : > { %3053 = vpow2.f32 %v2580_v7 }
 0xd23   : > { %v3054_v8 = vpop.eup %3053 }
 0xd24   : > { %v2582_v9 = vadd.f32 1.0, %v3054_v8 }
 0xd26   : > { %3055 = vrcp.f32 %v2582_v9  ;;  %v2594_v12 = vand.u32 2147483648, %v2582_v9  ;;  %v2592_v14 = vand.u32 2147483647, %v2582_v9  ;;  %vm2588_vm4 = vweird.f32 %v2582_v9 }
 0xd28   : > { %v2595_v16 = vor.u32 1.1754944e-38, %v2594_v12  ;;  %vm2593_vm6 = vcmp.eq.f32.partialorder %v2592_v14, 8.507059e+37 }
 0xd2c   : > { %v3056_v34 = vpop.eup %3055 }
 0xd2d   : > { %v2584_v10 = vmul.f32 %v3056_v34, %v2582_v9  ;;  %vm2589_vm3 = vweird.f32 %v3056_v34 }
 0xd2e   : > { %vm2590_vm5 = vmor %vm2588_vm4, %vm2589_vm3 }
 0xd2f   : > { %v2585_v11 = vsub.f32 1.0, %v2584_v10 }
 0xd31   : > { %v2586_v13 = vmul.f32 %v3056_v34, %v2585_v11 }
 0xd33   : > { %v2587_v15 = vadd.f32 %v3056_v34, %v2586_v13 }
 0xd35   : > { %v2591_v17 = vsel %vm2590_vm5, %v3056_v34, %v2587_v15 }
 0xd36   : > { %v2596_v18 = vsel %vm2593_vm6, %v2595_v16, %v2591_v17 }
 0xd37   : > { %v2599_v19 = vadd.f32 1e-10, %v2596_v18  ;;  %v2604_v21 = vsub.f32 1.0, %v2596_v18  ;;  %v2612_v23 = vperm.slane %v2596_v18, 0 }
 0xd39   : > { %3057 = vlog2.f32 %v2599_v19  ;;  %v2605_v24 = vadd.f32 1e-10, %v2604_v21  ;;  %2613 = vst [vmem:[%s664_s20] sm:$0xff] %v2612_v23 }
 0xd3b   : > { %3059 = vlog2.f32 %v2605_v24 }
 0xd3f   : > { %v3058_v22 = vpop.eup %3057 }
 0xd40   : > { %v2601_v25 = vmul.f32 0.6931472, %v3058_v22 }
 0xd41   : > { %v3060_v26 = vpop.eup %3059 }
 0xd42   : > { %v2607_v29 = vmul.f32 0.6931472, %v3060_v26  ;;  %v2603_v54 = vmul.f32 %v2602_v27, %v2601_v25 }
 0xd44   : > { %v2610_v30 = vmul.f32 %v2609_v28, %v2607_v29 }
 0xd46   : > { %v2611_v31 = vadd.f32 %v2610_v30, %v2603_v54 }
 0xd48   : > { %v2614_v32 = vperm.slane %v2611_v31, 0 }
 0xd4a   : > { %2615 = vst [vmem:[%s668_s6] sm:$0xff] %v2614_v32 }
 0xd4b PF: > { %p32_p1 = scmp.ge.s32.totalorder %s3634_s24, 4   ;;  %s3874_s15 = smov %s3426_s16 }
 0xd4c   : > { %s3875_s16 = smov %s3430_s17  ;;  %s3876_s17 = smov %s3646_s11 }
 0xd4d   : > { %s3877_s18 = smov %s3634_s24  ;;  %34 = sbr.rel (!%p32_p1) target bundleno = 18 (0x12), region = 174 }
 0xd52   :  { %2649 = vsyncpa [#allocation4], 1 }
 0xd53   :  { %2651 = vsyncpa [#allocation4 + $0x1], 1 }
 0xd54   :  { %2652 = vsyncpa [#allocation7], 1 }
 0xd55   :  { %2653 = vsyncpa [#allocation10], 1 }
 0xd56   :  { %2654 = vsyncpa [#allocation13], 1 }
 0xd57   :  { %2655 = vsyncpa [#allocation16], 1 }
 0xd58   :  { %2656 = vsyncpa [#allocation19], 1 }
 0xd59   :  { %2657 = vsyncpa [#allocation5], 1 }
 0xd5a   :  { %2659 = vsyncpa [#allocation5 + $0x1], 1 }

</bundles_post_ra>
